<compile_context>
chip_gen: v7x
topology: tpu7x:2x2x1
jax: 0.10.0
libtpu: 0.0.40
codegen_flags: <defaults>
</compile_context>

<pallas_src>
import functools

import jax
import jax.numpy as jnp
from jax import lax
from jax.experimental import pallas as pl
from jax.experimental.pallas import tpu as pltpu


# ----------------------------------------------------------------------------
# Kernel 1: fused QKV projection  (one MXU pass, lane-dense [tile_r, 3*hid] out)
# ----------------------------------------------------------------------------
def _qkv_proj_kernel(x_ref, w_ref, b_ref, qkv_ref):
    # x_ref  : [tile_r, C]      (bf16)
    # w_ref  : [C, 3*hid]       (bf16)   fused [Wk^T | Wq^T | Wv^T]
    # b_ref  : [1, 3*hid]       (f32)
    # qkv_ref: [tile_r, 3*hid]  (bf16)
    acc = jnp.dot(x_ref[...], w_ref[...], preferred_element_type=jnp.float32)
    qkv_ref[...] = (acc + b_ref[...]).astype(qkv_ref.dtype)


# ----------------------------------------------------------------------------
# Kernel 2: flash attention (online softmax) + mask 1x1-conv + residual add
# ----------------------------------------------------------------------------
def _flash_attn_mask_kernel(k_ref, q_ref, v_ref, wm_ref, bm_ref, res_ref,
                            o_ref, m_sc, l_sc, acc_sc):
    # k_ref : [tile_r, hid]   row tile of K (bf16)
    # q_ref : [tile_kv, hid]  kv tile of Q (bf16)
    # v_ref : [tile_kv, hid]  kv tile of V (bf16)
    # wm_ref: [hid, C]        mask conv weight^T (bf16)
    # bm_ref: [1, C]          mask conv bias (f32)
    # res_ref: [tile_r, C]    spatially-swapped feature tokens (f32) residual
    # o_ref : [tile_r, C]     output tokens (f32)
    s_idx = pl.program_id(1)

    @pl.when(s_idx == 0)
    def _init():
        m_sc[...] = jnp.full(m_sc.shape, -jnp.inf, m_sc.dtype)
        l_sc[...] = jnp.zeros(l_sc.shape, l_sc.dtype)
        acc_sc[...] = jnp.zeros(acc_sc.shape, acc_sc.dtype)

    # S[i, j] = K_tile[i] . Q_kv[j]   (== torch.matmul(k, q) with q already ^T)
    s = lax.dot_general(k_ref[...], q_ref[...],
                        (((1,), (1,)), ((), ())),
                        preferred_element_type=jnp.float32)        # [tile_r, tile_kv]

    # online softmax (f32 statistics)
    m_prev = m_sc[...]
    m_new = jnp.maximum(m_prev, jnp.max(s, axis=-1, keepdims=True))
    alpha = jnp.exp(m_prev - m_new)
    p = jnp.exp(s - m_new)
    l_sc[...] = alpha * l_sc[...] + jnp.sum(p, axis=-1, keepdims=True)
    acc_sc[...] = alpha * acc_sc[...] + jnp.dot(
        p.astype(v_ref.dtype), v_ref[...],
        preferred_element_type=jnp.float32)                         # [tile_r, hid]
    m_sc[...] = m_new

    @pl.when(s_idx == pl.num_programs(1) - 1)
    def _finalize():
        # single per-tile 1/l scale on the EUP (not a [tile_r, N] VPU multiply)
        a = acc_sc[...] * pl.reciprocal(l_sc[...], approx=True)
        mask = jnp.dot(a.astype(wm_ref.dtype), wm_ref[...],
                       preferred_element_type=jnp.float32) + bm_ref[...]
        o_ref[...] = (mask + res_ref[...]).astype(o_ref.dtype)


# ----------------------------------------------------------------------------
# Wrapper
# ----------------------------------------------------------------------------
@functools.partial(jax.jit, static_argnames=("tile_r", "tile_kv"))
def non_local_self_attention(feature, params, *, tile_r=256, tile_kv=512):
    n, C, h, w = feature.shape
    # The module's final spatial-swap + residual only type-checks when h == w.
    assert h == w, "NonLocalSelfAttention residual add requires h == w"
    hid = C // 2
    N = n * h * w

    tile_r = min(tile_r, N)
    tile_kv = min(tile_kv, N)
    assert N % tile_r == 0 and N % tile_kv == 0, "N must be divisible by tiles"

    f32, bf16 = jnp.float32, jnp.bfloat16

    # NCHW -> tokens [N, C], token = b*h*w + y*w + x.  bf16 for MXU peak.
    x_bf16 = jnp.transpose(feature, (0, 2, 3, 1)).reshape(N, C).astype(bf16)

    # Spatially-swapped feature tokens for the fused residual add:
    #   res[b*h*w + i*w + j, c] = feature[b, c, j, i]   (valid since h == w)
    res_tok = jnp.transpose(feature, (0, 3, 2, 1)).reshape(N, C).astype(f32)

    # Fused QKV weight [C, 3*hid] and bias [1, 3*hid]; mask conv weight^T.
    w_qkv = jnp.concatenate(
        [params["Wk"].T, params["Wq"].T, params["Wv"].T], axis=1).astype(bf16)
    b_qkv = jnp.concatenate(
        [params["bk"], params["bq"], params["bv"]]).reshape(1, 3 * hid).astype(f32)
    wm_t = params["Wm"].T.astype(bf16)                      # [hid, C]
    bm = params["bm"].reshape(1, C).astype(f32)

    vmem_cap = 48 * 1024 * 1024   # above v5e/v6e scoped defaults, below v7x 64 MiB

    # ---- Kernel 1: QKV projection (computed once, hoisted out of attention) --
    qkv = pl.pallas_call(
        _qkv_proj_kernel,
        out_shape=jax.ShapeDtypeStruct((N, 3 * hid), bf16),
        grid_spec=pltpu.PrefetchScalarGridSpec(
            num_scalar_prefetch=0,
            grid=(N // tile_r,),
            in_specs=[
                pl.BlockSpec((tile_r, C), lambda i: (i, 0)),       # x row tile
                pl.BlockSpec((C, 3 * hid), lambda i: (0, 0)),      # Wqkv
                pl.BlockSpec((1, 3 * hid), lambda i: (0, 0)),      # bqkv
            ],
            out_specs=pl.BlockSpec((tile_r, 3 * hid), lambda i: (i, 0)),
        ),
        compiler_params=pltpu.CompilerParams(
            dimension_semantics=("parallel",),
            vmem_limit_bytes=vmem_cap),
    )(x_bf16, w_qkv, b_qkv)

    k_all = qkv[:, :hid]
    q_all = qkv[:, hid:2 * hid]
    v_all = qkv[:, 2 * hid:]

    # ---- Kernel 2: flash attention + mask conv + residual --------------------
    # (On v5e, the Q/V kv-tile BlockSpecs can take pipeline_mode=pl.Buffered(3)
    #  to deepen the DMA pipeline; left at the default depth here.)
    o_tok = pl.pallas_call(
        _flash_attn_mask_kernel,
        out_shape=jax.ShapeDtypeStruct((N, C), f32),
        grid_spec=pltpu.PrefetchScalarGridSpec(
            num_scalar_prefetch=0,
            grid=(N // tile_r, N // tile_kv),
            in_specs=[
                pl.BlockSpec((tile_r, hid), lambda r, s: (r, 0)),   # K row tile
                pl.BlockSpec((tile_kv, hid), lambda r, s: (s, 0)),  # Q kv tile
                pl.BlockSpec((tile_kv, hid), lambda r, s: (s, 0)),  # V kv tile
                pl.BlockSpec((hid, C), lambda r, s: (0, 0)),        # Wm^T
                pl.BlockSpec((1, C), lambda r, s: (0, 0)),          # bm
                pl.BlockSpec((tile_r, C), lambda r, s: (r, 0)),     # residual
            ],
            out_specs=pl.BlockSpec((tile_r, C), lambda r, s: (r, 0)),
            scratch_shapes=[
                pltpu.VMEM((tile_r, 1), f32),     # running max
                pltpu.VMEM((tile_r, 1), f32),     # running sum
                pltpu.VMEM((tile_r, hid), f32),   # accumulator
            ],
        ),
        compiler_params=pltpu.CompilerParams(
            dimension_semantics=("parallel", "arbitrary"),
            vmem_limit_bytes=vmem_cap),
    )(k_all, q_all, v_all, wm_t, bm, res_tok)

    # tokens [N, C] -> [n, h, w, C] -> single collapsed transpose to NCHW
    # (w/h swapped == the module's transpose quirk; residual already fused).
    return jnp.transpose(o_tok.reshape(n, h, w, C), (0, 3, 2, 1))


# ----------------------------------------------------------------------------
# Pure-JAX f32 mirror of the PyTorch forward (for verification)
# ----------------------------------------------------------------------------
def reference(feature, params):
    n, C, h, w = feature.shape
    hid = C // 2

    def conv1x1(x, W, b):
        return jnp.einsum("oc,nchw->nohw", W, x) + b[None, :, None, None]

    k = conv1x1(feature, params["Wk"], params["bk"])
    q = conv1x1(feature, params["Wq"], params["bq"])
    v = conv1x1(feature, params["Wv"], params["bv"])

    def tok(t):
        return jnp.transpose(t, (0, 2, 3, 1)).reshape(n * h * w, hid)

    K, Q, V = tok(k), tok(q), tok(v)
    S = K @ Q.T
    P = jax.nn.softmax(S, axis=1)
    A = P @ V
    mask = A.reshape(n, h, w, hid)
    mask = jnp.transpose(mask, (0, 3, 1, 2))   # [n, hid, h, w]
    mask = jnp.transpose(mask, (0, 1, 3, 2))   # [n, hid, w, h]
    out = conv1x1(mask, params["Wm"], params["bm"])
    return out + feature


if __name__ == "__main__":
    n, C, h, w = 2, 4, 16, 16
    hid = C // 2

    key = jax.random.PRNGKey(0)
    ks = jax.random.split(key, 9)
    params = {
        "Wk": 0.1 * jax.random.normal(ks[0], (hid, C), jnp.float32),
        "bk": 0.1 * jax.random.normal(ks[1], (hid,), jnp.float32),
        "Wq": 0.1 * jax.random.normal(ks[2], (hid, C), jnp.float32),
        "bq": 0.1 * jax.random.normal(ks[3], (hid,), jnp.float32),
        "Wv": 0.1 * jax.random.normal(ks[4], (hid, C), jnp.float32),
        "bv": 0.1 * jax.random.normal(ks[5], (hid,), jnp.float32),
        "Wm": 0.1 * jax.random.normal(ks[6], (C, hid), jnp.float32),
        "bm": 0.1 * jax.random.normal(ks[7], (C,), jnp.float32),
    }
    feature = jax.random.normal(ks[8], (n, C, h, w), jnp.float32)

    out = non_local_self_attention(feature, params)
    out = jax.block_until_ready(out)

    ref = reference(feature, params)
    assert out.shape == (n, C, h, w)
    # bf16 matmuls + approx reciprocal vs f32 reference -> relaxed tolerance.
    assert jnp.allclose(out, ref, rtol=2e-2, atol=2e-2), (
        f"max abs err {jnp.max(jnp.abs(out - ref))}")
    print("KERNEL_OK")
</pallas_src>

<mosaic_0001>
module attributes {stable_mosaic.version = 11 : i64} {
  func.func @_qkv_proj_kernel(%arg0: i32, %arg1: memref<256x4xbf16, #tpu.memory_space<vmem>>, %arg2: memref<4x6xbf16, #tpu.memory_space<vmem>>, %arg3: memref<1x6xf32, #tpu.memory_space<vmem>>, %arg4: memref<256x6xbf16, #tpu.memory_space<vmem>>) attributes {dimension_semantics = [#tpu.dimension_semantics<parallel>], iteration_bounds = array<i64: 2>, scalar_prefetch = 0 : i64, scratch_operands = 0 : i64, tpu.core_type = #tpu.core_type<tc>, window_params = [{transform_indices = @transform_0, window_bounds = array<i64: 256, 4>}, {pipeline_mode = #tpu.pipeline_mode<synchronous>, transform_indices = @transform_1, window_bounds = array<i64: 4, 6>}, {pipeline_mode = #tpu.pipeline_mode<synchronous>, transform_indices = @transform_2, window_bounds = array<i64: 1, 6>}, {transform_indices = @transform_3, window_bounds = array<i64: 256, 6>}]} {
    %c0 = arith.constant 0 : index
    %c0_0 = arith.constant 0 : index
    %0 = vector.load %arg1[%c0, %c0_0] : memref<256x4xbf16, #tpu.memory_space<vmem>>, vector<256x4xbf16>
    %c0_1 = arith.constant 0 : index
    %c0_2 = arith.constant 0 : index
    %1 = vector.load %arg2[%c0_1, %c0_2] : memref<4x6xbf16, #tpu.memory_space<vmem>>, vector<4x6xbf16>
    %cst = arith.constant dense<0.000000e+00> : vector<256x6xf32>
    %2 = tpu.matmul %0, %1, %cst {dimension_numbers = #tpu.dot_dimension_numbers<[1], [0], [0], [1], [0, 0, 1, 1], [], []>} : vector<256x4xbf16>, vector<4x6xbf16>, vector<256x6xf32> -> vector<256x6xf32>
    %c0_3 = arith.constant 0 : index
    %c0_4 = arith.constant 0 : index
    %3 = vector.load %arg3[%c0_3, %c0_4] : memref<1x6xf32, #tpu.memory_space<vmem>>, vector<1x6xf32>
    %4 = vector.broadcast %3 : vector<1x6xf32> to vector<256x6xf32>
    %5 = arith.addf %2, %4 : vector<256x6xf32>
    %6 = arith.truncf %5 : vector<256x6xf32> to vector<256x6xbf16>
    %c0_5 = arith.constant 0 : index
    %c0_6 = arith.constant 0 : index
    %7 = vector.load %arg4[%c0_5, %c0_6] : memref<256x6xbf16, #tpu.memory_space<vmem>>, vector<256x6xbf16>
    tpu.vector_store %arg4[%c0_5, %c0_6], %6 {strides = array<i32>} : memref<256x6xbf16, #tpu.memory_space<vmem>>, vector<256x6xbf16>,
    return
  }
  func.func @transform_0(%arg0: i32) -> (i32, i32) {
    %c0_i32 = arith.constant 0 : i32
    %c0_i32_0 = arith.constant 0 : i32
    return %arg0, %c0_i32 : i32, i32
  }
  func.func @transform_1(%arg0: i32) -> (i32, i32) {
    %c0_i32 = arith.constant 0 : i32
    %c0_i32_0 = arith.constant 0 : i32
    %c0_i32_1 = arith.constant 0 : i32
    return %c0_i32, %c0_i32_0 : i32, i32
  }
  func.func @transform_2(%arg0: i32) -> (i32, i32) {
    %c0_i32 = arith.constant 0 : i32
    %c0_i32_0 = arith.constant 0 : i32
    %c0_i32_1 = arith.constant 0 : i32
    return %c0_i32, %c0_i32_0 : i32, i32
  }
  func.func @transform_3(%arg0: i32) -> (i32, i32) {
    %c0_i32 = arith.constant 0 : i32
    %c0_i32_0 = arith.constant 0 : i32
    return %arg0, %c0_i32 : i32, i32
  }
}

module attributes {stable_mosaic.version = 11 : i64} {
  func.func @_flash_attn_mask_kernel(%arg0: i32, %arg1: i32, %arg2: memref<256x2xbf16, #tpu.memory_space<vmem>>, %arg3: memref<512x2xbf16, #tpu.memory_space<vmem>>, %arg4: memref<512x2xbf16, #tpu.memory_space<vmem>>, %arg5: memref<2x4xbf16, #tpu.memory_space<vmem>>, %arg6: memref<1x4xf32, #tpu.memory_space<vmem>>, %arg7: memref<256x4xf32, #tpu.memory_space<vmem>>, %arg8: memref<256x4xf32, #tpu.memory_space<vmem>>, %arg9: memref<256x1xf32, #tpu.memory_space<vmem>>, %arg10: memref<256x1xf32, #tpu.memory_space<vmem>>, %arg11: memref<256x2xf32, #tpu.memory_space<vmem>>) attributes {dimension_semantics = [#tpu.dimension_semantics<parallel>, #tpu.dimension_semantics<arbitrary>], iteration_bounds = array<i64: 2, 1>, scalar_prefetch = 0 : i64, scratch_operands = 3 : i64, tpu.core_type = #tpu.core_type<tc>, window_params = [{transform_indices = @transform_0, window_bounds = array<i64: 256, 2>}, {transform_indices = @transform_1, window_bounds = array<i64: 512, 2>}, {transform_indices = @transform_2, window_bounds = array<i64: 512, 2>}, {pipeline_mode = #tpu.pipeline_mode<synchronous>, transform_indices = @transform_3, window_bounds = array<i64: 2, 4>}, {pipeline_mode = #tpu.pipeline_mode<synchronous>, transform_indices = @transform_4, window_bounds = array<i64: 1, 4>}, {transform_indices = @transform_5, window_bounds = array<i64: 256, 4>}, {transform_indices = @transform_6, window_bounds = array<i64: 256, 4>}]} {
    %c0_i32 = arith.constant 0 : i32
    %0 = arith.cmpi eq, %arg1, %c0_i32 : i32
    %1 = arith.extui %0 : i1 to i32
    %c0_i32_0 = arith.constant 0 : i32
    %2 = arith.cmpi ne, %1, %c0_i32_0 : i32
    scf.if %2 {
      %cst_23 = arith.constant 0xFF800000 : f32
      %33 = vector.broadcast %cst_23 : f32 to vector<256x1xf32>
      %c0_24 = arith.constant 0 : index
      %c0_25 = arith.constant 0 : index
      %34 = vector.load %arg9[%c0_24, %c0_25] : memref<256x1xf32, #tpu.memory_space<vmem>>, vector<256x1xf32>
      tpu.vector_store %arg9[%c0_24, %c0_25], %33 {strides = array<i32>} : memref<256x1xf32, #tpu.memory_space<vmem>>, vector<256x1xf32>,
      %cst_26 = arith.constant 0.000000e+00 : f32
      %35 = vector.broadcast %cst_26 : f32 to vector<256x1xf32>
      %c0_27 = arith.constant 0 : index
      %c0_28 = arith.constant 0 : index
      %36 = vector.load %arg10[%c0_27, %c0_28] : memref<256x1xf32, #tpu.memory_space<vmem>>, vector<256x1xf32>
      tpu.vector_store %arg10[%c0_27, %c0_28], %35 {strides = array<i32>} : memref<256x1xf32, #tpu.memory_space<vmem>>, vector<256x1xf32>,
      %cst_29 = arith.constant 0.000000e+00 : f32
      %37 = vector.broadcast %cst_29 : f32 to vector<256x2xf32>
      %c0_30 = arith.constant 0 : index
      %c0_31 = arith.constant 0 : index
      %38 = vector.load %arg11[%c0_30, %c0_31] : memref<256x2xf32, #tpu.memory_space<vmem>>, vector<256x2xf32>
      tpu.vector_store %arg11[%c0_30, %c0_31], %37 {strides = array<i32>} : memref<256x2xf32, #tpu.memory_space<vmem>>, vector<256x2xf32>,
    } else {
    }
    %c0 = arith.constant 0 : index
    %c0_1 = arith.constant 0 : index
    %3 = vector.load %arg2[%c0, %c0_1] : memref<256x2xbf16, #tpu.memory_space<vmem>>, vector<256x2xbf16>
    %c0_2 = arith.constant 0 : index
    %c0_3 = arith.constant 0 : index
    %4 = vector.load %arg3[%c0_2, %c0_3] : memref<512x2xbf16, #tpu.memory_space<vmem>>, vector<512x2xbf16>
    %cst = arith.constant dense<0.000000e+00> : vector<256x512xf32>
    %5 = tpu.matmul %3, %4, %cst {dimension_numbers = #tpu.dot_dimension_numbers<[1], [1], [0], [0], [0, 0, 1, 0], [], []>} : vector<256x2xbf16>, vector<512x2xbf16>, vector<256x512xf32> -> vector<256x512xf32>
    %c0_4 = arith.constant 0 : index
    %c0_5 = arith.constant 0 : index
    %6 = vector.load %arg9[%c0_4, %c0_5] : memref<256x1xf32, #tpu.memory_space<vmem>>, vector<256x1xf32>
    %cst_6 = arith.constant dense<0xFF800000> : vector<256xf32>
    %7 = vector.multi_reduction <maximumf>, %5, %cst_6 [1] : vector<256x512xf32> to vector<256xf32>
    %8 = vector.shape_cast %7 : vector<256xf32> to vector<256x1xf32>
    %9 = arith.maximumf %6, %8 : vector<256x1xf32>
    %10 = arith.subf %6, %9 : vector<256x1xf32>
    %11 = math.exp %10 : vector<256x1xf32>
    %12 = vector.broadcast %9 : vector<256x1xf32> to vector<256x512xf32>
    %13 = arith.subf %5, %12 : vector<256x512xf32>
    %14 = math.exp %13 : vector<256x512xf32>
    %c0_7 = arith.constant 0 : index
    %c0_8 = arith.constant 0 : index
    %15 = vector.load %arg10[%c0_7, %c0_8] : memref<256x1xf32, #tpu.memory_space<vmem>>, vector<256x1xf32>
    %16 = arith.mulf %11, %15 : vector<256x1xf32>
    %cst_9 = arith.constant dense<0.000000e+00> : vector<256xf32>
    %17 = vector.multi_reduction <add>, %14, %cst_9 [1] : vector<256x512xf32> to vector<256xf32>
    %18 = vector.shape_cast %17 : vector<256xf32> to vector<256x1xf32>
    %19 = arith.addf %16, %18 : vector<256x1xf32>
    %c0_10 = arith.constant 0 : index
    %c0_11 = arith.constant 0 : index
    %20 = vector.load %arg10[%c0_10, %c0_11] : memref<256x1xf32, #tpu.memory_space<vmem>>, vector<256x1xf32>
    tpu.vector_store %arg10[%c0_10, %c0_11], %19 {strides = array<i32>} : memref<256x1xf32, #tpu.memory_space<vmem>>, vector<256x1xf32>,
    %c0_12 = arith.constant 0 : index
    %c0_13 = arith.constant 0 : index
    %21 = vector.load %arg11[%c0_12, %c0_13] : memref<256x2xf32, #tpu.memory_space<vmem>>, vector<256x2xf32>
    %22 = vector.broadcast %11 : vector<256x1xf32> to vector<256x2xf32>
    %23 = arith.mulf %22, %21 : vector<256x2xf32>
    %24 = arith.truncf %14 : vector<256x512xf32> to vector<256x512xbf16>
    %c0_14 = arith.constant 0 : index
    %c0_15 = arith.constant 0 : index
    %25 = vector.load %arg4[%c0_14, %c0_15] : memref<512x2xbf16, #tpu.memory_space<vmem>>, vector<512x2xbf16>
    %cst_16 = arith.constant dense<0.000000e+00> : vector<256x2xf32>
    %26 = tpu.matmul %24, %25, %cst_16 {dimension_numbers = #tpu.dot_dimension_numbers<[1], [0], [0], [1], [0, 0, 1, 1], [], []>} : vector<256x512xbf16>, vector<512x2xbf16>, vector<256x2xf32> -> vector<256x2xf32>
    %27 = arith.addf %23, %26 : vector<256x2xf32>
    %c0_17 = arith.constant 0 : index
    %c0_18 = arith.constant 0 : index
    %28 = vector.load %arg11[%c0_17, %c0_18] : memref<256x2xf32, #tpu.memory_space<vmem>>, vector<256x2xf32>
    tpu.vector_store %arg11[%c0_17, %c0_18], %27 {strides = array<i32>} : memref<256x2xf32, #tpu.memory_space<vmem>>, vector<256x2xf32>,
    %c0_19 = arith.constant 0 : index
    %c0_20 = arith.constant 0 : index
    %29 = vector.load %arg9[%c0_19, %c0_20] : memref<256x1xf32, #tpu.memory_space<vmem>>, vector<256x1xf32>
    tpu.vector_store %arg9[%c0_19, %c0_20], %9 {strides = array<i32>} : memref<256x1xf32, #tpu.memory_space<vmem>>, vector<256x1xf32>,
    %c0_i32_21 = arith.constant 0 : i32
    %30 = arith.cmpi eq, %arg1, %c0_i32_21 : i32
    %31 = arith.extui %30 : i1 to i32
    %c0_i32_22 = arith.constant 0 : i32
    %32 = arith.cmpi ne, %31, %c0_i32_22 : i32
    scf.if %32 {
      %c0_23 = arith.constant 0 : index
      %c0_24 = arith.constant 0 : index
      %33 = vector.load %arg11[%c0_23, %c0_24] : memref<256x2xf32, #tpu.memory_space<vmem>>, vector<256x2xf32>
      %c0_25 = arith.constant 0 : index
      %c0_26 = arith.constant 0 : index
      %34 = vector.load %arg10[%c0_25, %c0_26] : memref<256x1xf32, #tpu.memory_space<vmem>>, vector<256x1xf32>
      %35 = tpu.reciprocal %34 {approx = true} : vector<256x1xf32> -> vector<256x1xf32>
      %36 = vector.broadcast %35 : vector<256x1xf32> to vector<256x2xf32>
      %37 = arith.mulf %33, %36 : vector<256x2xf32>
      %38 = arith.truncf %37 : vector<256x2xf32> to vector<256x2xbf16>
      %c0_27 = arith.constant 0 : index
      %c0_28 = arith.constant 0 : index
      %39 = vector.load %arg5[%c0_27, %c0_28] : memref<2x4xbf16, #tpu.memory_space<vmem>>, vector<2x4xbf16>
      %cst_29 = arith.constant dense<0.000000e+00> : vector<256x4xf32>
      %40 = tpu.matmul %38, %39, %cst_29 {dimension_numbers = #tpu.dot_dimension_numbers<[1], [0], [0], [1], [0, 0, 1, 1], [], []>} : vector<256x2xbf16>, vector<2x4xbf16>, vector<256x4xf32> -> vector<256x4xf32>
      %c0_30 = arith.constant 0 : index
      %c0_31 = arith.constant 0 : index
      %41 = vector.load %arg6[%c0_30, %c0_31] : memref<1x4xf32, #tpu.memory_space<vmem>>, vector<1x4xf32>
      %42 = vector.broadcast %41 : vector<1x4xf32> to vector<256x4xf32>
      %43 = arith.addf %40, %42 : vector<256x4xf32>
      %c0_32 = arith.constant 0 : index
      %c0_33 = arith.constant 0 : index
      %44 = vector.load %arg7[%c0_32, %c0_33] : memref<256x4xf32, #tpu.memory_space<vmem>>, vector<256x4xf32>
      %45 = arith.addf %43, %44 : vector<256x4xf32>
      %c0_34 = arith.constant 0 : index
      %c0_35 = arith.constant 0 : index
      %46 = vector.load %arg8[%c0_34, %c0_35] : memref<256x4xf32, #tpu.memory_space<vmem>>, vector<256x4xf32>
      tpu.vector_store %arg8[%c0_34, %c0_35], %45 {strides = array<i32>} : memref<256x4xf32, #tpu.memory_space<vmem>>, vector<256x4xf32>,
    } else {
    }
    return
  }
  func.func @transform_0(%arg0: i32, %arg1: i32) -> (i32, i32) {
    %c0_i32 = arith.constant 0 : i32
    %c0_i32_0 = arith.constant 0 : i32
    return %arg0, %c0_i32 : i32, i32
  }
  func.func @transform_1(%arg0: i32, %arg1: i32) -> (i32, i32) {
    %c0_i32 = arith.constant 0 : i32
    %c0_i32_0 = arith.constant 0 : i32
    return %arg1, %c0_i32 : i32, i32
  }
  func.func @transform_2(%arg0: i32, %arg1: i32) -> (i32, i32) {
    %c0_i32 = arith.constant 0 : i32
    %c0_i32_0 = arith.constant 0 : i32
    return %arg1, %c0_i32 : i32, i32
  }
  func.func @transform_3(%arg0: i32, %arg1: i32) -> (i32, i32) {
    %c0_i32 = arith.constant 0 : i32
    %c0_i32_0 = arith.constant 0 : i32
    %c0_i32_1 = arith.constant 0 : i32
    return %c0_i32, %c0_i32_0 : i32, i32
  }
  func.func @transform_4(%arg0: i32, %arg1: i32) -> (i32, i32) {
    %c0_i32 = arith.constant 0 : i32
    %c0_i32_0 = arith.constant 0 : i32
    %c0_i32_1 = arith.constant 0 : i32
    return %c0_i32, %c0_i32_0 : i32, i32
  }
  func.func @transform_5(%arg0: i32, %arg1: i32) -> (i32, i32) {
    %c0_i32 = arith.constant 0 : i32
    %c0_i32_0 = arith.constant 0 : i32
    return %arg0, %c0_i32 : i32, i32
  }
  func.func @transform_6(%arg0: i32, %arg1: i32) -> (i32, i32) {
    %c0_i32 = arith.constant 0 : i32
    %c0_i32_0 = arith.constant 0 : i32
    return %arg0, %c0_i32 : i32, i32
  }
}

</mosaic_0001>

<bundles_post_ra>
// kernel: non_local_self_attention.2
= control target key start
LH: loop header
LB: loop body
LE: loop exit
PB: predicated region body
PF: predicated region fallthrough
CT: control target
= control target key end

     0   :  { %s941_s12 = smov 0   ;;  %s1105_s0 = inlined_call_operand.vmem [shape: bf16[512,4], index: 0, kind: input, shape index: {}]   ;;  %s1106_s1 = inlined_call_operand.vmem [shape: bf16[4,6], index: 1, kind: input, shape index: {}]   ;;  %s1107_s2 = inlined_call_operand.vmem [shape: f32[1,6], index: 2, kind: input, shape index: {}]   ;;  %s1108_s3 = inlined_call_operand.vmem [shape: bf16[512,6], index: 3, kind: output, shape index: {}]  }
   0x1 LB: > { %s726_s13 = sadd.s32 4294967295, %s919_s12   ;;  %p730_p0 = scmp.ge.s32.totalorder %s919_s12, 1  ;;  %s919_s12 = sphi %s941_s12, %s13_s12  }
   0x2   : > { %p138_p1 = scmp.lt.s32.totalorder %s919_s12, 3 }
   0x4   : > { %p139_p2 = pnand %p730_p0, %p138_p1 }
   0x5   : > { %v207_v0 = vld [vmem:[%s1106_s1] sm:$0x3] (!%p139_p2)  ;;  %vm344_vm0 = vcmask (!%p139_p2), 1041408   ;;  %s731_s16 = sshll.u32 (!%p139_p2), %s726_s13, 5  ;;  %vm295_vm1 = vcmask (!%p139_p2), 31744   ;;  %vm637_vm2 = vcmask (!%p139_p2), 44032  }
   0x6   : > { %142 = sbr.rel (%p139_p2) target bundleno = 263 (0x107), region = 32  ;;  %887 = vmatprep.subr.msk.bf16.mxu0 (!%p139_p2), %vm344_vm0, %v207_v0  ;;  %888 = vmatprep.subr.msk.bf16.mxu1 (!%p139_p2), %vm344_vm0, %v207_v0  ;;  %v346_v1 = vsel (!%p139_p2), %vm344_vm0, %v207_v0, 0  ;;  %p163_p3 = scmp.lt.s32.totalorder (!%p139_p2), %s731_s16, 63  ;;  %v997_v18 = vld [vmem:[%s1107_s2] ss:$0 sm:$0xff] (!%p139_p2) }
   0x7   : > { %852 = vmatpush3.bf16.msra.mxu0 (!%p139_p2), %v346_v1  ;;  %886 = vmatpush3.bf16.msra.mxu1 (!%p139_p2), %v346_v1 }
   0xd   : > { %s1110_s16 = smov (!%p163_p3, %s731_s16), 63 }
   0xe   : > { %s732_s17 = sshll.u32 %s1110_s16, 2 }
   0xf   : > { %s960_s20 = scalar_lea.vmem %s1105_s0, %s732_s17  ;;  %s1005_s25 = scalar_lea.vmem %s1108_s3, %s732_s17 }
  0x10   : > { %v897_v2 = vld [vmem:[%s960_s20] sm:$0xff]   ;;  %v899_v4 = vld [vmem:[%s960_s20 + $0x8] sm:$0xff]   ;;  %v901_v6 = vld [vmem:[%s960_s20 + $0x10] sm:$0xff]  }
  0x11   : > { %v898_v3 = vld [vmem:[%s960_s20 + $0x40] sm:$0xff]   ;;  %853 = vmatprep.mubr.msk.bf16.mxu0 %vm295_vm1, %v897_v2  ;;  %v900_v5 = vld [vmem:[%s960_s20 + $0x48] sm:$0xff]   ;;  %v902_v7 = vld [vmem:[%s960_s20 + $0x50] sm:$0xff]  }
  0x12   : > { %869 = vmatprep.mubr.msk.bf16.mxu1 %vm295_vm1, %v898_v3  ;;  %854 = vmatmul.mubr.msk.bf16.vlgmr.msra.gmra.mrb[0].mxu0 %vm295_vm1, %v899_v4  ;;  %v903_v8 = vld [vmem:[%s960_s20 + $0x18] sm:$0xff]   ;;  %v905_v10 = vld [vmem:[%s960_s20 + $0x20] sm:$0xff]   ;;  %v907_v12 = vld [vmem:[%s960_s20 + $0x28] sm:$0xff]  }
  0x13   : > { %870 = vmatmul.mubr.msk.bf16.vlgmr.msra.gmra.mrb[0].mxu1 %vm295_vm1, %v900_v5  ;;  %857 = vmatprep.mubr.msk.bf16.mxu0 %vm295_vm1, %v901_v6  ;;  %v904_v9 = vld [vmem:[%s960_s20 + $0x58] sm:$0xff]   ;;  %v906_v11 = vld [vmem:[%s960_s20 + $0x60] sm:$0xff]   ;;  %v908_v13 = vld [vmem:[%s960_s20 + $0x68] sm:$0xff]  }
  0x14   : > { %873 = vmatprep.mubr.msk.bf16.mxu1 %vm295_vm1, %v902_v7  ;;  %v909_v14 = vld [vmem:[%s960_s20 + $0x30] sm:$0xff]   ;;  %v911_v16 = vld [vmem:[%s960_s20 + $0x38] sm:$0xff]  }
  0x15   : > { %v910_v15 = vld [vmem:[%s960_s20 + $0x70] sm:$0xff]   ;;  %v912_v17 = vld [vmem:[%s960_s20 + $0x78] sm:$0xff]  }
  0x1a   : > { %858 = vmatmul.mubr.msk.bf16.gmra.mrb[4].mxu0 %vm295_vm1, %v903_v8 }
  0x1b   : > { %874 = vmatmul.mubr.msk.bf16.gmra.mrb[4].mxu1 %vm295_vm1, %v904_v9  ;;  %861 = vmatprep.mubr.msk.bf16.mxu0 %vm295_vm1, %v905_v10 }
  0x1c   : > { %877 = vmatprep.mubr.msk.bf16.mxu1 %vm295_vm1, %v906_v11 }
  0x22   : > { %862 = vmatmul.mubr.msk.bf16.gmra.mrb[8].mxu0 %vm295_vm1, %v907_v12 }
  0x23   : > { %878 = vmatmul.mubr.msk.bf16.gmra.mrb[8].mxu1 %vm295_vm1, %v908_v13  ;;  %865 = vmatprep.mubr.msk.bf16.mxu0 %vm295_vm1, %v909_v14 }
  0x24   : > { %881 = vmatprep.mubr.msk.bf16.mxu1 %vm295_vm1, %v910_v15 }
  0x2a   : > { %866 = vmatmul.mubr.msk.bf16.gmra.mrb[12].mxu0 %vm295_vm1, %v911_v16 }
  0x2b   : > { %882 = vmatmul.mubr.msk.bf16.gmra.mrb[12].mxu1 %vm295_vm1, %v912_v17 }
  0xe5   : > { %v855_v19 = vpop.f32.mrb[0].mxu0 }
  0xe6   : > { %v391_v20 = vadd.f32 %v855_v19, %v997_v18  ;;  %v871_v21 = vpop.f32.mrb[0].mxu1  ;;  %v382_v22 = vpop.f32.mrb[1].mxu0 }
  0xe7   : > { %v455_v23 = vadd.f32 %v871_v21, %v997_v18  ;;  %v383_v24 = vadd.f32 %v997_v18, %v382_v22  ;;  %v446_v25 = vpop.f32.mrb[1].mxu1  ;;  %v856_v26 = vpop.f32.mrb[2].mxu0 }
  0xe8   : > { %v804_v27 = vpack.c.bf16 %v391_v20, %v391_v20  ;;  %v447_v28 = vadd.f32 %v997_v18, %v446_v25  ;;  %v394_v29 = vadd.f32 %v856_v26, %v997_v18  ;;  %v872_v30 = vpop.f32.mrb[2].mxu1  ;;  %v385_v31 = vpop.f32.mrb[3].mxu0 }
  0xe9   : > { %v820_v32 = vpack.c.bf16 %v455_v23, %v455_v23  ;;  %v802_v33 = vpack.c.bf16 %v383_v24, %v383_v24  ;;  %v458_v34 = vadd.f32 %v872_v30, %v997_v18  ;;  %v386_v35 = vadd.f32 %v997_v18, %v385_v31  ;;  %v449_v36 = vpop.f32.mrb[3].mxu1 }
  0xea   : > { %640 = vst.msk [vmem:[%s1005_s25 + $0x8] sm:$0xf] %vm637_vm2, %v804_v27  ;;  %v818_v37 = vpack.c.bf16 %v447_v28, %v447_v28  ;;  %v805_v38 = vpack.c.bf16 %v394_v29, %v394_v29  ;;  %v450_v39 = vadd.f32 %v997_v18, %v449_v36 }
  0xeb   : > { %656 = vst.msk [vmem:[%s1005_s25 + $0x48] sm:$0xf] %vm637_vm2, %v820_v32  ;;  %638 = vst.msk [vmem:[%s1005_s25] sm:$0xf] %vm637_vm2, %v802_v33  ;;  %v821_v40 = vpack.c.bf16 %v458_v34, %v458_v34  ;;  %v803_v41 = vpack.c.bf16 %v386_v35, %v386_v35 }
  0xec   : > { %654 = vst.msk [vmem:[%s1005_s25 + $0x40] sm:$0xf] %vm637_vm2, %v818_v37  ;;  %641 = vst.msk [vmem:[%s1005_s25 + $0xc] sm:$0xf] %vm637_vm2, %v805_v38  ;;  %v819_v42 = vpack.c.bf16 %v450_v39, %v450_v39 }
  0xed   : > { %657 = vst.msk [vmem:[%s1005_s25 + $0x4c] sm:$0xf] %vm637_vm2, %v821_v40  ;;  %639 = vst.msk [vmem:[%s1005_s25 + $0x4] sm:$0xf] %vm637_vm2, %v803_v41  ;;  %v859_v43 = vpop.f32.mrb[4].mxu0 }
  0xee   : > { %655 = vst.msk [vmem:[%s1005_s25 + $0x44] sm:$0xf] %vm637_vm2, %v819_v42  ;;  %v407_v44 = vadd.f32 %v859_v43, %v997_v18  ;;  %v875_v45 = vpop.f32.mrb[4].mxu1  ;;  %v398_v46 = vpop.f32.mrb[5].mxu0 }
  0xef   : > { %v471_v47 = vadd.f32 %v875_v45, %v997_v18  ;;  %v399_v48 = vadd.f32 %v997_v18, %v398_v46  ;;  %v462_v49 = vpop.f32.mrb[5].mxu1  ;;  %v860_v50 = vpop.f32.mrb[6].mxu0 }
  0xf0   : > { %v808_v51 = vpack.c.bf16 %v407_v44, %v407_v44  ;;  %v463_v52 = vadd.f32 %v997_v18, %v462_v49  ;;  %v410_v53 = vadd.f32 %v860_v50, %v997_v18  ;;  %v876_v54 = vpop.f32.mrb[6].mxu1  ;;  %v401_v55 = vpop.f32.mrb[7].mxu0 }
  0xf1   : > { %v824_v56 = vpack.c.bf16 %v471_v47, %v471_v47  ;;  %v806_v57 = vpack.c.bf16 %v399_v48, %v399_v48  ;;  %v474_v58 = vadd.f32 %v876_v54, %v997_v18  ;;  %v402_v59 = vadd.f32 %v997_v18, %v401_v55  ;;  %v465_v60 = vpop.f32.mrb[7].mxu1 }
  0xf2   : > { %644 = vst.msk [vmem:[%s1005_s25 + $0x18] sm:$0xf] %vm637_vm2, %v808_v51  ;;  %v822_v61 = vpack.c.bf16 %v463_v52, %v463_v52  ;;  %v809_v62 = vpack.c.bf16 %v410_v53, %v410_v53  ;;  %v466_v63 = vadd.f32 %v997_v18, %v465_v60 }
  0xf3   : > { %660 = vst.msk [vmem:[%s1005_s25 + $0x58] sm:$0xf] %vm637_vm2, %v824_v56  ;;  %642 = vst.msk [vmem:[%s1005_s25 + $0x10] sm:$0xf] %vm637_vm2, %v806_v57  ;;  %v825_v0 = vpack.c.bf16 %v474_v58, %v474_v58  ;;  %v807_v1 = vpack.c.bf16 %v402_v59, %v402_v59 }
  0xf4   : > { %658 = vst.msk [vmem:[%s1005_s25 + $0x50] sm:$0xf] %vm637_vm2, %v822_v61  ;;  %645 = vst.msk [vmem:[%s1005_s25 + $0x1c] sm:$0xf] %vm637_vm2, %v809_v62  ;;  %v823_v2 = vpack.c.bf16 %v466_v63, %v466_v63 }
  0xf5   : > { %661 = vst.msk [vmem:[%s1005_s25 + $0x5c] sm:$0xf] %vm637_vm2, %v825_v0  ;;  %643 = vst.msk [vmem:[%s1005_s25 + $0x14] sm:$0xf] %vm637_vm2, %v807_v1  ;;  %v863_v3 = vpop.f32.mrb[8].mxu0 }
  0xf6   : > { %659 = vst.msk [vmem:[%s1005_s25 + $0x54] sm:$0xf] %vm637_vm2, %v823_v2  ;;  %v423_v4 = vadd.f32 %v863_v3, %v997_v18  ;;  %v879_v5 = vpop.f32.mrb[8].mxu1  ;;  %v414_v6 = vpop.f32.mrb[9].mxu0 }
  0xf7   : > { %v487_v7 = vadd.f32 %v879_v5, %v997_v18  ;;  %v415_v8 = vadd.f32 %v997_v18, %v414_v6  ;;  %v478_v9 = vpop.f32.mrb[9].mxu1  ;;  %v864_v10 = vpop.f32.mrb[10].mxu0 }
  0xf8   : > { %v812_v11 = vpack.c.bf16 %v423_v4, %v423_v4  ;;  %v479_v12 = vadd.f32 %v997_v18, %v478_v9  ;;  %v426_v13 = vadd.f32 %v864_v10, %v997_v18  ;;  %v880_v14 = vpop.f32.mrb[10].mxu1  ;;  %v417_v15 = vpop.f32.mrb[11].mxu0 }
  0xf9   : > { %v828_v16 = vpack.c.bf16 %v487_v7, %v487_v7  ;;  %v810_v17 = vpack.c.bf16 %v415_v8, %v415_v8  ;;  %v490_v19 = vadd.f32 %v880_v14, %v997_v18  ;;  %v418_v20 = vadd.f32 %v997_v18, %v417_v15  ;;  %v481_v21 = vpop.f32.mrb[11].mxu1 }
  0xfa   : > { %648 = vst.msk [vmem:[%s1005_s25 + $0x28] sm:$0xf] %vm637_vm2, %v812_v11  ;;  %v826_v22 = vpack.c.bf16 %v479_v12, %v479_v12  ;;  %v813_v23 = vpack.c.bf16 %v426_v13, %v426_v13  ;;  %v482_v24 = vadd.f32 %v997_v18, %v481_v21 }
  0xfb   : > { %664 = vst.msk [vmem:[%s1005_s25 + $0x68] sm:$0xf] %vm637_vm2, %v828_v16  ;;  %646 = vst.msk [vmem:[%s1005_s25 + $0x20] sm:$0xf] %vm637_vm2, %v810_v17  ;;  %v829_v25 = vpack.c.bf16 %v490_v19, %v490_v19  ;;  %v811_v26 = vpack.c.bf16 %v418_v20, %v418_v20 }
  0xfc   : > { %662 = vst.msk [vmem:[%s1005_s25 + $0x60] sm:$0xf] %vm637_vm2, %v826_v22  ;;  %649 = vst.msk [vmem:[%s1005_s25 + $0x2c] sm:$0xf] %vm637_vm2, %v813_v23  ;;  %v827_v27 = vpack.c.bf16 %v482_v24, %v482_v24 }
  0xfd   : > { %665 = vst.msk [vmem:[%s1005_s25 + $0x6c] sm:$0xf] %vm637_vm2, %v829_v25  ;;  %647 = vst.msk [vmem:[%s1005_s25 + $0x24] sm:$0xf] %vm637_vm2, %v811_v26  ;;  %v867_v28 = vpop.f32.mrb[12].mxu0 }
  0xfe   : > { %663 = vst.msk [vmem:[%s1005_s25 + $0x64] sm:$0xf] %vm637_vm2, %v827_v27  ;;  %v439_v29 = vadd.f32 %v867_v28, %v997_v18  ;;  %v883_v30 = vpop.f32.mrb[12].mxu1  ;;  %v430_v31 = vpop.f32.mrb[13].mxu0 }
  0xff   : > { %v503_v32 = vadd.f32 %v883_v30, %v997_v18  ;;  %v431_v33 = vadd.f32 %v997_v18, %v430_v31  ;;  %v494_v34 = vpop.f32.mrb[13].mxu1  ;;  %v868_v35 = vpop.f32.mrb[14].mxu0 }
 0x100   : > { %v816_v36 = vpack.c.bf16 %v439_v29, %v439_v29  ;;  %v495_v37 = vadd.f32 %v997_v18, %v494_v34  ;;  %v442_v38 = vadd.f32 %v868_v35, %v997_v18  ;;  %v884_v39 = vpop.f32.mrb[14].mxu1  ;;  %v433_v40 = vpop.f32.mrb[15].mxu0 }
 0x101   : > { %v832_v41 = vpack.c.bf16 %v503_v32, %v503_v32  ;;  %v814_v42 = vpack.c.bf16 %v431_v33, %v431_v33  ;;  %v506_v43 = vadd.f32 %v884_v39, %v997_v18  ;;  %v434_v44 = vadd.f32 %v997_v18, %v433_v40  ;;  %v497_v45 = vpop.f32.mrb[15].mxu1 }
 0x102   : > { %652 = vst.msk [vmem:[%s1005_s25 + $0x38] sm:$0xf] %vm637_vm2, %v816_v36  ;;  %v830_v46 = vpack.c.bf16 %v495_v37, %v495_v37  ;;  %v817_v47 = vpack.c.bf16 %v442_v38, %v442_v38  ;;  %v498_v48 = vadd.f32 %v997_v18, %v497_v45 }
 0x103   : > { %668 = vst.msk [vmem:[%s1005_s25 + $0x78] sm:$0xf] %vm637_vm2, %v832_v41  ;;  %650 = vst.msk [vmem:[%s1005_s25 + $0x30] sm:$0xf] %vm637_vm2, %v814_v42  ;;  %v833_v49 = vpack.c.bf16 %v506_v43, %v506_v43  ;;  %v815_v50 = vpack.c.bf16 %v434_v44, %v434_v44 }
 0x104   : > { %666 = vst.msk [vmem:[%s1005_s25 + $0x70] sm:$0xf] %vm637_vm2, %v830_v46  ;;  %653 = vst.msk [vmem:[%s1005_s25 + $0x3c] sm:$0xf] %vm637_vm2, %v817_v47  ;;  %v831_v51 = vpack.c.bf16 %v498_v48, %v498_v48 }
 0x105   : > { %669 = vst.msk [vmem:[%s1005_s25 + $0x7c] sm:$0xf] %vm637_vm2, %v833_v49  ;;  %651 = vst.msk [vmem:[%s1005_s25 + $0x34] sm:$0xf] %vm637_vm2, %v815_v50 }
 0x106   : > { %667 = vst.msk [vmem:[%s1005_s25 + $0x74] sm:$0xf] %vm637_vm2, %v831_v51 }
 0x107 PF: > { %s13_s12 = sadd.s32 1, %s919_s12  }
 0x108   : > { %p10_p4 = scmp.ge.s32.totalorder %s13_s12, 4  }
 0x10a   :  { %12 = sbr.rel (!%p10_p4) target bundleno = 1 (0x1), region = 62 }

// kernel: non_local_self_attention.3
= control target key start
LH: loop header
LB: loop body
LE: loop exit
PB: predicated region body
PF: predicated region fallthrough
CT: control target
= control target key end

     0   :  { %s5253_s21 = smov 0   ;;  %s5255_s22 = smov 0   ;;  %s7689_s0 = inlined_call_operand.vmem [shape: bf16[512,2], index: 0, kind: input, shape index: {}]   ;;  %s7690_s1 = inlined_call_operand.vmem [shape: bf16[512,2], index: 1, kind: input, shape index: {}]   ;;  %s7691_s2 = inlined_call_operand.vmem [shape: bf16[512,2], index: 2, kind: input, shape index: {}]   ;;  %s7692_s3 = inlined_call_operand.vmem [shape: bf16[2,4], index: 3, kind: input, shape index: {}]   ;;  %s7693_s4 = inlined_call_operand.vmem [shape: f32[1,4], index: 4, kind: input, shape index: {}]   ;;  %s7694_s5 = inlined_call_operand.vmem [shape: f32[512,4], index: 5, kind: input, shape index: {}]   ;;  %s7695_s6 = inlined_call_operand.vmem [shape: f32[512,4], index: 6, kind: output, shape index: {}]  }
   0x1   :  { %s5257_s23 = smov 0  }
   0x2 LB: > { %s28_s24 = sadd.s32 1, %s5209_s22  ;;  %p4156_p0 = scmp.ge.s32.totalorder %s5213_s23, 1  ;;  %s5213_s23 = sphi %s5257_s23, %s16_s23   ;;  %s5209_s22 = sphi %s5255_s22, %s8346_s22   ;;  %s5205_s21 = sphi %s5253_s21, %s8345_s21  }
   0x3   : > { %p30_p1 = scmp.ge.s32.totalorder %s28_s24, 2  ;;  %p258_p2 = scmp.lt.s32.totalorder %s5213_s23, 3 }
   0x5   : > { %s8348_s24 = smov (%p30_p1, %s28_s24), 0  ;;  %p259_p3 = pnand %p4156_p0, %p258_p2 }
   0x7   : > { %262 = sbr.rel (%p259_p3) target bundleno = 1453 (0x5ad), region = 44 }
   0xe   : > { %vm403_vm0 = vcmask 15360   ;;  %v4727_v0 = vld [vmem:[%s7690_s1 + $0x40] sm:$0xff]   ;;  %v4731_v5 = vld [vmem:[%s7690_s1 + $0x48] sm:$0xff]   ;;  %v4735_v11 = vld [vmem:[%s7690_s1 + $0x50] sm:$0xff]   ;;  %s4157_s27 = sshll.u32 %s5205_s21, 5  ;;  %vm338_vm1 = vcmask 7168  }
   0xf   : > { %v4728_v1 = vld [vmem:[%s7690_s1 + $0xc0] sm:$0xff]   ;;  %4681 = vmatprep.subr.msk.bf16.mxu0 %vm403_vm0, %v4727_v0  ;;  %v4732_v7 = vld [vmem:[%s7690_s1 + $0xc8] sm:$0xff]   ;;  %v4736_v13 = vld [vmem:[%s7690_s1 + $0xd0] sm:$0xff]   ;;  %p304_p4 = scmp.lt.s32.totalorder %s4157_s27, 63  ;;  %vm3781_vm2 = vcmask 1040384   ;;  %vm4010_vm3 = vcmask 31744  }
  0x10   : > { %v4729_v2 = vld [vmem:[%s7690_s1] sm:$0xff]   ;;  %4689 = vmatprep.subr.msk.bf16.mxu1 %vm403_vm0, %v4728_v1  ;;  %v4733_v8 = vld [vmem:[%s7690_s1 + $0x8] sm:$0xff]   ;;  %v4737_v14 = vld [vmem:[%s7690_s1 + $0x10] sm:$0xff]  }
  0x11   : > { %v4730_v3 = vld [vmem:[%s7690_s1 + $0x80] sm:$0xff]   ;;  %v822_v4 = vsel %vm403_vm0, %v4729_v2, 0  ;;  %v4734_v9 = vld [vmem:[%s7690_s1 + $0x88] sm:$0xff]   ;;  %v825_v10 = vsel %vm403_vm0, %v4733_v8, 0  ;;  %v4738_v15 = vld [vmem:[%s7690_s1 + $0x90] sm:$0xff]   ;;  %v828_v16 = vsel %vm403_vm0, %v4737_v14, 0 }
  0x12   : > { %4295 = vmatpush3.bf16.xpose.msra.mxu0 %v822_v4  ;;  %v870_v6 = vsel %vm403_vm0, %v4730_v3, 0  ;;  %v873_v12 = vsel %vm403_vm0, %v4734_v9, 0  ;;  %v4739_v17 = vld [vmem:[%s7690_s1 + $0x58] sm:$0xff]   ;;  %v876_v18 = vsel %vm403_vm0, %v4738_v15, 0  ;;  %s8350_s27 = smov (!%p304_p4, %s4157_s27), 63  ;;  %v4743_v23 = vld [vmem:[%s7690_s1 + $0x60] sm:$0xff]  }
  0x13   : > { %4343 = vmatpush3.bf16.xpose.msra.mxu1 %v870_v6  ;;  %4682 = vmatprep.subr.msk.bf16.mxu0 %vm403_vm0, %v4731_v5  ;;  %v4740_v19 = vld [vmem:[%s7690_s1 + $0xd8] sm:$0xff]   ;;  %s4158_s13 = sshll.u32 %s8350_s27, 2  ;;  %v4744_v25 = vld [vmem:[%s7690_s1 + $0xe0] sm:$0xff]   ;;  %v4747_v30 = vld [vmem:[%s7690_s1 + $0x68] sm:$0xff]   ;;  %s4160_s15 = sshll.u32 %s8350_s27, 3 }
  0x14   : > { %4690 = vmatprep.subr.msk.bf16.mxu1 %vm403_vm0, %v4732_v7  ;;  %v4741_v20 = vld [vmem:[%s7690_s1 + $0x18] sm:$0xff]   ;;  %s5350_s20 = scalar_lea.vmem %s7689_s0, %s4158_s13  ;;  %v4745_v26 = vld [vmem:[%s7690_s1 + $0x20] sm:$0xff]   ;;  %v4748_v32 = vld [vmem:[%s7690_s1 + $0xe8] sm:$0xff]   ;;  %s7540_s18 = scalar_lea.vmem %s7694_s5, %s4160_s15 }
  0x15   : > { %v4742_v21 = vld [vmem:[%s7690_s1 + $0x98] sm:$0xff]   ;;  %v831_v22 = vsel %vm403_vm0, %v4741_v20, 0  ;;  %v4746_v27 = vld [vmem:[%s7690_s1 + $0xa0] sm:$0xff]   ;;  %v834_v29 = vsel %vm403_vm0, %v4745_v26, 0  ;;  %v4749_v33 = vld [vmem:[%s7690_s1 + $0x28] sm:$0xff]   ;;  %s7553_s28 = scalar_lea.vmem %s7695_s6, %s4160_s15 }
  0x16   : > { %v879_v24 = vsel %vm403_vm0, %v4742_v21, 0  ;;  %v4759_v28 = vld [vmem:[%s5350_s20] sm:$0xff]   ;;  %v882_v31 = vsel %vm403_vm0, %v4746_v27, 0  ;;  %v4750_v34 = vld [vmem:[%s7690_s1 + $0xa8] sm:$0xff]   ;;  %v4751_v35 = vld [vmem:[%s7690_s1 + $0x70] sm:$0xff]   ;;  %v837_v37 = vsel %vm403_vm0, %v4749_v33, 0 }
  0x17   : > { %4310 = vmatprep.mubr.msk.bf16.mxu0 %vm403_vm0, %v4759_v28  ;;  %4358 = vmatprep.mubr.msk.bf16.mxu1 %vm403_vm0, %v4759_v28  ;;  %v4753_v36 = vld [vmem:[%s7690_s1 + $0x30] sm:$0xff]   ;;  %v885_v39 = vsel %vm403_vm0, %v4750_v34, 0  ;;  %v4757_v43 = vld [vmem:[%s7690_s1 + $0x38] sm:$0xff]   ;;  %v4760_v49 = vld [vmem:[%s5350_s20 + $0x8] sm:$0xff]  }
  0x18   : > { %v4754_v38 = vld [vmem:[%s7690_s1 + $0xb0] sm:$0xff]   ;;  %v840_v41 = vsel %vm403_vm0, %v4753_v36, 0  ;;  %v4758_v44 = vld [vmem:[%s7690_s1 + $0xb8] sm:$0xff]   ;;  %v843_v47 = vsel %vm403_vm0, %v4757_v43, 0  ;;  %v4763_v52 = vld [vmem:[%s5350_s20 + $0x20] sm:$0xff]  }
  0x19   : > { %v4752_v40 = vld [vmem:[%s7690_s1 + $0xf0] sm:$0xff]   ;;  %v888_v42 = vsel %vm403_vm0, %v4754_v38, 0  ;;  %v4755_v45 = vld [vmem:[%s7690_s1 + $0x78] sm:$0xff]   ;;  %v891_v48 = vsel %vm403_vm0, %v4758_v44, 0  ;;  %v4764_v53 = vld [vmem:[%s5350_s20 + $0x28] sm:$0xff]  }
  0x1a   : > { %4297 = vmatpush3.bf16.xpose.msra.mxu0 %v825_v10  ;;  %v4756_v46 = vld [vmem:[%s7690_s1 + $0xf8] sm:$0xff]   ;;  %v4761_v50 = vld [vmem:[%s5350_s20 + $0x10] sm:$0xff]   ;;  %v4767_v56 = vld [vmem:[%s5350_s20 + $0x40] sm:$0xff]  }
  0x1b   : > { %4345 = vmatpush3.bf16.xpose.msra.mxu1 %v873_v12  ;;  %4683 = vmatprep.subr.msk.bf16.mxu0 %vm403_vm0, %v4735_v11  ;;  %v4762_v51 = vld [vmem:[%s5350_s20 + $0x18] sm:$0xff]   ;;  %v4765_v54 = vld [vmem:[%s5350_s20 + $0x30] sm:$0xff]   ;;  %v4768_v57 = vld [vmem:[%s5350_s20 + $0x48] sm:$0xff]  }
  0x1c   : > { %4691 = vmatprep.subr.msk.bf16.mxu1 %vm403_vm0, %v4736_v13  ;;  %v4766_v55 = vld [vmem:[%s5350_s20 + $0x38] sm:$0xff]   ;;  %v4769_v58 = vld [vmem:[%s5350_s20 + $0x50] sm:$0xff]   ;;  %v4771_v60 = vld [vmem:[%s5350_s20 + $0x60] sm:$0xff]  }
  0x1d   : > { %v4770_v59 = vld [vmem:[%s5350_s20 + $0x58] sm:$0xff]   ;;  %v4772_v61 = vld [vmem:[%s5350_s20 + $0x68] sm:$0xff]   ;;  %v4773_v62 = vld [vmem:[%s5350_s20 + $0x70] sm:$0xff]  }
  0x1e   : > { %v4774_v63 = vld [vmem:[%s5350_s20 + $0x78] sm:$0xff]  }
  0x22   : > { %4299 = vmatpush3.bf16.xpose.msra.mxu0 %v828_v16 }
  0x23   : > { %4347 = vmatpush3.bf16.xpose.msra.mxu1 %v876_v18  ;;  %4684 = vmatprep.subr.msk.bf16.mxu0 %vm403_vm0, %v4739_v17  ;;  %v5215_v17 = vmov -inf  }
  0x24   : > { %4692 = vmatprep.subr.msk.bf16.mxu1 %vm403_vm0, %v4740_v19  ;;  %339 = vst.msk [vmem:[#allocation2] sm:$0xff] %vm338_vm1, %v5215_v17  ;;  %340 = vst.msk [vmem:[#allocation2 + $0x8] sm:$0xff] %vm338_vm1, %v5215_v17 }
  0x25   : > { %341 = vst.msk [vmem:[#allocation2 + $0x10] sm:$0xff] %vm338_vm1, %v5215_v17  ;;  %342 = vst.msk [vmem:[#allocation2 + $0x18] sm:$0xff] %vm338_vm1, %v5215_v17 }
  0x26   : > { %343 = vst.msk [vmem:[#allocation2 + $0x20] sm:$0xff] %vm338_vm1, %v5215_v17  ;;  %344 = vst.msk [vmem:[#allocation2 + $0x28] sm:$0xff] %vm338_vm1, %v5215_v17 }
  0x27   : > { %345 = vst.msk [vmem:[#allocation2 + $0x30] sm:$0xff] %vm338_vm1, %v5215_v17  ;;  %346 = vst.msk [vmem:[#allocation2 + $0x38] sm:$0xff] %vm338_vm1, %v5215_v17 }
  0x28   : > { %347 = vst.msk [vmem:[#allocation2 + $0x40] sm:$0xff] %vm338_vm1, %v5215_v17  ;;  %348 = vst.msk [vmem:[#allocation2 + $0x48] sm:$0xff] %vm338_vm1, %v5215_v17 }
  0x29   : > { %349 = vst.msk [vmem:[#allocation2 + $0x50] sm:$0xff] %vm338_vm1, %v5215_v17  ;;  %350 = vst.msk [vmem:[#allocation2 + $0x58] sm:$0xff] %vm338_vm1, %v5215_v17 }
  0x2a   : > { %4301 = vmatpush3.bf16.xpose.msra.mxu0 %v831_v22  ;;  %351 = vst.msk [vmem:[#allocation2 + $0x60] sm:$0xff] %vm338_vm1, %v5215_v17  ;;  %352 = vst.msk [vmem:[#allocation2 + $0x68] sm:$0xff] %vm338_vm1, %v5215_v17 }
  0x2b   : > { %4349 = vmatpush3.bf16.xpose.msra.mxu1 %v879_v24  ;;  %4685 = vmatprep.subr.msk.bf16.mxu0 %vm403_vm0, %v4743_v23  ;;  %353 = vst.msk [vmem:[#allocation2 + $0x70] sm:$0xff] %vm338_vm1, %v5215_v17  ;;  %354 = vst.msk [vmem:[#allocation2 + $0x78] sm:$0xff] %vm338_vm1, %v5215_v17 }
  0x2c   : > { %4693 = vmatprep.subr.msk.bf16.mxu1 %vm403_vm0, %v4744_v25  ;;  %355 = vst.msk [vmem:[#allocation2 + $0x80] sm:$0xff] %vm338_vm1, %v5215_v17  ;;  %356 = vst.msk [vmem:[#allocation2 + $0x88] sm:$0xff] %vm338_vm1, %v5215_v17 }
  0x2d   : > { %357 = vst.msk [vmem:[#allocation2 + $0x90] sm:$0xff] %vm338_vm1, %v5215_v17  ;;  %358 = vst.msk [vmem:[#allocation2 + $0x98] sm:$0xff] %vm338_vm1, %v5215_v17 }
  0x2e   : > { %359 = vst.msk [vmem:[#allocation2 + $0xa0] sm:$0xff] %vm338_vm1, %v5215_v17  ;;  %360 = vst.msk [vmem:[#allocation2 + $0xa8] sm:$0xff] %vm338_vm1, %v5215_v17 }
  0x2f   : > { %361 = vst.msk [vmem:[#allocation2 + $0xb0] sm:$0xff] %vm338_vm1, %v5215_v17  ;;  %362 = vst.msk [vmem:[#allocation2 + $0xb8] sm:$0xff] %vm338_vm1, %v5215_v17 }
  0x30   : > { %363 = vst.msk [vmem:[#allocation2 + $0xc0] sm:$0xff] %vm338_vm1, %v5215_v17  ;;  %364 = vst.msk [vmem:[#allocation2 + $0xc8] sm:$0xff] %vm338_vm1, %v5215_v17 }
  0x31   : > { %365 = vst.msk [vmem:[#allocation2 + $0xd0] sm:$0xff] %vm338_vm1, %v5215_v17  ;;  %366 = vst.msk [vmem:[#allocation2 + $0xd8] sm:$0xff] %vm338_vm1, %v5215_v17 }
  0x32   : > { %4303 = vmatpush3.bf16.xpose.msra.mxu0 %v834_v29  ;;  %367 = vst.msk [vmem:[#allocation2 + $0xe0] sm:$0xff] %vm338_vm1, %v5215_v17  ;;  %368 = vst.msk [vmem:[#allocation2 + $0xe8] sm:$0xff] %vm338_vm1, %v5215_v17 }
  0x33   : > { %4351 = vmatpush3.bf16.xpose.msra.mxu1 %v882_v31  ;;  %4686 = vmatprep.subr.msk.bf16.mxu0 %vm403_vm0, %v4747_v30  ;;  %369 = vst.msk [vmem:[#allocation2 + $0xf0] sm:$0xff] %vm338_vm1, %v5215_v17  ;;  %370 = vst.msk [vmem:[#allocation2 + $0xf8] sm:$0xff] %vm338_vm1, %v5215_v17 }
  0x34   : > { %4694 = vmatprep.subr.msk.bf16.mxu1 %vm403_vm0, %v4748_v32 }
  0x3a   : > { %4305 = vmatpush3.bf16.xpose.msra.mxu0 %v837_v37 }
  0x3b   : > { %4353 = vmatpush3.bf16.xpose.msra.mxu1 %v885_v39  ;;  %4687 = vmatprep.subr.msk.bf16.mxu0 %vm403_vm0, %v4751_v35 }
  0x3c   : > { %4695 = vmatprep.subr.msk.bf16.mxu1 %vm403_vm0, %v4752_v40 }
  0x42   : > { %4307 = vmatpush3.bf16.xpose.msra.mxu0 %v840_v41 }
  0x43   : > { %4355 = vmatpush3.bf16.xpose.msra.mxu1 %v888_v42  ;;  %4688 = vmatprep.subr.msk.bf16.mxu0 %vm403_vm0, %v4755_v45 }
  0x44   : > { %4696 = vmatprep.subr.msk.bf16.mxu1 %vm403_vm0, %v4756_v46 }
  0x4a   : > { %4309 = vmatpush3.bf16.xpose.msra.mxu0 %v843_v47 }
  0x4b   : > { %4357 = vmatpush3.bf16.xpose.msra.mxu1 %v891_v48 }
  0x51   : > { %4311 = vmatmul.mubr.msk.bf16.vlgmr.msra.gmra.mrb[0].mxu0 %vm403_vm0, %v4759_v28 }
  0x52   : > { %4359 = vmatmul.mubr.msk.bf16.vlgmr.msra.gmra.mrb[0].mxu1 %vm403_vm0, %v4759_v28  ;;  %4312 = vmatprep.mubr.msk.bf16.mxu0 %vm403_vm0, %v4760_v49 }
  0x53   : > { %4360 = vmatprep.mubr.msk.bf16.mxu1 %vm403_vm0, %v4760_v49 }
  0x59   : > { %4313 = vmatmul.mubr.msk.bf16.gmra.mrb[4].mxu0 %vm403_vm0, %v4760_v49 }
  0x5a   : > { %4361 = vmatmul.mubr.msk.bf16.gmra.mrb[4].mxu1 %vm403_vm0, %v4760_v49  ;;  %4314 = vmatprep.mubr.msk.bf16.mxu0 %vm403_vm0, %v4761_v50  ;;  %v5216_v49 = vmov 0  }
  0x5b   : > { %4362 = vmatprep.mubr.msk.bf16.mxu1 %vm403_vm0, %v4761_v50  ;;  %4725 = vset.pattern.permute.xlu0 %v5216_v49 }
  0x5c   : > { %4726 = vset.pattern.permute.xlu1 %v5216_v49 }
  0x61   : > { %4315 = vmatmul.mubr.msk.bf16.gmra.mrb[8].mxu0 %vm403_vm0, %v4761_v50 }
  0x62   : > { %4363 = vmatmul.mubr.msk.bf16.gmra.mrb[8].mxu1 %vm403_vm0, %v4761_v50  ;;  %4316 = vmatprep.mubr.msk.bf16.mxu0 %vm403_vm0, %v4762_v51 }
  0x63   : > { %4364 = vmatprep.mubr.msk.bf16.mxu1 %vm403_vm0, %v4762_v51 }
  0x69   : > { %4317 = vmatmul.mubr.msk.bf16.gmra.mrb[12].mxu0 %vm403_vm0, %v4762_v51 }
  0x6a   : > { %4365 = vmatmul.mubr.msk.bf16.gmra.mrb[12].mxu1 %vm403_vm0, %v4762_v51  ;;  %4318 = vmatprep.mubr.msk.bf16.mxu0 %vm403_vm0, %v4763_v52 }
  0x6b   : > { %4366 = vmatprep.mubr.msk.bf16.mxu1 %vm403_vm0, %v4763_v52 }
  0x71   : > { %4319 = vmatmul.mubr.msk.bf16.gmra.mrb[16].mxu0 %vm403_vm0, %v4763_v52 }
  0x72   : > { %4367 = vmatmul.mubr.msk.bf16.gmra.mrb[16].mxu1 %vm403_vm0, %v4763_v52  ;;  %4320 = vmatprep.mubr.msk.bf16.mxu0 %vm403_vm0, %v4764_v53 }
  0x73   : > { %4368 = vmatprep.mubr.msk.bf16.mxu1 %vm403_vm0, %v4764_v53 }
  0x79   : > { %4321 = vmatmul.mubr.msk.bf16.gmra.mrb[20].mxu0 %vm403_vm0, %v4764_v53 }
  0x7a   : > { %4369 = vmatmul.mubr.msk.bf16.gmra.mrb[20].mxu1 %vm403_vm0, %v4764_v53  ;;  %4322 = vmatprep.mubr.msk.bf16.mxu0 %vm403_vm0, %v4765_v54 }
  0x7b   : > { %4370 = vmatprep.mubr.msk.bf16.mxu1 %vm403_vm0, %v4765_v54 }
  0x81   : > { %4323 = vmatmul.mubr.msk.bf16.gmra.mrb[24].mxu0 %vm403_vm0, %v4765_v54 }
  0x82   : > { %4371 = vmatmul.mubr.msk.bf16.gmra.mrb[24].mxu1 %vm403_vm0, %v4765_v54  ;;  %4324 = vmatprep.mubr.msk.bf16.mxu0 %vm403_vm0, %v4766_v55 }
  0x83   : > { %4372 = vmatprep.mubr.msk.bf16.mxu1 %vm403_vm0, %v4766_v55 }
  0x89   : > { %4325 = vmatmul.mubr.msk.bf16.gmra.mrb[28].mxu0 %vm403_vm0, %v4766_v55 }
  0x8a   : > { %4373 = vmatmul.mubr.msk.bf16.gmra.mrb[28].mxu1 %vm403_vm0, %v4766_v55  ;;  %4326 = vmatprep.mubr.msk.bf16.mxu0 %vm403_vm0, %v4767_v56 }
  0x8b   : > { %4374 = vmatprep.mubr.msk.bf16.mxu1 %vm403_vm0, %v4767_v56 }
  0x91   : > { %4327 = vmatmul.mubr.msk.bf16.gmra.mrb[32].mxu0 %vm403_vm0, %v4767_v56 }
  0x92   : > { %4375 = vmatmul.mubr.msk.bf16.gmra.mrb[32].mxu1 %vm403_vm0, %v4767_v56  ;;  %4328 = vmatprep.mubr.msk.bf16.mxu0 %vm403_vm0, %v4768_v57 }
  0x93   : > { %4376 = vmatprep.mubr.msk.bf16.mxu1 %vm403_vm0, %v4768_v57 }
  0x99   : > { %4329 = vmatmul.mubr.msk.bf16.gmra.mrb[36].mxu0 %vm403_vm0, %v4768_v57 }
  0x9a   : > { %4377 = vmatmul.mubr.msk.bf16.gmra.mrb[36].mxu1 %vm403_vm0, %v4768_v57  ;;  %4330 = vmatprep.mubr.msk.bf16.mxu0 %vm403_vm0, %v4769_v58 }
  0x9b   : > { %4378 = vmatprep.mubr.msk.bf16.mxu1 %vm403_vm0, %v4769_v58 }
  0xa1   : > { %4331 = vmatmul.mubr.msk.bf16.gmra.mrb[40].mxu0 %vm403_vm0, %v4769_v58 }
  0xa2   : > { %4379 = vmatmul.mubr.msk.bf16.gmra.mrb[40].mxu1 %vm403_vm0, %v4769_v58  ;;  %4332 = vmatprep.mubr.msk.bf16.mxu0 %vm403_vm0, %v4770_v59 }
  0xa3   : > { %4380 = vmatprep.mubr.msk.bf16.mxu1 %vm403_vm0, %v4770_v59 }
  0xa9   : > { %4333 = vmatmul.mubr.msk.bf16.gmra.mrb[44].mxu0 %vm403_vm0, %v4770_v59 }
  0xaa   : > { %4381 = vmatmul.mubr.msk.bf16.gmra.mrb[44].mxu1 %vm403_vm0, %v4770_v59  ;;  %4334 = vmatprep.mubr.msk.bf16.mxu0 %vm403_vm0, %v4771_v60 }
  0xab   : > { %4382 = vmatprep.mubr.msk.bf16.mxu1 %vm403_vm0, %v4771_v60 }
  0xb1   : > { %4335 = vmatmul.mubr.msk.bf16.gmra.mrb[48].mxu0 %vm403_vm0, %v4771_v60 }
  0xb2   : > { %4383 = vmatmul.mubr.msk.bf16.gmra.mrb[48].mxu1 %vm403_vm0, %v4771_v60  ;;  %4336 = vmatprep.mubr.msk.bf16.mxu0 %vm403_vm0, %v4772_v61 }
  0xb3   : > { %4384 = vmatprep.mubr.msk.bf16.mxu1 %vm403_vm0, %v4772_v61 }
  0xb9   : > { %4337 = vmatmul.mubr.msk.bf16.gmra.mrb[52].mxu0 %vm403_vm0, %v4772_v61 }
  0xba   : > { %4385 = vmatmul.mubr.msk.bf16.gmra.mrb[52].mxu1 %vm403_vm0, %v4772_v61  ;;  %4338 = vmatprep.mubr.msk.bf16.mxu0 %vm403_vm0, %v4773_v62 }
  0xbb   : > { %4386 = vmatprep.mubr.msk.bf16.mxu1 %vm403_vm0, %v4773_v62 }
  0xc1   : > { %4339 = vmatmul.mubr.msk.bf16.gmra.mrb[56].mxu0 %vm403_vm0, %v4773_v62 }
  0xc2   : > { %4387 = vmatmul.mubr.msk.bf16.gmra.mrb[56].mxu1 %vm403_vm0, %v4773_v62  ;;  %4340 = vmatprep.mubr.msk.bf16.mxu0 %vm403_vm0, %v4774_v63 }
  0xc3   : > { %4388 = vmatprep.mubr.msk.bf16.mxu1 %vm403_vm0, %v4774_v63 }
  0xc9   : > { %4341 = vmatmul.mubr.msk.bf16.gmra.mrb[60].mxu0 %vm403_vm0, %v4774_v63 }
  0xca   : > { %4389 = vmatmul.mubr.msk.bf16.gmra.mrb[60].mxu1 %vm403_vm0, %v4774_v63 }
 0x124   : > { %v5490_v0 = vpop.f32.mrb[0].mxu0 }
 0x125   : > { %v5492_v1 = vpop.f32.mrb[0].mxu1  ;;  %v5494_v2 = vpop.f32.mrb[1].mxu0 }
 0x126   : > { %v1335_v3 = vmax.f32 %v5490_v0, %v5494_v2  ;;  %v5498_v4 = vpop.f32.mrb[1].mxu1  ;;  %v5500_v5 = vpop.f32.mrb[2].mxu0 }
 0x127   : > { %v5502_v6 = vpop.f32.mrb[2].mxu1  ;;  %v5504_v7 = vpop.f32.mrb[3].mxu0 }
 0x128   : > { %v1340_v8 = vmax.f32 %v5500_v5, %v5504_v7  ;;  %v5508_v9 = vpop.f32.mrb[3].mxu1  ;;  %v1336_v10 = vmax.f32 %v1335_v3, %v5492_v1 }
 0x12a   : > { %v1337_v11 = vmax.f32 %v1336_v10, %v5498_v4  ;;  %v1341_v12 = vmax.f32 %v1340_v8, %v5502_v6 }
 0x12c   : > { %1338 = vmax.xlane.f32.xlu0 %v1337_v11  ;;  %v5513_v13 = vpop.f32.mrb[4].mxu0  ;;  %v1342_v14 = vmax.f32 %v1341_v12, %v5508_v9 }
 0x12d   : > { %v5516_v15 = vpop.f32.mrb[4].mxu1  ;;  %v5518_v16 = vpop.f32.mrb[5].mxu0 }
 0x12e   : > { %v1345_v18 = vmax.f32 %v5513_v13, %v5518_v16  ;;  %v5554_v19 = vpop.f32.mrb[5].mxu1  ;;  %1343 = vmax.xlane.f32.xlu1 %v1342_v14  ;;  %v5556_v20 = vpop.f32.mrb[6].mxu0 }
 0x12f   : > { %v5558_v21 = vpop.f32.mrb[6].mxu1  ;;  %v5560_v22 = vpop.f32.mrb[7].mxu0 }
 0x130   : > { %v1350_v23 = vmax.f32 %v5556_v20, %v5560_v22  ;;  %v5564_v24 = vpop.f32.mrb[7].mxu1  ;;  %v1346_v25 = vmax.f32 %v1345_v18, %v5516_v15 }
 0x132   : > { %v1347_v26 = vmax.f32 %v1346_v25, %v5554_v19  ;;  %v1351_v27 = vmax.f32 %v1350_v23, %v5558_v21 }
 0x134   : > { %1348 = vmax.xlane.f32.xlu0 %v1347_v26  ;;  %v5569_v28 = vpop.f32.mrb[8].mxu0  ;;  %v1352_v29 = vmax.f32 %v1351_v27, %v5564_v24 }
 0x135   : > { %7891 = vst [vmem:[#allocation5_spill] sm:$0xff] %v5569_v28  ;;  %v5572_v30 = vpop.f32.mrb[8].mxu1  ;;  %v5574_v31 = vpop.f32.mrb[9].mxu0 }
 0x136   : > { %7892 = vst [vmem:[#allocation6_spill] sm:$0xff] %v5572_v30  ;;  %7893 = vst [vmem:[#allocation7_spill] sm:$0xff] %v5574_v31  ;;  %v1355_v32 = vmax.f32 %v5569_v28, %v5574_v31  ;;  %v5578_v33 = vpop.f32.mrb[9].mxu1  ;;  %1353 = vmax.xlane.f32.xlu1 %v1352_v29  ;;  %v5580_v34 = vpop.f32.mrb[10].mxu0 }
 0x137   : > { %7894 = vst [vmem:[#allocation8_spill] sm:$0xff] %v5578_v33  ;;  %7895 = vst [vmem:[#allocation9_spill] sm:$0xff] %v5580_v34  ;;  %v5582_v35 = vpop.f32.mrb[10].mxu1  ;;  %v5584_v36 = vpop.f32.mrb[11].mxu0 }
 0x138   : > { %7896 = vst [vmem:[#allocation10_spill] sm:$0xff] %v5582_v35  ;;  %7897 = vst [vmem:[#allocation11_spill] sm:$0xff] %v5584_v36  ;;  %v1360_v37 = vmax.f32 %v5580_v34, %v5584_v36  ;;  %v5588_v38 = vpop.f32.mrb[11].mxu1  ;;  %v1356_v39 = vmax.f32 %v1355_v32, %v5572_v30 }
 0x139   : > { %7898 = vst [vmem:[#allocation12_spill] sm:$0xff] %v5588_v38 }
 0x13a   : > { %v1357_v40 = vmax.f32 %v1356_v39, %v5578_v33  ;;  %v1361_v41 = vmax.f32 %v1360_v37, %v5582_v35 }
 0x13c   : > { %1358 = vmax.xlane.f32.xlu0 %v1357_v40  ;;  %v5593_v42 = vpop.f32.mrb[12].mxu0  ;;  %v1362_v43 = vmax.f32 %v1361_v41, %v5588_v38 }
 0x13d   : > { %7899 = vst [vmem:[#allocation13_spill] sm:$0xff] %v5593_v42  ;;  %v5596_v44 = vpop.f32.mrb[12].mxu1  ;;  %v5598_v45 = vpop.f32.mrb[13].mxu0 }
 0x13e   : > { %7900 = vst [vmem:[#allocation14_spill] sm:$0xff] %v5596_v44  ;;  %7901 = vst [vmem:[#allocation15_spill] sm:$0xff] %v5598_v45  ;;  %v1365_v46 = vmax.f32 %v5593_v42, %v5598_v45  ;;  %v5602_v47 = vpop.f32.mrb[13].mxu1  ;;  %1363 = vmax.xlane.f32.xlu1 %v1362_v43  ;;  %v5604_v48 = vpop.f32.mrb[14].mxu0 }
 0x13f   : > { %7902 = vst [vmem:[#allocation16_spill] sm:$0xff] %v5602_v47  ;;  %7903 = vst [vmem:[#allocation17_spill] sm:$0xff] %v5604_v48  ;;  %v5606_v50 = vpop.f32.mrb[14].mxu1  ;;  %v5608_v51 = vpop.f32.mrb[15].mxu0 }
 0x140   : > { %7904 = vst [vmem:[#allocation18_spill] sm:$0xff] %v5606_v50  ;;  %7905 = vst [vmem:[#allocation19_spill] sm:$0xff] %v5608_v51  ;;  %v1370_v52 = vmax.f32 %v5604_v48, %v5608_v51  ;;  %v5612_v53 = vpop.f32.mrb[15].mxu1  ;;  %v1366_v54 = vmax.f32 %v1365_v46, %v5596_v44 }
 0x141   : > { %7906 = vst [vmem:[#allocation20_spill] sm:$0xff] %v5612_v53 }
 0x142   : > { %v1367_v55 = vmax.f32 %v1366_v54, %v5602_v47  ;;  %v1371_v56 = vmax.f32 %v1370_v52, %v5606_v50 }
 0x144   : > { %1368 = vmax.xlane.f32.xlu0 %v1367_v55  ;;  %v5617_v57 = vpop.f32.mrb[16].mxu0  ;;  %v1372_v58 = vmax.f32 %v1371_v56, %v5612_v53 }
 0x145   : > { %7907 = vst [vmem:[#allocation21_spill] sm:$0xff] %v5617_v57  ;;  %v5620_v59 = vpop.f32.mrb[16].mxu1  ;;  %v5622_v60 = vpop.f32.mrb[17].mxu0 }
 0x146   : > { %7908 = vst [vmem:[#allocation22_spill] sm:$0xff] %v5620_v59  ;;  %7909 = vst [vmem:[#allocation23_spill] sm:$0xff] %v5622_v60  ;;  %v1375_v61 = vmax.f32 %v5617_v57, %v5622_v60  ;;  %v5626_v62 = vpop.f32.mrb[17].mxu1  ;;  %1373 = vmax.xlane.f32.xlu1 %v1372_v58  ;;  %v5628_v63 = vpop.f32.mrb[18].mxu0 }
 0x147   : > { %7910 = vst [vmem:[#allocation24_spill] sm:$0xff] %v5626_v62  ;;  %7911 = vst [vmem:[#allocation25_spill] sm:$0xff] %v5628_v63  ;;  %v5630_v3 = vpop.f32.mrb[18].mxu1  ;;  %v5632_v8 = vpop.f32.mrb[19].mxu0 }
 0x148   : > { %7912 = vst [vmem:[#allocation26_spill] sm:$0xff] %v5630_v3  ;;  %7913 = vst [vmem:[#allocation27_spill] sm:$0xff] %v5632_v8  ;;  %v1380_v10 = vmax.f32 %v5628_v63, %v5632_v8  ;;  %v5636_v11 = vpop.f32.mrb[19].mxu1  ;;  %v1376_v12 = vmax.f32 %v1375_v61, %v5620_v59 }
 0x149   : > { %7914 = vst [vmem:[#allocation28_spill] sm:$0xff] %v5636_v11 }
 0x14a   : > { %v1377_v14 = vmax.f32 %v1376_v12, %v5626_v62  ;;  %v1381_v17 = vmax.f32 %v1380_v10, %v5630_v3 }
 0x14c   : > { %1378 = vmax.xlane.f32.xlu0 %v1377_v14  ;;  %v5641_v18 = vpop.f32.mrb[20].mxu0  ;;  %v1382_v23 = vmax.f32 %v1381_v17, %v5636_v11 }
 0x14d   : > { %7915 = vst [vmem:[#allocation29_spill] sm:$0xff] %v5641_v18  ;;  %v5644_v25 = vpop.f32.mrb[20].mxu1  ;;  %v5646_v26 = vpop.f32.mrb[21].mxu0 }
 0x14e   : > { %7916 = vst [vmem:[#allocation30_spill] sm:$0xff] %v5644_v25  ;;  %7917 = vst [vmem:[#allocation31_spill] sm:$0xff] %v5646_v26  ;;  %v1385_v27 = vmax.f32 %v5641_v18, %v5646_v26  ;;  %v5650_v29 = vpop.f32.mrb[21].mxu1  ;;  %1383 = vmax.xlane.f32.xlu1 %v1382_v23  ;;  %v5652_v32 = vpop.f32.mrb[22].mxu0 }
 0x14f   : > { %7918 = vst [vmem:[#allocation32_spill] sm:$0xff] %v5650_v29  ;;  %7919 = vst [vmem:[#allocation33_spill] sm:$0xff] %v5652_v32  ;;  %v5654_v37 = vpop.f32.mrb[22].mxu1  ;;  %v5656_v39 = vpop.f32.mrb[23].mxu0 }
 0x150   : > { %7920 = vst [vmem:[#allocation34_spill] sm:$0xff] %v5654_v37  ;;  %7921 = vst [vmem:[#allocation35_spill] sm:$0xff] %v5656_v39  ;;  %v1390_v40 = vmax.f32 %v5652_v32, %v5656_v39  ;;  %v5660_v41 = vpop.f32.mrb[23].mxu1  ;;  %v1386_v43 = vmax.f32 %v1385_v27, %v5644_v25 }
 0x151   : > { %7922 = vst [vmem:[#allocation36_spill] sm:$0xff] %v5660_v41 }
 0x152   : > { %v1387_v46 = vmax.f32 %v1386_v43, %v5650_v29  ;;  %v1391_v49 = vmax.f32 %v1390_v40, %v5654_v37 }
 0x154   : > { %1388 = vmax.xlane.f32.xlu0 %v1387_v46  ;;  %v5665_v52 = vpop.f32.mrb[24].mxu0  ;;  %v1392_v54 = vmax.f32 %v1391_v49, %v5660_v41 }
 0x155   : > { %7923 = vst [vmem:[#allocation37_spill] sm:$0xff] %v5665_v52  ;;  %v5668_v55 = vpop.f32.mrb[24].mxu1  ;;  %v5670_v56 = vpop.f32.mrb[25].mxu0 }
 0x156   : > { %7924 = vst [vmem:[#allocation38_spill] sm:$0xff] %v5668_v55  ;;  %7925 = vst [vmem:[#allocation39_spill] sm:$0xff] %v5670_v56  ;;  %v1395_v58 = vmax.f32 %v5665_v52, %v5670_v56  ;;  %v5674_v61 = vpop.f32.mrb[25].mxu1  ;;  %1393 = vmax.xlane.f32.xlu1 %v1392_v54  ;;  %v5676_v10 = vpop.f32.mrb[26].mxu0 }
 0x157   : > { %7926 = vst [vmem:[#allocation40_spill] sm:$0xff] %v5674_v61  ;;  %7927 = vst [vmem:[#allocation41_spill] sm:$0xff] %v5676_v10  ;;  %v5678_v12 = vpop.f32.mrb[26].mxu1  ;;  %v5680_v14 = vpop.f32.mrb[27].mxu0 }
 0x158   : > { %7928 = vst [vmem:[#allocation42_spill] sm:$0xff] %v5678_v12  ;;  %7929 = vst [vmem:[#allocation43_spill] sm:$0xff] %v5680_v14  ;;  %v1400_v17 = vmax.f32 %v5676_v10, %v5680_v14  ;;  %v5684_v23 = vpop.f32.mrb[27].mxu1  ;;  %v1396_v27 = vmax.f32 %v1395_v58, %v5668_v55 }
 0x159   : > { %7930 = vst [vmem:[#allocation44_spill] sm:$0xff] %v5684_v23 }
 0x15a   : > { %v1397_v40 = vmax.f32 %v1396_v27, %v5674_v61  ;;  %v1401_v43 = vmax.f32 %v1400_v17, %v5678_v12 }
 0x15c   : > { %1398 = vmax.xlane.f32.xlu1 %v1397_v40  ;;  %v5689_v46 = vpop.f32.mrb[28].mxu0  ;;  %v1402_v49 = vmax.f32 %v1401_v43, %v5684_v23 }
 0x15d   : > { %7931 = vst [vmem:[#allocation45_spill] sm:$0xff] %v5689_v46  ;;  %v5692_v54 = vpop.f32.mrb[28].mxu1  ;;  %v5694_v56 = vpop.f32.mrb[29].mxu0 }
 0x15e   : > { %7932 = vst [vmem:[#allocation46_spill] sm:$0xff] %v5692_v54  ;;  %7933 = vst [vmem:[#allocation47_spill] sm:$0xff] %v5694_v56  ;;  %v1405_v52 = vmax.f32 %v5689_v46, %v5694_v56  ;;  %v5698_v41 = vpop.f32.mrb[29].mxu1  ;;  %1403 = vmax.xlane.f32.xlu0 %v1402_v49  ;;  %v5700_v58 = vpop.f32.mrb[30].mxu0 }
 0x15f   : > { %7934 = vst [vmem:[#allocation48_spill] sm:$0xff] %v5698_v41  ;;  %7935 = vst [vmem:[#allocation49_spill] sm:$0xff] %v5700_v58  ;;  %v5702_v27 = vpop.f32.mrb[30].mxu1  ;;  %v5704_v17 = vpop.f32.mrb[31].mxu0 }
 0x160   : > { %7936 = vst [vmem:[#allocation50_spill] sm:$0xff] %v5702_v27  ;;  %7937 = vst [vmem:[#allocation51_spill] sm:$0xff] %v5704_v17  ;;  %v1410_v40 = vmax.f32 %v5700_v58, %v5704_v17  ;;  %v5708_v43 = vpop.f32.mrb[31].mxu1  ;;  %v1406_v61 = vmax.f32 %v1405_v52, %v5692_v54 }
 0x161   : > { %7938 = vst [vmem:[#allocation52_spill] sm:$0xff] %v5708_v43 }
 0x162   : > { %v1407_v55 = vmax.f32 %v1406_v61, %v5698_v41  ;;  %v1411_v56 = vmax.f32 %v1410_v40, %v5702_v27 }
 0x164   : > { %1408 = vmax.xlane.f32.xlu1 %v1407_v55  ;;  %v5713_v46 = vpop.f32.mrb[32].mxu0  ;;  %v1412_v49 = vmax.f32 %v1411_v56, %v5708_v43 }
 0x165   : > { %7939 = vst [vmem:[#allocation53_spill] sm:$0xff] %v5713_v46  ;;  %v5716_v37 = vpop.f32.mrb[32].mxu1  ;;  %v5718_v39 = vpop.f32.mrb[33].mxu0 }
 0x166   : > { %7940 = vst [vmem:[#allocation54_spill] sm:$0xff] %v5716_v37  ;;  %7941 = vst [vmem:[#allocation55_spill] sm:$0xff] %v5718_v39  ;;  %v1415_v32 = vmax.f32 %v5713_v46, %v5718_v39  ;;  %v5722_v17 = vpop.f32.mrb[33].mxu1  ;;  %1413 = vmax.xlane.f32.xlu0 %v1412_v49  ;;  %v5724_v52 = vpop.f32.mrb[34].mxu0 }
 0x167   : > { %7942 = vst [vmem:[#allocation56_spill] sm:$0xff] %v5722_v17  ;;  %7943 = vst [vmem:[#allocation57_spill] sm:$0xff] %v5724_v52  ;;  %v5726_v61 = vpop.f32.mrb[34].mxu1  ;;  %v5728_v40 = vpop.f32.mrb[35].mxu0 }
 0x168   : > { %7944 = vst [vmem:[#allocation58_spill] sm:$0xff] %v5726_v61  ;;  %7945 = vst [vmem:[#allocation59_spill] sm:$0xff] %v5728_v40  ;;  %v1420_v55 = vmax.f32 %v5724_v52, %v5728_v40  ;;  %v5732_v56 = vpop.f32.mrb[35].mxu1  ;;  %v5735_v41 = vmax.f32 %v1415_v32, %v5716_v37  ;;  %v5217_v40 = vmov 0.0  }
 0x169   : > { %7946 = vst [vmem:[#allocation60_spill] sm:$0xff] %v5732_v56  ;;  %404 = vst.msk [vmem:[#allocation4] sm:$0xff] %vm403_vm0, %v5217_v40 }
 0x16a   : > { %v5740_v46 = vmax.f32 %v1420_v55, %v5726_v61  ;;  %371 = vst.msk [vmem:[#allocation3] sm:$0xff] %vm338_vm1, %v5217_v40  ;;  %372 = vst.msk [vmem:[#allocation3 + $0x8] sm:$0xff] %vm338_vm1, %v5217_v40  ;;  %v7975_v45 = vmax.f32 %v5735_v41, %v5722_v17 }
 0x16b   : > { %373 = vst.msk [vmem:[#allocation3 + $0x10] sm:$0xff] %vm338_vm1, %v5217_v40  ;;  %374 = vst.msk [vmem:[#allocation3 + $0x18] sm:$0xff] %vm338_vm1, %v5217_v40 }
 0x16c   : > { %v5742_v49 = vpop.f32.mrb[36].mxu0  ;;  %375 = vst.msk [vmem:[#allocation3 + $0x20] sm:$0xff] %vm338_vm1, %v5217_v40  ;;  %376 = vst.msk [vmem:[#allocation3 + $0x28] sm:$0xff] %vm338_vm1, %v5217_v40  ;;  %v7984_v33 = vmax.f32 %v5740_v46, %v5732_v56 }
 0x16d   : > { %7947 = vst [vmem:[#allocation61_spill] sm:$0xff] %v5742_v49  ;;  %v5746_v43 = vpop.f32.mrb[36].mxu1  ;;  %v5748_v27 = vpop.f32.mrb[37].mxu0  ;;  %377 = vst.msk [vmem:[#allocation3 + $0x30] sm:$0xff] %vm338_vm1, %v5217_v40 }
 0x16e   : > { %7948 = vst [vmem:[#allocation62_spill] sm:$0xff] %v5746_v43  ;;  %7949 = vst [vmem:[#allocation63_spill] sm:$0xff] %v5748_v27  ;;  %v1425_v32 = vmax.f32 %v5742_v49, %v5748_v27  ;;  %v5880_v55 = vpop.f32.mrb[37].mxu1  ;;  %v5882_v54 = vpop.f32.mrb[38].mxu0 }
 0x16f   : > { %378 = vst.msk [vmem:[#allocation3 + $0x38] sm:$0xff] %vm338_vm1, %v5217_v40  ;;  %379 = vst.msk [vmem:[#allocation3 + $0x40] sm:$0xff] %vm338_vm1, %v5217_v40  ;;  %v5884_v39 = vpop.f32.mrb[38].mxu1  ;;  %v5886_v37 = vpop.f32.mrb[39].mxu0 }
 0x170   : > { %380 = vst.msk [vmem:[#allocation3 + $0x48] sm:$0xff] %vm338_vm1, %v5217_v40  ;;  %381 = vst.msk [vmem:[#allocation3 + $0x50] sm:$0xff] %vm338_vm1, %v5217_v40  ;;  %v1430_v61 = vmax.f32 %v5882_v54, %v5886_v37  ;;  %v5890_v52 = vpop.f32.mrb[39].mxu1  ;;  %v5893_v58 = vmax.f32 %v1425_v32, %v5746_v43 }
 0x171   : > { %382 = vst.msk [vmem:[#allocation3 + $0x58] sm:$0xff] %vm338_vm1, %v5217_v40  ;;  %383 = vst.msk [vmem:[#allocation3 + $0x60] sm:$0xff] %vm338_vm1, %v5217_v40 }
 0x172   : > { %384 = vst.msk [vmem:[#allocation3 + $0x68] sm:$0xff] %vm338_vm1, %v5217_v40  ;;  %385 = vst.msk [vmem:[#allocation3 + $0x70] sm:$0xff] %vm338_vm1, %v5217_v40 }
 0x173   : > { %386 = vst.msk [vmem:[#allocation3 + $0x78] sm:$0xff] %vm338_vm1, %v5217_v40  ;;  %387 = vst.msk [vmem:[#allocation3 + $0x80] sm:$0xff] %vm338_vm1, %v5217_v40 }
 0x174   : > { %388 = vst.msk [vmem:[#allocation3 + $0x88] sm:$0xff] %vm338_vm1, %v5217_v40  ;;  %389 = vst.msk [vmem:[#allocation3 + $0x90] sm:$0xff] %vm338_vm1, %v5217_v40  ;;  %v5900_v49 = vpop.f32.mrb[40].mxu0 }
 0x175   : > { %390 = vst.msk [vmem:[#allocation3 + $0x98] sm:$0xff] %vm338_vm1, %v5217_v40  ;;  %391 = vst.msk [vmem:[#allocation3 + $0xa0] sm:$0xff] %vm338_vm1, %v5217_v40  ;;  %v5904_v25 = vpop.f32.mrb[40].mxu1  ;;  %v5906_v26 = vpop.f32.mrb[41].mxu0 }
 0x176   : > { %392 = vst.msk [vmem:[#allocation3 + $0xa8] sm:$0xff] %vm338_vm1, %v5217_v40  ;;  %393 = vst.msk [vmem:[#allocation3 + $0xb0] sm:$0xff] %vm338_vm1, %v5217_v40  ;;  %v5910_v32 = vpop.f32.mrb[41].mxu1  ;;  %v5912_v43 = vpop.f32.mrb[42].mxu0 }
 0x177   : > { %394 = vst.msk [vmem:[#allocation3 + $0xb8] sm:$0xff] %vm338_vm1, %v5217_v40  ;;  %395 = vst.msk [vmem:[#allocation3 + $0xc0] sm:$0xff] %vm338_vm1, %v5217_v40 }
 0x178   : > { %396 = vst.msk [vmem:[#allocation3 + $0xc8] sm:$0xff] %vm338_vm1, %v5217_v40  ;;  %397 = vst.msk [vmem:[#allocation3 + $0xd0] sm:$0xff] %vm338_vm1, %v5217_v40 }
 0x179   : > { %398 = vst.msk [vmem:[#allocation3 + $0xd8] sm:$0xff] %vm338_vm1, %v5217_v40  ;;  %399 = vst.msk [vmem:[#allocation3 + $0xe0] sm:$0xff] %vm338_vm1, %v5217_v40 }
 0x17a   : > { %400 = vst.msk [vmem:[#allocation3 + $0xe8] sm:$0xff] %vm338_vm1, %v5217_v40  ;;  %401 = vst.msk [vmem:[#allocation3 + $0xf0] sm:$0xff] %vm338_vm1, %v5217_v40 }
 0x17b   : > { %402 = vst.msk [vmem:[#allocation3 + $0xf8] sm:$0xff] %vm338_vm1, %v5217_v40  ;;  %7950 = vst [vmem:[#allocation64_spill] sm:$0xff] %v5880_v55 }
 0x17c   : > { %405 = vst.msk [vmem:[#allocation4 + $0x8] sm:$0xff] %vm403_vm0, %v5217_v40  ;;  %406 = vst.msk [vmem:[#allocation4 + $0x10] sm:$0xff] %vm403_vm0, %v5217_v40 }
 0x17d   : > { %407 = vst.msk [vmem:[#allocation4 + $0x18] sm:$0xff] %vm403_vm0, %v5217_v40  ;;  %408 = vst.msk [vmem:[#allocation4 + $0x20] sm:$0xff] %vm403_vm0, %v5217_v40 }
 0x17e   : > { %409 = vst.msk [vmem:[#allocation4 + $0x28] sm:$0xff] %vm403_vm0, %v5217_v40  ;;  %410 = vst.msk [vmem:[#allocation4 + $0x30] sm:$0xff] %vm403_vm0, %v5217_v40 }
 0x17f   : > { %411 = vst.msk [vmem:[#allocation4 + $0x38] sm:$0xff] %vm403_vm0, %v5217_v40  ;;  %412 = vst.msk [vmem:[#allocation4 + $0x40] sm:$0xff] %vm403_vm0, %v5217_v40 }
 0x180   : > { %413 = vst.msk [vmem:[#allocation4 + $0x48] sm:$0xff] %vm403_vm0, %v5217_v40  ;;  %414 = vst.msk [vmem:[#allocation4 + $0x50] sm:$0xff] %vm403_vm0, %v5217_v40 }
 0x181   : > { %415 = vst.msk [vmem:[#allocation4 + $0x58] sm:$0xff] %vm403_vm0, %v5217_v40  ;;  %416 = vst.msk [vmem:[#allocation4 + $0x60] sm:$0xff] %vm403_vm0, %v5217_v40 }
 0x182   : > { %417 = vst.msk [vmem:[#allocation4 + $0x68] sm:$0xff] %vm403_vm0, %v5217_v40  ;;  %418 = vst.msk [vmem:[#allocation4 + $0x70] sm:$0xff] %vm403_vm0, %v5217_v40 }
 0x183   : > { %419 = vst.msk [vmem:[#allocation4 + $0x78] sm:$0xff] %vm403_vm0, %v5217_v40  ;;  %420 = vst.msk [vmem:[#allocation4 + $0x80] sm:$0xff] %vm403_vm0, %v5217_v40 }
 0x184   : > { %421 = vst.msk [vmem:[#allocation4 + $0x88] sm:$0xff] %vm403_vm0, %v5217_v40  ;;  %422 = vst.msk [vmem:[#allocation4 + $0x90] sm:$0xff] %vm403_vm0, %v5217_v40 }
 0x185   : > { %423 = vst.msk [vmem:[#allocation4 + $0x98] sm:$0xff] %vm403_vm0, %v5217_v40  ;;  %424 = vst.msk [vmem:[#allocation4 + $0xa0] sm:$0xff] %vm403_vm0, %v5217_v40 }
 0x186   : > { %425 = vst.msk [vmem:[#allocation4 + $0xa8] sm:$0xff] %vm403_vm0, %v5217_v40  ;;  %426 = vst.msk [vmem:[#allocation4 + $0xb0] sm:$0xff] %vm403_vm0, %v5217_v40 }
 0x187   : > { %427 = vst.msk [vmem:[#allocation4 + $0xb8] sm:$0xff] %vm403_vm0, %v5217_v40  ;;  %428 = vst.msk [vmem:[#allocation4 + $0xc0] sm:$0xff] %vm403_vm0, %v5217_v40 }
 0x188   : > { %429 = vst.msk [vmem:[#allocation4 + $0xc8] sm:$0xff] %vm403_vm0, %v5217_v40  ;;  %430 = vst.msk [vmem:[#allocation4 + $0xd0] sm:$0xff] %vm403_vm0, %v5217_v40 }
 0x189   : > { %431 = vst.msk [vmem:[#allocation4 + $0xd8] sm:$0xff] %vm403_vm0, %v5217_v40  ;;  %432 = vst.msk [vmem:[#allocation4 + $0xe0] sm:$0xff] %vm403_vm0, %v5217_v40 }
 0x18a   : > { %433 = vst.msk [vmem:[#allocation4 + $0xe8] sm:$0xff] %vm403_vm0, %v5217_v40  ;;  %434 = vst.msk [vmem:[#allocation4 + $0xf0] sm:$0xff] %vm403_vm0, %v5217_v40 }
 0x18b   : > { %435 = vst.msk [vmem:[#allocation4 + $0xf8] sm:$0xff] %vm403_vm0, %v5217_v40  ;;  %7951 = vst [vmem:[#allocation65_spill] sm:$0xff] %v5882_v54  ;;  %v5896_v40 = vmax.f32 %v1430_v61, %v5884_v39  ;;  %v5914_v61 = vpop.f32.mrb[42].mxu1 }
 0x18c   : > { %7952 = vst [vmem:[#allocation66_spill] sm:$0xff] %v5884_v39  ;;  %7953 = vst [vmem:[#allocation67_spill] sm:$0xff] %v5886_v37  ;;  %v1435_v37 = vmax.f32 %v5900_v49, %v5906_v26  ;;  %v5916_v39 = vpop.f32.mrb[43].mxu0  ;;  %v5920_v54 = vpop.f32.mrb[43].mxu1 }
 0x18d   : > { %7954 = vst [vmem:[#allocation68_spill] sm:$0xff] %v5890_v52  ;;  %7955 = vst [vmem:[#allocation69_spill] sm:$0xff] %v5900_v49  ;;  %v1440_v27 = vmax.f32 %v5912_v43, %v5916_v39  ;;  %v5930_v49 = vpop.f32.mrb[44].mxu0  ;;  %v5934_v12 = vpop.f32.mrb[44].mxu1 }
 0x18e   : > { %7956 = vst [vmem:[#allocation70_spill] sm:$0xff] %v5904_v25  ;;  %7957 = vst [vmem:[#allocation71_spill] sm:$0xff] %v5906_v26  ;;  %v5923_v29 = vmax.f32 %v1435_v37, %v5904_v25  ;;  %v5936_v14 = vpop.f32.mrb[45].mxu0  ;;  %v5940_v37 = vpop.f32.mrb[45].mxu1 }
 0x18f   : > { %7958 = vst [vmem:[#allocation72_spill] sm:$0xff] %v5910_v32  ;;  %7959 = vst [vmem:[#allocation73_spill] sm:$0xff] %v5912_v43  ;;  %v5928_v26 = vmax.f32 %v1440_v27, %v5914_v61  ;;  %v5942_v25 = vpop.f32.mrb[46].mxu0  ;;  %v5944_v18 = vpop.f32.mrb[46].mxu1 }
 0x190   : > { %7960 = vst [vmem:[#allocation74_spill] sm:$0xff] %v5914_v61  ;;  %7961 = vst [vmem:[#allocation75_spill] sm:$0xff] %v5916_v39  ;;  %v1445_v39 = vmax.f32 %v5930_v49, %v5936_v14  ;;  %v5946_v27 = vpop.f32.mrb[47].mxu0  ;;  %v5950_v43 = vpop.f32.mrb[47].mxu1 }
 0x191   : > { %7962 = vst [vmem:[#allocation76_spill] sm:$0xff] %v5920_v54  ;;  %7963 = vst [vmem:[#allocation77_spill] sm:$0xff] %v5930_v49  ;;  %v1450_v61 = vmax.f32 %v5942_v25, %v5946_v27  ;;  %v5960_v49 = vpop.f32.mrb[48].mxu0  ;;  %v5964_v3 = vpop.f32.mrb[48].mxu1 }
 0x192   : > { %7964 = vst [vmem:[#allocation78_spill] sm:$0xff] %v5934_v12  ;;  %7965 = vst [vmem:[#allocation79_spill] sm:$0xff] %v5936_v14  ;;  %v5953_v23 = vmax.f32 %v1445_v39, %v5934_v12  ;;  %v5966_v8 = vpop.f32.mrb[49].mxu0  ;;  %v5970_v39 = vpop.f32.mrb[49].mxu1 }
 0x193   : > { %7966 = vst [vmem:[#allocation80_spill] sm:$0xff] %v5940_v37  ;;  %7967 = vst [vmem:[#allocation81_spill] sm:$0xff] %v5942_v25  ;;  %v5956_v10 = vmax.f32 %v1450_v61, %v5944_v18  ;;  %v5972_v12 = vpop.f32.mrb[50].mxu0  ;;  %v5974_v61 = vpop.f32.mrb[50].mxu1 }
 0x194   : > { %7968 = vst [vmem:[#allocation82_spill] sm:$0xff] %v5944_v18  ;;  %7969 = vst [vmem:[#allocation83_spill] sm:$0xff] %v5946_v27  ;;  %v1455_v27 = vmax.f32 %v5960_v49, %v5966_v8  ;;  %v5976_v18 = vpop.f32.mrb[51].mxu0  ;;  %v5980_v25 = vpop.f32.mrb[51].mxu1 }
 0x195   : > { %7970 = vst [vmem:[#allocation84_spill] sm:$0xff] %v5950_v43  ;;  %v1460_v14 = vmax.f32 %v5972_v12, %v5976_v18  ;;  %v5985_v59 = vpop.f32.mrb[52].mxu0  ;;  %v5988_v57 = vpop.f32.mrb[52].mxu1 }
 0x196   : > { %v1456_v11 = vmax.f32 %v1455_v27, %v5964_v3  ;;  %v5990_v53 = vpop.f32.mrb[53].mxu0  ;;  %v5994_v51 = vpop.f32.mrb[53].mxu1 }
 0x197   : > { %v1461_v62 = vmax.f32 %v1460_v14, %v5974_v61  ;;  %v1465_v50 = vmax.f32 %v5985_v59, %v5990_v53  ;;  %v5996_v48 = vpop.f32.mrb[54].mxu0  ;;  %v5998_v27 = vpop.f32.mrb[54].mxu1 }
 0x198   : > { %v1457_v63 = vmax.f32 %v1456_v11, %v5970_v39  ;;  %7971 = vst [vmem:[#allocation85_spill] sm:$0xff] %v5996_v48  ;;  %7972 = vst [vmem:[#allocation86_spill] sm:$0xff] %v5998_v27  ;;  %v6000_v11 = vpop.f32.mrb[55].mxu0  ;;  %v6004_v14 = vpop.f32.mrb[55].mxu1 }
 0x199   : > { %v1462_v60 = vmax.f32 %v1461_v62, %v5980_v25  ;;  %7973 = vst [vmem:[#allocation87_spill] sm:$0xff] %v6000_v11  ;;  %7974 = vst [vmem:[#allocation88_spill] sm:$0xff] %v6004_v14  ;;  %v1466_v62 = vmax.f32 %v1465_v50, %v5988_v57  ;;  %v6012_v42 = vpop.f32.mrb[56].mxu0  ;;  %v6015_v35 = vpop.f32.mrb[56].mxu1 }
 0x19a   : > { %1458 = vmax.xlane.f32.xlu0 %v1457_v63  ;;  %v1470_v63 = vmax.f32 %v5996_v48, %v6000_v11  ;;  %7976 = vst [vmem:[#allocation89_spill] sm:$0xff] %v6012_v42  ;;  %7977 = vst [vmem:[#allocation90_spill] sm:$0xff] %v6015_v35  ;;  %v6017_v36 = vpop.f32.mrb[57].mxu0 }
 0x19b   : > { %v1467_v47 = vmax.f32 %v1466_v62, %v5994_v51  ;;  %7978 = vst [vmem:[#allocation91_spill] sm:$0xff] %v6017_v36  ;;  %v1475_v50 = vmax.f32 %v6012_v42, %v6017_v36  ;;  %v6023_v62 = vpop.f32.mrb[58].mxu0 }
 0x19c   : > { %v1471_v44 = vmax.f32 %v1470_v63, %v5998_v27  ;;  %7980 = vst [vmem:[#allocation93_spill] sm:$0xff] %v6023_v62  ;;  %v6027_v41 = vpop.f32.mrb[59].mxu0 }
 0x19d   : > { %1468 = vmax.xlane.f32.xlu1 %v1467_v47  ;;  %7982 = vst [vmem:[#allocation95_spill] sm:$0xff] %v6027_v41  ;;  %v6039_v30 = vpop.f32.mrb[60].mxu0 }
 0x19e   : > { %1463 = vmax.xlane.f32.xlu0 %v1462_v60  ;;  %v1472_v38 = vmax.f32 %v1471_v44, %v6004_v14  ;;  %v6021_v60 = vpop.f32.mrb[57].mxu1  ;;  %v1476_v44 = vmax.f32 %v1475_v50, %v6015_v35  ;;  %7985 = vst [vmem:[#allocation97_spill] sm:$0xff] %v6039_v30  ;;  %v6042_v28 = vpop.f32.mrb[61].mxu0  ;;  %v6341_v35 = vld [vmem:[#allocation2 + $0xf8] sm:$0xff] }
 0x19f   : > { %7979 = vst [vmem:[#allocation92_spill] sm:$0xff] %v6021_v60  ;;  %v6025_v63 = vpop.f32.mrb[58].mxu1  ;;  %7986 = vst [vmem:[#allocation98_spill] sm:$0xff] %v6042_v28  ;;  %v6048_v50 = vpop.f32.mrb[62].mxu0 }
 0x1a0   : > { %7981 = vst [vmem:[#allocation94_spill] sm:$0xff] %v6025_v63  ;;  %v6031_v47 = vpop.f32.mrb[59].mxu1  ;;  %v1477_v17 = vmax.f32 %v1476_v44, %v6021_v60  ;;  %7988 = vst [vmem:[#allocation100_spill] sm:$0xff] %v6048_v50  ;;  %v6324_v60 = vld [vmem:[#allocation2 + $0x90] sm:$0xff] }
 0x1a1   : > { %7983 = vst [vmem:[#allocation96_spill] sm:$0xff] %v6031_v47  ;;  %1473 = vmax.xlane.f32.xlu1 %v1472_v38  ;;  %v1485_v38 = vmax.f32 %v6039_v30, %v6042_v28  ;;  %8033 = vst [vmem:[#allocation141_spill] sm:$0xff] %v6324_v60 }
 0x1a2   : > { %1418 = vmax.xlane.f32.xlu0 %v7975_v45  ;;  %v1480_v45 = vmax.f32 %v6023_v62, %v6027_v41  ;;  %v6044_v41 = vpop.f32.mrb[60].mxu1  ;;  %v6307_v62 = vld [vmem:[#allocation2 + $0xe8] sm:$0xff]  ;;  %8035 = vst [vmem:[#allocation143_spill] sm:$0xff] %v6341_v35 }
 0x1a3   : > { %7987 = vst [vmem:[#allocation99_spill] sm:$0xff] %v6044_v41  ;;  %v6050_v44 = vpop.f32.mrb[61].mxu1  ;;  %8030 = vst [vmem:[#allocation138_spill] sm:$0xff] %v6307_v62 }
 0x1a4   : > { %v1481_v34 = vmax.f32 %v1480_v45, %v6025_v63  ;;  %7989 = vst [vmem:[#allocation101_spill] sm:$0xff] %v6050_v44  ;;  %v6052_v45 = vpop.f32.mrb[63].mxu0  ;;  %v6054_v46 = vpop.f32.mrb[62].mxu1  ;;  %v6305_v63 = vld [vmem:[#allocation2 + $0x98] sm:$0xff] }
 0x1a5   : > { %1423 = vmax.xlane.f32.xlu1 %v7984_v33  ;;  %7990 = vst [vmem:[#allocation102_spill] sm:$0xff] %v6052_v45  ;;  %7991 = vst [vmem:[#allocation103_spill] sm:$0xff] %v6054_v46  ;;  %v1490_v33 = vmax.f32 %v6048_v50, %v6052_v45  ;;  %v6062_v56 = vpop.f32.mrb[63].mxu1  ;;  %v7995_v45 = vmax.f32 %v5893_v58, %v5880_v55  ;;  %v6082_v58 = vld [vmem:[#allocation2] sm:$0xff]  ;;  %v6253_v50 = vld [vmem:[#allocation2 + $0xc8] sm:$0xff] }
 0x1a6   : > { %1478 = vmax.xlane.f32.xlu0 %v1477_v17  ;;  %v1482_v31 = vmax.f32 %v1481_v34, %v6031_v47  ;;  %v1486_v34 = vmax.f32 %v1485_v38, %v6044_v41  ;;  %v7992_v17 = vmax.f32 %v5896_v40, %v5890_v52  ;;  %7993 = vst [vmem:[#allocation104_spill] sm:$0xff] %v6062_v56  ;;  %v4775_v40 = vld [vmem:[%s7691_s2 + $0x40] sm:$0xff]   ;;  %7997 = vst [vmem:[#allocation105_spill] sm:$0xff] %v6082_v58  ;;  %v6278_v41 = vld [vmem:[#allocation2 + $0xd8] sm:$0xff] }
 0x1a7   : > { %v1491_v28 = vmax.f32 %v1490_v33, %v6054_v46  ;;  %v7994_v47 = vmax.f32 %v5923_v29, %v5910_v32  ;;  %v4776_v29 = vld [vmem:[%s7691_s2] sm:$0xff]   ;;  %4390 = vmatprep.subr.bf16.mxu0 %v4775_v40  ;;  %4665 = vmatprep.subr.bf16.mxu1 %v4775_v40  ;;  %8019 = vst [vmem:[#allocation127_spill] sm:$0xff] %v6253_v50  ;;  %8024 = vst [vmem:[#allocation132_spill] sm:$0xff] %v6278_v41 }
 0x1a8   : > { %v1487_v30 = vmax.f32 %v1486_v34, %v6050_v44  ;;  %4391 = vmatpush3.bf16.msra.mxu0 %v4776_v29  ;;  %4673 = vmatpush3.bf16.msra.mxu1 %v4776_v29  ;;  %v4779_v34 = vld [vmem:[%s7691_s2 + $0x50] sm:$0xff]   ;;  %8029 = vst [vmem:[#allocation137_spill] sm:$0xff] %v6305_v63 }
 0x1a9   : > { %1483 = vmax.xlane.f32.xlu1 %v1482_v31  ;;  %v1492_v38 = vmax.f32 %v1491_v28, %v6062_v56  ;;  %v7996_v31 = vmax.f32 %v5928_v26, %v5920_v54  ;;  %v4777_v28 = vld [vmem:[%s7691_s2 + $0x48] sm:$0xff]   ;;  %v6113_v29 = vld [vmem:[#allocation2 + $0x10] sm:$0xff] }
 0x1aa   : > { %1433 = vmax.xlane.f32.xlu0 %v7992_v17  ;;  %4392 = vmatprep.subr.bf16.mxu0 %v4777_v28  ;;  %8001 = vst [vmem:[#allocation109_spill] sm:$0xff] %v6113_v29  ;;  %v4785_v54 = vld [vmem:[%s7691_s2 + $0x68] sm:$0xff]   ;;  %v6265_v44 = vld [vmem:[#allocation2 + $0xd0] sm:$0xff] }
 0x1ab   : > { %4666 = vmatprep.subr.bf16.mxu1 %v4777_v28  ;;  %8022 = vst [vmem:[#allocation130_spill] sm:$0xff] %v6265_v44 }
 0x1ad   : > { %1428 = vmax.xlane.f32.xlu1 %v7995_v45 }
 0x1ae   : > { %1438 = vmax.xlane.f32.xlu0 %v7994_v47  ;;  %v6090_v47 = vld [vmem:[#allocation2 + $0x8] sm:$0xff] }
 0x1af   : > { %7998 = vst [vmem:[#allocation106_spill] sm:$0xff] %v6090_v47 }
 0x1b1   : > { %1493 = vmax.xlane.f32.xlu1 %v1492_v38 }
 0x1b2   : > { %1488 = vmax.xlane.f32.xlu0 %v1487_v30  ;;  %v4778_v30 = vld [vmem:[%s7691_s2 + $0x8] sm:$0xff]  }
 0x1b3   : > { %4393 = vmatpush3.bf16.msra.mxu0 %v4778_v30  ;;  %4674 = vmatpush3.bf16.msra.mxu1 %v4778_v30  ;;  %v6115_v30 = vld [vmem:[#allocation2 + $0x18] sm:$0xff] }
 0x1b4   : > { %4394 = vmatprep.subr.bf16.mxu0 %v4779_v34  ;;  %4667 = vmatprep.subr.bf16.mxu1 %v4779_v34  ;;  %8002 = vst [vmem:[#allocation110_spill] sm:$0xff] %v6115_v30  ;;  %v4782_v34 = vld [vmem:[%s7691_s2 + $0x18] sm:$0xff]  }
 0x1b5   : > { %1443 = vmax.xlane.f32.xlu1 %v7996_v31  ;;  %v4780_v31 = vld [vmem:[%s7691_s2 + $0x10] sm:$0xff]  }
 0x1b7   : > { %4395 = vmatpush3.bf16.msra.mxu0 %v4780_v31  ;;  %4675 = vmatpush3.bf16.msra.mxu1 %v4780_v31  ;;  %v4783_v31 = vld [vmem:[%s7691_s2 + $0x60] sm:$0xff]  }
 0x1b9   : > { %v1339_v26 = vpop.xlane.xlu0 %1338 }
 0x1ba   : > { %v6093_v45 = vmax.f32 %v6082_v58, %v1339_v26  ;;  %v4781_v26 = vld [vmem:[%s7691_s2 + $0x58] sm:$0xff]  }
 0x1bb   : > { %v1344_v33 = vpop.xlane.xlu1 %1343  ;;  %4396 = vmatprep.subr.bf16.mxu0 %v4781_v26  ;;  %4668 = vmatprep.subr.bf16.mxu1 %v4781_v26  ;;  %v6139_v26 = vld [vmem:[#allocation2 + $0x20] sm:$0xff]  ;;  %v6236_v58 = vld [vmem:[#allocation2 + $0x78] sm:$0xff] }
 0x1bc   : > { %7999 = vst [vmem:[#allocation107_spill] sm:$0xff] %v6093_v45  ;;  %3386 = vst.msk [vmem:[#allocation2] sm:$0xff] %vm338_vm1, %v6093_v45  ;;  %v6103_v38 = vmax.f32 %v6090_v47, %v1344_v33  ;;  %4397 = vmatpush3.bf16.msra.mxu0 %v4782_v34  ;;  %4676 = vmatpush3.bf16.msra.mxu1 %v4782_v34  ;;  %v6148_v34 = vld [vmem:[#allocation2 + $0x28] sm:$0xff] }
 0x1bd   : > { %8005 = vst [vmem:[#allocation113_spill] sm:$0xff] %v6139_v26  ;;  %8006 = vst [vmem:[#allocation114_spill] sm:$0xff] %v6148_v34  ;;  %4398 = vmatprep.subr.bf16.mxu0 %v4783_v31  ;;  %4669 = vmatprep.subr.bf16.mxu1 %v4783_v31  ;;  %v4786_v31 = vld [vmem:[%s7691_s2 + $0x28] sm:$0xff]  }
 0x1be   : > { %8000 = vst [vmem:[#allocation108_spill] sm:$0xff] %v6103_v38  ;;  %3387 = vst.msk [vmem:[#allocation2 + $0x8] sm:$0xff] %vm338_vm1, %v6103_v38  ;;  %v6222_v47 = vld [vmem:[#allocation2 + $0x68] sm:$0xff] }
 0x1bf   : > { %8014 = vst [vmem:[#allocation122_spill] sm:$0xff] %v6222_v47  ;;  %8016 = vst [vmem:[#allocation124_spill] sm:$0xff] %v6236_v58 }
 0x1c1   : > { %v1349_v28 = vpop.xlane.xlu0 %1348 }
 0x1c2   : > { %v6121_v33 = vmax.f32 %v6113_v29, %v1349_v28  ;;  %v6208_v29 = vld [vmem:[#allocation2 + $0x58] sm:$0xff] }
 0x1c3   : > { %v1354_v40 = vpop.xlane.xlu1 %1353  ;;  %8012 = vst [vmem:[#allocation120_spill] sm:$0xff] %v6208_v29 }
 0x1c4   : > { %8003 = vst [vmem:[#allocation111_spill] sm:$0xff] %v6121_v33  ;;  %3388 = vst.msk [vmem:[#allocation2 + $0x10] sm:$0xff] %vm338_vm1, %v6121_v33  ;;  %v6132_v17 = vmax.f32 %v6115_v30, %v1354_v40  ;;  %v4784_v40 = vld [vmem:[%s7691_s2 + $0x20] sm:$0xff]   ;;  %v6174_v30 = vld [vmem:[#allocation2 + $0x38] sm:$0xff] }
 0x1c5   : > { %4399 = vmatpush3.bf16.msra.mxu0 %v4784_v40  ;;  %4677 = vmatpush3.bf16.msra.mxu1 %v4784_v40  ;;  %v4787_v40 = vld [vmem:[%s7691_s2 + $0x70] sm:$0xff]   ;;  %8008 = vst [vmem:[#allocation116_spill] sm:$0xff] %v6174_v30 }
 0x1c6   : > { %8004 = vst [vmem:[#allocation112_spill] sm:$0xff] %v6132_v17  ;;  %1635 = vperm.xlu1 %4726, %v6121_v33   ;;  %3389 = vst.msk [vmem:[#allocation2 + $0x18] sm:$0xff] %vm338_vm1, %v6132_v17  ;;  %4400 = vmatprep.subr.bf16.mxu0 %v4785_v54 }
 0x1c7   : > { %4670 = vmatprep.subr.bf16.mxu1 %v4785_v54  ;;  %v4789_v54 = vld [vmem:[%s7691_s2 + $0x78] sm:$0xff]  }
 0x1c8   : > { %1625 = vperm.xlu0 %4725, %v6093_v45  }
 0x1c9   : > { %v1359_v32 = vpop.xlane.xlu0 %1358  ;;  %4401 = vmatpush3.bf16.msra.mxu0 %v4786_v31  ;;  %4678 = vmatpush3.bf16.msra.mxu1 %v4786_v31 }
 0x1ca   : > { %1640 = vperm.xlu1 %4726, %v6132_v17   ;;  %v6151_v28 = vmax.f32 %v6139_v26, %v1359_v32  ;;  %v6166_v32 = vld [vmem:[#allocation2 + $0x30] sm:$0xff]  ;;  %4402 = vmatprep.subr.bf16.mxu0 %v4787_v40 }
 0x1cb   : > { %v1364_v55 = vpop.xlane.xlu1 %1363  ;;  %8007 = vst [vmem:[#allocation115_spill] sm:$0xff] %v6166_v32  ;;  %4671 = vmatprep.subr.bf16.mxu1 %v4787_v40 }
 0x1cc   : > { %1630 = vperm.xlu0 %4725, %v6103_v38   ;;  %3390 = vst.msk [vmem:[#allocation2 + $0x20] sm:$0xff] %vm338_vm1, %v6151_v28  ;;  %v6159_v52 = vmax.f32 %v6148_v34, %v1364_v55  ;;  %v4788_v55 = vld [vmem:[%s7691_s2 + $0x30] sm:$0xff]   ;;  %v4790_v34 = vld [vmem:[%s7691_s2 + $0x38] sm:$0xff]  }
 0x1cd   : > { %4403 = vmatpush3.bf16.msra.mxu0 %v4788_v55  ;;  %4679 = vmatpush3.bf16.msra.mxu1 %v4788_v55 }
 0x1ce   : > { %3391 = vst.msk [vmem:[#allocation2 + $0x28] sm:$0xff] %vm338_vm1, %v6159_v52  ;;  %4404 = vmatprep.subr.bf16.mxu0 %v4789_v54  ;;  %4672 = vmatprep.subr.bf16.mxu1 %v4789_v54 }
 0x1d1   : > { %v1369_v17 = vpop.xlane.xlu0 %1368  ;;  %4405 = vmatpush3.bf16.msra.mxu0 %v4790_v34  ;;  %4680 = vmatpush3.bf16.msra.mxu1 %v4790_v34 }
 0x1d2   : > { %v6180_v31 = vmax.f32 %v6166_v32, %v1369_v17  ;;  %v6192_v17 = vld [vmem:[#allocation2 + $0x40] sm:$0xff]  ;;  %v6194_v32 = vld [vmem:[#allocation2 + $0x48] sm:$0xff] }
 0x1d3   : > { %v1374_v26 = vpop.xlane.xlu1 %1373  ;;  %8009 = vst [vmem:[#allocation117_spill] sm:$0xff] %v6192_v17  ;;  %8010 = vst [vmem:[#allocation118_spill] sm:$0xff] %v6194_v32 }
 0x1d4   : > { %3392 = vst.msk [vmem:[#allocation2 + $0x30] sm:$0xff] %vm338_vm1, %v6180_v31  ;;  %v6188_v33 = vmax.f32 %v6174_v30, %v1374_v26  ;;  %v6206_v30 = vld [vmem:[#allocation2 + $0x50] sm:$0xff] }
 0x1d5   : > { %8011 = vst [vmem:[#allocation119_spill] sm:$0xff] %v6206_v30 }
 0x1d6   : > { %3393 = vst.msk [vmem:[#allocation2 + $0x38] sm:$0xff] %vm338_vm1, %v6188_v33 }
 0x1d9   : > { %v1379_v40 = vpop.xlane.xlu0 %1378 }
 0x1da   : > { %v6197_v55 = vmax.f32 %v6192_v17, %v1379_v40 }
 0x1db   : > { %v1384_v54 = vpop.xlane.xlu1 %1383 }
 0x1dc   : > { %3394 = vst.msk [vmem:[#allocation2 + $0x40] sm:$0xff] %vm338_vm1, %v6197_v55  ;;  %v6202_v26 = vmax.f32 %v6194_v32, %v1384_v54  ;;  %v6220_v54 = vld [vmem:[#allocation2 + $0x60] sm:$0xff] }
 0x1dd   : > { %8013 = vst [vmem:[#allocation121_spill] sm:$0xff] %v6220_v54 }
 0x1de   : > { %3395 = vst.msk [vmem:[#allocation2 + $0x48] sm:$0xff] %vm338_vm1, %v6202_v26 }
 0x1e1   : > { %v1389_v34 = vpop.xlane.xlu0 %1388 }
 0x1e2   : > { %v6211_v38 = vmax.f32 %v6206_v30, %v1389_v34 }
 0x1e3   : > { %v1394_v40 = vpop.xlane.xlu1 %1393 }
 0x1e4   : > { %3396 = vst.msk [vmem:[#allocation2 + $0x50] sm:$0xff] %vm338_vm1, %v6211_v38  ;;  %v6216_v17 = vmax.f32 %v6208_v29, %v1394_v40  ;;  %v6234_v40 = vld [vmem:[#allocation2 + $0x70] sm:$0xff] }
 0x1e5   : > { %8015 = vst [vmem:[#allocation123_spill] sm:$0xff] %v6234_v40 }
 0x1e6   : > { %3397 = vst.msk [vmem:[#allocation2 + $0x58] sm:$0xff] %vm338_vm1, %v6216_v17 }
 0x1e9   : > { %v1399_v32 = vpop.xlane.xlu1 %1398 }
 0x1ea   : > { %v6225_v45 = vmax.f32 %v6220_v54, %v1399_v32 }
 0x1eb   : > { %v1404_v34 = vpop.xlane.xlu0 %1403 }
 0x1ec   : > { %3398 = vst.msk [vmem:[#allocation2 + $0x60] sm:$0xff] %vm338_vm1, %v6225_v45  ;;  %v6230_v30 = vmax.f32 %v6222_v47, %v1404_v34  ;;  %v6248_v34 = vld [vmem:[#allocation2 + $0xc0] sm:$0xff] }
 0x1ed   : > { %8017 = vst [vmem:[#allocation125_spill] sm:$0xff] %v6248_v34 }
 0x1ee   : > { %3399 = vst.msk [vmem:[#allocation2 + $0x68] sm:$0xff] %vm338_vm1, %v6230_v30 }
 0x1f1   : > { %v1409_v29 = vpop.xlane.xlu1 %1408 }
 0x1f2   : > { %v6239_v56 = vmax.f32 %v6234_v40, %v1409_v29  ;;  %v6263_v40 = vld [vmem:[#allocation2 + $0x80] sm:$0xff] }
 0x1f3   : > { %v1414_v32 = vpop.xlane.xlu0 %1413  ;;  %8021 = vst [vmem:[#allocation129_spill] sm:$0xff] %v6263_v40 }
 0x1f4   : > { %3400 = vst.msk [vmem:[#allocation2 + $0x70] sm:$0xff] %vm338_vm1, %v6239_v56  ;;  %v6244_v54 = vmax.f32 %v6236_v58, %v1414_v32 }
 0x1f6   : > { %3401 = vst.msk [vmem:[#allocation2 + $0x78] sm:$0xff] %vm338_vm1, %v6244_v54 }
 0x227   : > { %v1459_v47 = vpop.xlane.xlu0 %1458 }
 0x228   : > { %v6251_v46 = vmax.f32 %v6248_v34, %v1459_v47 }
 0x22a   : > { %8018 = vst [vmem:[#allocation126_spill] sm:$0xff] %v6251_v46  ;;  %3410 = vst.msk [vmem:[#allocation2 + $0xc0] sm:$0xff] %vm338_vm1, %v6251_v46  ;;  %1745 = vperm.xlu0 %4725, %v6251_v46   ;;  %v1469_v34 = vpop.xlane.xlu1 %1468 }
 0x22b   : > { %v1464_v32 = vpop.xlane.xlu0 %1463 }
 0x22c   : > { %v6261_v58 = vmax.f32 %v6253_v50, %v1464_v32  ;;  %v6276_v32 = vmax.f32 %v6265_v44, %v1469_v34  ;;  %v6290_v50 = vld [vmem:[#allocation2 + $0x88] sm:$0xff]  ;;  %v6292_v34 = vld [vmem:[#allocation2 + $0xe0] sm:$0xff] }
 0x22d   : > { %8026 = vst [vmem:[#allocation134_spill] sm:$0xff] %v6290_v50  ;;  %8027 = vst [vmem:[#allocation135_spill] sm:$0xff] %v6292_v34 }
 0x22e   : > { %8020 = vst [vmem:[#allocation128_spill] sm:$0xff] %v6261_v58  ;;  %3411 = vst.msk [vmem:[#allocation2 + $0xc8] sm:$0xff] %vm338_vm1, %v6261_v58  ;;  %1750 = vperm.xlu1 %4726, %v6261_v58   ;;  %v1474_v58 = vpop.xlane.xlu1 %1473 }
 0x22f   : > { %v1419_v29 = vpop.xlane.xlu0 %1418  ;;  %8023 = vst [vmem:[#allocation131_spill] sm:$0xff] %v6276_v32  ;;  %3412 = vst.msk [vmem:[#allocation2 + $0xd0] sm:$0xff] %vm338_vm1, %v6276_v32 }
 0x230   : > { %v6273_v46 = vmax.f32 %v6263_v40, %v1419_v29  ;;  %v6288_v29 = vmax.f32 %v6278_v41, %v1474_v58 }
 0x232   : > { %3402 = vst.msk [vmem:[#allocation2 + $0x80] sm:$0xff] %vm338_vm1, %v6273_v46  ;;  %1755 = vperm.xlu1 %4726, %v6276_v32   ;;  %8025 = vst [vmem:[#allocation133_spill] sm:$0xff] %v6288_v29  ;;  %v1424_v47 = vpop.xlane.xlu1 %1423 }
 0x233   : > { %3413 = vst.msk [vmem:[#allocation2 + $0xd8] sm:$0xff] %vm338_vm1, %v6288_v29  ;;  %v1479_v44 = vpop.xlane.xlu0 %1478  ;;  %v6300_v32 = vmax.f32 %v6290_v50, %v1424_v47  ;;  %v6322_v50 = vld [vmem:[#allocation2 + $0xa0] sm:$0xff] }
 0x234   : > { %v6303_v58 = vmax.f32 %v6292_v34, %v1479_v44  ;;  %8032 = vst [vmem:[#allocation140_spill] sm:$0xff] %v6322_v50 }
 0x235   : > { %3403 = vst.msk [vmem:[#allocation2 + $0x88] sm:$0xff] %vm338_vm1, %v6300_v32 }
 0x236   : > { %1760 = vperm.xlu1 %4726, %v6288_v29   ;;  %8028 = vst [vmem:[#allocation136_spill] sm:$0xff] %v6303_v58  ;;  %3414 = vst.msk [vmem:[#allocation2 + $0xe0] sm:$0xff] %vm338_vm1, %v6303_v58  ;;  %1765 = vperm.xlu0 %4725, %v6303_v58   ;;  %v1484_v29 = vpop.xlane.xlu1 %1483 }
 0x237   : > { %v1434_v47 = vpop.xlane.xlu0 %1433  ;;  %v6320_v41 = vmax.f32 %v6307_v62, %v1484_v29 }
 0x238   : > { %v6317_v44 = vmax.f32 %v6305_v63, %v1434_v47  ;;  %v6339_v63 = vld [vmem:[#allocation2 + $0xf0] sm:$0xff] }
 0x239   : > { %8031 = vst [vmem:[#allocation139_spill] sm:$0xff] %v6320_v41  ;;  %3415 = vst.msk [vmem:[#allocation2 + $0xe8] sm:$0xff] %vm338_vm1, %v6320_v41 }
 0x23a   : > { %3405 = vst.msk [vmem:[#allocation2 + $0x98] sm:$0xff] %vm338_vm1, %v6317_v44  ;;  %1770 = vperm.xlu0 %4725, %v6320_v41   ;;  %v1429_v58 = vpop.xlane.xlu1 %1428  ;;  %8034 = vst [vmem:[#allocation142_spill] sm:$0xff] %v6339_v63 }
 0x23b   : > { %v1439_v47 = vpop.xlane.xlu0 %1438  ;;  %v6337_v34 = vmax.f32 %v6324_v60, %v1429_v58  ;;  %v6353_v58 = vld [vmem:[#allocation2 + $0xa8] sm:$0xff]  ;;  %v4791_v60 = vld [vmem:[%s7691_s2 + $0xc0] sm:$0xff]  }
 0x23c   : > { %v6334_v29 = vmax.f32 %v6322_v50, %v1439_v47  ;;  %8038 = vst [vmem:[#allocation146_spill] sm:$0xff] %v6353_v58  ;;  %4502 = vmatprep.subr.bf16.mxu1 %v4791_v60 }
 0x23d   : > { %3404 = vst.msk [vmem:[#allocation2 + $0x90] sm:$0xff] %vm338_vm1, %v6337_v34 }
 0x23e   : > { %3406 = vst.msk [vmem:[#allocation2 + $0xa0] sm:$0xff] %vm338_vm1, %v6334_v29  ;;  %v1494_v41 = vpop.xlane.xlu1 %1493 }
 0x23f   : > { %v1489_v40 = vpop.xlane.xlu0 %1488  ;;  %v6351_v47 = vmax.f32 %v6341_v35, %v1494_v41 }
 0x240   : > { %v6348_v62 = vmax.f32 %v6339_v63, %v1489_v40 }
 0x241   : > { %8037 = vst [vmem:[#allocation145_spill] sm:$0xff] %v6351_v47  ;;  %3417 = vst.msk [vmem:[#allocation2 + $0xf8] sm:$0xff] %vm338_vm1, %v6351_v47 }
 0x242   : > { %8036 = vst [vmem:[#allocation144_spill] sm:$0xff] %v6348_v62  ;;  %3416 = vst.msk [vmem:[#allocation2 + $0xf0] sm:$0xff] %vm338_vm1, %v6348_v62  ;;  %1775 = vperm.xlu1 %4726, %v6348_v62   ;;  %v1444_v41 = vpop.xlane.xlu1 %1443 }
 0x243   : > { %v6368_v40 = vmax.f32 %v6353_v58, %v1444_v41 }
 0x245   : > { %3407 = vst.msk [vmem:[#allocation2 + $0xa8] sm:$0xff] %vm338_vm1, %v6368_v40 }
 0x246   : > { %1780 = vperm.xlu1 %4726, %v6351_v47  }
 0x247   : > { %v1626_v50 = vpop.permute.xlu0 %1625 }
 0x248   : > { %v1783_v63 = vsub.f32 %v5490_v0, %v1626_v50  ;;  %v1784_v36 = vsub.f32 %v5494_v2, %v1626_v50  ;;  %v1785_v35 = vsub.f32 %v5492_v1, %v1626_v50  ;;  %v1786_v42 = vsub.f32 %v5498_v4, %v1626_v50  ;;  %v1636_v2 = vpop.permute.xlu1 %1635 }
 0x24a   : > { %v1911_v62 = vmul.f32 1.442695, %v1783_v63  ;;  %v1913_v14 = vmul.f32 1.442695, %v1784_v36  ;;  %v1915_v60 = vmul.f32 1.442695, %v1785_v35  ;;  %v1791_v35 = vsub.f32 %v5513_v13, %v1636_v2 }
 0x24b   : > { %v1917_v27 = vmul.f32 1.442695, %v1786_v42  ;;  %v1631_v41 = vpop.permute.xlu0 %1630  ;;  %v1792_v42 = vsub.f32 %v5518_v16, %v1636_v2 }
 0x24c   : > { %4807 = vpow2.f32 %v1911_v62  ;;  %v1787_v58 = vsub.f32 %v5500_v5, %v1631_v41  ;;  %v1788_v11 = vsub.f32 %v5504_v7, %v1631_v41  ;;  %v1789_v47 = vsub.f32 %v5502_v6, %v1631_v41 }
 0x24d   : > { %4809 = vpow2.f32 %v1913_v14  ;;  %v1790_v0 = vsub.f32 %v5508_v9, %v1631_v41  ;;  %v1793_v5 = vsub.f32 %v5516_v15, %v1636_v2  ;;  %v1794_v7 = vsub.f32 %v5554_v19, %v1636_v2  ;;  %v1641_v9 = vpop.permute.xlu1 %1640 }
 0x24e   : > { %4811 = vpow2.f32 %v1915_v60  ;;  %v1919_v1 = vmul.f32 1.442695, %v1787_v58  ;;  %v1921_v48 = vmul.f32 1.442695, %v1788_v11  ;;  %v1923_v4 = vmul.f32 1.442695, %v1789_v47 }
 0x24f   : > { %4813 = vpow2.f32 %v1917_v27  ;;  %v1925_v36 = vmul.f32 1.442695, %v1790_v0  ;;  %v1927_v6 = vmul.f32 1.442695, %v1791_v35  ;;  %v1929_v14 = vmul.f32 1.442695, %v1792_v42 }
 0x250   : > { %4815 = vpow2.f32 %v1919_v1  ;;  %v1931_v62 = vmul.f32 1.442695, %v1793_v5  ;;  %v1933_v63 = vmul.f32 1.442695, %v1794_v7  ;;  %v1795_v11 = vsub.f32 %v5556_v20, %v1641_v9 }
 0x251   : > { %4817 = vpow2.f32 %v1921_v48  ;;  %v1796_v27 = vsub.f32 %v5560_v22, %v1641_v9  ;;  %v1797_v13 = vsub.f32 %v5558_v21, %v1641_v9  ;;  %v1798_v16 = vsub.f32 %v5564_v24, %v1641_v9 }
 0x252   : > { %4819 = vpow2.f32 %v1923_v4  ;;  %v1935_v15 = vmul.f32 1.442695, %v1795_v11  ;;  %v8039_v21 = vmax.f32 %v5956_v10, %v5950_v43  ;;  %v8206_v43 = vld [vmem:[#allocation52_spill] sm:$0xff] }
 0x253   : > { %4821 = vpow2.f32 %v1925_v36  ;;  %v1937_v19 = vmul.f32 1.442695, %v1796_v27  ;;  %v1939_v50 = vmul.f32 1.442695, %v1797_v13  ;;  %v1941_v58 = vmul.f32 1.442695, %v1798_v16 }
 0x254   : > { %4823 = vpow2.f32 %v1927_v6 }
 0x255   : > { %4825 = vpow2.f32 %v1929_v14 }
 0x256   : > { %v4808_v48 = vpop.eup %4807  ;;  %4827 = vpow2.f32 %v1931_v62 }
 0x257   : > { %v4810_v47 = vpop.eup %4809  ;;  %4829 = vpow2.f32 %v1933_v63 }
 0x258   : > { %v6389_v60 = vpop.eup %4811  ;;  %4831 = vpow2.f32 %v1935_v15  ;;  %v2231_v20 = vadd.f32 %v4810_v47, %v4808_v48 }
 0x259   : > { %v6391_v41 = vpop.eup %4813  ;;  %4833 = vpow2.f32 %v1937_v19  ;;  %1453 = vmax.xlane.f32.xlu0 %v8039_v21 }
 0x25a   : > { %v4816_v22 = vpop.eup %4815  ;;  %4835 = vpow2.f32 %v1939_v50  ;;  %v2232_v24 = vadd.f32 %v6389_v60, %v2231_v20 }
 0x25b   : > { %v4818_v0 = vpop.eup %4817  ;;  %4837 = vpow2.f32 %v1941_v58  ;;  %v2680_v2 = vpack.c.bf16 %v4816_v22, %v4808_v48 }
 0x25c   : > { %v6397_v1 = vpop.eup %4819  ;;  %v2681_v4 = vpack.c.bf16 %v4818_v0, %v4810_v47  ;;  %v2236_v36 = vadd.f32 %v4818_v0, %v4816_v22  ;;  %v6400_v35 = vadd.f32 %v6391_v41, %v2232_v24  ;;  %v8044_v0 = vmax.f32 %v5953_v23, %v5940_v37 }
 0x25d   : > { %v6402_v42 = vpop.eup %4821 }
 0x25e   : > { %8040 = vst [vmem:[#allocation147_spill] sm:$0xff] %v6400_v35  ;;  %v4824_v5 = vpop.eup %4823  ;;  %3032 = vmatprep.mubr.bf16.mxu0 %v2681_v4  ;;  %v2237_v6 = vadd.f32 %v6397_v1, %v2236_v36  ;;  %v8214_v35 = vld [vmem:[#allocation59_spill] sm:$0xff] }
 0x25f   : > { %v4826_v14 = vpop.eup %4825  ;;  %3033 = vmatmul.mubr.bf16.vlgmr.msra.gmra.mrb[64].mxu0 %v2680_v2 }
 0x260   : > { %v6409_v9 = vpop.eup %4827  ;;  %v6412_v62 = vadd.f32 %v6402_v42, %v2237_v6  ;;  %v2241_v63 = vadd.f32 %v4826_v14, %v4824_v5 }
 0x261   : > { %v6414_v11 = vpop.eup %4829 }
 0x262   : > { %8041 = vst [vmem:[#allocation148_spill] sm:$0xff] %v6412_v62  ;;  %v4832_v27 = vpop.eup %4831  ;;  %v2242_v13 = vadd.f32 %v6409_v9, %v2241_v63 }
 0x263   : > { %v4834_v16 = vpop.eup %4833  ;;  %v2684_v15 = vpack.c.bf16 %v4832_v27, %v4824_v5 }
 0x264   : > { %v6417_v19 = vpop.eup %4835  ;;  %v2685_v48 = vpack.c.bf16 %v4834_v16, %v4826_v14  ;;  %v6420_v50 = vadd.f32 %v6414_v11, %v2242_v13  ;;  %v2246_v47 = vadd.f32 %v4834_v16, %v4832_v27 }
 0x265   : > { %v6422_v58 = vpop.eup %4837 }
 0x266   : > { %8042 = vst [vmem:[#allocation149_spill] sm:$0xff] %v6420_v50  ;;  %3040 = vmatprep.mubr.bf16.mxu0 %v2685_v48  ;;  %v2247_v22 = vadd.f32 %v6417_v19, %v2246_v47  ;;  %v8213_v50 = vld [vmem:[#allocation57_spill] sm:$0xff] }
 0x267   : > { %3041 = vmatmul.mubr.bf16.gmra.mrb[68].mxu0 %v2684_v15 }
 0x268   : > { %v6430_v24 = vadd.f32 %v6422_v58, %v2247_v22 }
 0x26a   : > { %8043 = vst [vmem:[#allocation150_spill] sm:$0xff] %v6430_v24  ;;  %1448 = vmax.xlane.f32.xlu1 %v8044_v0 }
 0x26f   : > { %1645 = vperm.xlu0 %4725, %v6151_v28  }
 0x273   : > { %1650 = vperm.xlu0 %4725, %v6159_v52  }
 0x277   : > { %1655 = vperm.xlu0 %4725, %v6180_v31  }
 0x27b   : > { %1660 = vperm.xlu0 %4725, %v6188_v33   ;;  %1665 = vperm.xlu1 %4726, %v6197_v55  }
 0x27f   : > { %1670 = vperm.xlu0 %4725, %v6202_v26   ;;  %1690 = vperm.xlu1 %4726, %v6230_v30  }
 0x283   : > { %1675 = vperm.xlu0 %4725, %v6211_v38   ;;  %1700 = vperm.xlu1 %4726, %v6244_v54  }
 0x287   : > { %1680 = vperm.xlu0 %4725, %v6216_v17   ;;  %1710 = vperm.xlu1 %4726, %v6300_v32  }
 0x28b   : > { %1685 = vperm.xlu0 %4725, %v6225_v45   ;;  %1720 = vperm.xlu1 %4726, %v6317_v44  }
 0x28f   : > { %1695 = vperm.xlu0 %4725, %v6239_v56   ;;  %1730 = vperm.xlu1 %4726, %v6368_v40  }
 0x293   : > { %1705 = vperm.xlu0 %4725, %v6273_v46  }
 0x297   : > { %1715 = vperm.xlu0 %4725, %v6337_v34  }
 0x29b   : > { %1725 = vperm.xlu0 %4725, %v6334_v29  }
 0x2a9   : > { %v1746_v23 = vpop.permute.xlu0 %1745 }
 0x2aa   : > { %v1879_v2 = vsub.f32 %v5960_v49, %v1746_v23  ;;  %v1880_v4 = vsub.f32 %v5966_v8, %v1746_v23  ;;  %v1881_v36 = vsub.f32 %v5964_v3, %v1746_v23  ;;  %v1882_v5 = vsub.f32 %v5970_v39, %v1746_v23 }
 0x2ac   : > { %v2103_v6 = vmul.f32 1.442695, %v1879_v2  ;;  %v2105_v14 = vmul.f32 1.442695, %v1880_v4  ;;  %v2107_v63 = vmul.f32 1.442695, %v1881_v36 }
 0x2ad   : > { %v2109_v27 = vmul.f32 1.442695, %v1882_v5  ;;  %v1751_v13 = vpop.permute.xlu1 %1750  ;;  %v8045_v5 = vld [vmem:[#allocation85_spill] sm:$0xff] }
 0x2ae   : > { %4839 = vpow2.f32 %v2103_v6  ;;  %v1883_v16 = vsub.f32 %v5972_v12, %v1751_v13  ;;  %v1884_v15 = vsub.f32 %v5976_v18, %v1751_v13  ;;  %v1885_v48 = vsub.f32 %v5974_v61, %v1751_v13 }
 0x2af   : > { %4841 = vpow2.f32 %v2105_v14  ;;  %v1886_v49 = vsub.f32 %v5980_v25, %v1751_v13  ;;  %v8046_v14 = vld [vmem:[#allocation87_spill] sm:$0xff] }
 0x2b0   : > { %4843 = vpow2.f32 %v2107_v63  ;;  %v2111_v8 = vmul.f32 1.442695, %v1883_v16  ;;  %v2113_v3 = vmul.f32 1.442695, %v1884_v15  ;;  %v2115_v47 = vmul.f32 1.442695, %v1885_v48 }
 0x2b1   : > { %4845 = vpow2.f32 %v2109_v27  ;;  %v2117_v39 = vmul.f32 1.442695, %v1886_v49  ;;  %v1756_v22 = vpop.permute.xlu1 %1755 }
 0x2b2   : > { %4847 = vpow2.f32 %v2111_v8  ;;  %v1887_v0 = vsub.f32 %v5985_v59, %v1756_v22  ;;  %v1888_v23 = vsub.f32 %v5990_v53, %v1756_v22  ;;  %v1889_v12 = vsub.f32 %v5988_v57, %v1756_v22  ;;  %v8047_v59 = vld [vmem:[#allocation86_spill] sm:$0xff]  ;;  %v8048_v53 = vld [vmem:[#allocation88_spill] sm:$0xff] }
 0x2b3   : > { %4849 = vpow2.f32 %v2113_v3  ;;  %v1890_v18 = vsub.f32 %v5994_v51, %v1756_v22  ;;  %v8051_v22 = vld [vmem:[#allocation91_spill] sm:$0xff] }
 0x2b4   : > { %4851 = vpow2.f32 %v2115_v47  ;;  %v2119_v61 = vmul.f32 1.442695, %v1887_v0  ;;  %v2121_v25 = vmul.f32 1.442695, %v1888_v23  ;;  %v2123_v2 = vmul.f32 1.442695, %v1889_v12 }
 0x2b5   : > { %4853 = vpow2.f32 %v2117_v39  ;;  %v2125_v4 = vmul.f32 1.442695, %v1890_v18  ;;  %v1761_v36 = vpop.permute.xlu1 %1760  ;;  %v1766_v8 = vpop.permute.xlu0 %1765  ;;  %v8050_v47 = vld [vmem:[#allocation89_spill] sm:$0xff]  ;;  %v8052_v23 = vld [vmem:[#allocation90_spill] sm:$0xff] }
 0x2b6   : > { %4855 = vpow2.f32 %v2119_v61  ;;  %v1891_v6 = vsub.f32 %v8045_v5, %v1761_v36  ;;  %v1892_v63 = vsub.f32 %v8046_v14, %v1761_v36  ;;  %v1893_v27 = vsub.f32 %v8047_v59, %v1761_v36  ;;  %v8054_v61 = vld [vmem:[#allocation92_spill] sm:$0xff] }
 0x2b7   : > { %4857 = vpow2.f32 %v2121_v25  ;;  %v1894_v57 = vsub.f32 %v8048_v53, %v1761_v36  ;;  %v1895_v39 = vsub.f32 %v8050_v47, %v1766_v8  ;;  %v1896_v0 = vsub.f32 %v8051_v22, %v1766_v8  ;;  %v8057_v47 = vld [vmem:[#allocation95_spill] sm:$0xff]  ;;  %v8058_v22 = vld [vmem:[#allocation94_spill] sm:$0xff] }
 0x2b8   : > { %v4840_v13 = vpop.eup %4839  ;;  %4859 = vpow2.f32 %v2123_v2  ;;  %v2127_v51 = vmul.f32 1.442695, %v1891_v6  ;;  %v2129_v16 = vmul.f32 1.442695, %v1892_v63  ;;  %v2131_v15 = vmul.f32 1.442695, %v1893_v27 }
 0x2b9   : > { %v4842_v48 = vpop.eup %4841  ;;  %4861 = vpow2.f32 %v2125_v4  ;;  %v2133_v49 = vmul.f32 1.442695, %v1894_v57  ;;  %v1897_v12 = vsub.f32 %v8052_v23, %v1766_v8  ;;  %v1898_v25 = vsub.f32 %v8054_v61, %v1766_v8  ;;  %v1771_v59 = vpop.permute.xlu0 %1770 }
 0x2ba   : > { %v6469_v3 = vpop.eup %4843  ;;  %4863 = vpow2.f32 %v2127_v51  ;;  %v2351_v2 = vadd.f32 %v4842_v48, %v4840_v13  ;;  %v2135_v4 = vmul.f32 1.442695, %v1895_v39  ;;  %v2137_v5 = vmul.f32 1.442695, %v1896_v0  ;;  %v8056_v51 = vld [vmem:[#allocation93_spill] sm:$0xff]  ;;  %v8060_v39 = vld [vmem:[#allocation96_spill] sm:$0xff] }
 0x2bb   : > { %8049 = vst [vmem:[#allocation85_spill] sm:$0xff] %v6469_v3  ;;  %v6474_v18 = vpop.eup %4845  ;;  %4865 = vpow2.f32 %v2129_v16  ;;  %v2139_v6 = vmul.f32 1.442695, %v1897_v12  ;;  %v2141_v63 = vmul.f32 1.442695, %v1898_v25  ;;  %v1899_v16 = vsub.f32 %v8056_v51, %v1771_v59  ;;  %v4793_v12 = vld [vmem:[%s7691_s2 + $0xc8] sm:$0xff]  }
 0x2bc   : > { %8053 = vst [vmem:[#allocation87_spill] sm:$0xff] %v6474_v18  ;;  %v4848_v36 = vpop.eup %4847  ;;  %4867 = vpow2.f32 %v2131_v15  ;;  %v2352_v53 = vadd.f32 %v6469_v3, %v2351_v2  ;;  %v1900_v8 = vsub.f32 %v8057_v47, %v1771_v59  ;;  %v1901_v23 = vsub.f32 %v8058_v22, %v1771_v59 }
 0x2bd   : > { %v4850_v14 = vpop.eup %4849  ;;  %4869 = vpow2.f32 %v2133_v49  ;;  %v2728_v27 = vpack.c.bf16 %v4848_v36, %v4840_v13  ;;  %v1902_v0 = vsub.f32 %v8060_v39, %v1771_v59  ;;  %v4792_v13 = vld [vmem:[%s7691_s2 + $0x80] sm:$0xff]   ;;  %v2143_v2 = vmul.f32 1.442695, %v1899_v16 }
 0x2be   : > { %v6478_v57 = vpop.eup %4851  ;;  %4871 = vpow2.f32 %v2135_v4  ;;  %v2729_v49 = vpack.c.bf16 %v4850_v14, %v4842_v48  ;;  %v2356_v61 = vadd.f32 %v4850_v14, %v4848_v36  ;;  %v2145_v4 = vmul.f32 1.442695, %v1900_v8 }
 0x2bf   : > { %8055 = vst [vmem:[#allocation86_spill] sm:$0xff] %v6478_v57  ;;  %v6483_v15 = vpop.eup %4853  ;;  %4873 = vpow2.f32 %v2137_v5  ;;  %v2147_v51 = vmul.f32 1.442695, %v1901_v23  ;;  %v2149_v5 = vmul.f32 1.442695, %v1902_v0  ;;  %v6498_v36 = vadd.f32 %v6474_v18, %v2352_v53 }
 0x2c0   : > { %8059 = vst [vmem:[#allocation88_spill] sm:$0xff] %v6483_v15  ;;  %v4856_v25 = vpop.eup %4855  ;;  %4875 = vpow2.f32 %v2139_v6  ;;  %3128 = vmatprep.mubr.bf16.mxu1 %v2729_v49  ;;  %v2357_v48 = vadd.f32 %v6478_v57, %v2356_v61  ;;  %v8066_v61 = vld [vmem:[#allocation97_spill] sm:$0xff]  ;;  %v8068_v6 = vld [vmem:[#allocation99_spill] sm:$0xff] }
 0x2c1   : > { %v4858_v47 = vpop.eup %4857  ;;  %4877 = vpow2.f32 %v2141_v63  ;;  %3129 = vmatmul.mubr.bf16.vlgmr.msra.gmra.mrb[64].mxu1 %v2728_v27  ;;  %8062 = vst [vmem:[#allocation91_spill] sm:$0xff] %v6498_v36  ;;  %v4794_v63 = vld [vmem:[%s7691_s2 + $0x88] sm:$0xff]   ;;  %v4795_v27 = vld [vmem:[%s7691_s2 + $0xd0] sm:$0xff]   ;;  %v1776_v0 = vpop.permute.xlu1 %1775 }
 0x2c2   : > { %v6495_v22 = vpop.eup %4859  ;;  %4879 = vpow2.f32 %v2143_v2  ;;  %v2361_v14 = vadd.f32 %v4858_v47, %v4856_v25  ;;  %4503 = vmatpush3.bf16.msra.mxu1 %v4792_v13  ;;  %v6508_v8 = vadd.f32 %v6483_v15, %v2357_v48  ;;  %v1903_v2 = vsub.f32 %v8066_v61, %v1776_v0  ;;  %v8199_v15 = vld [vmem:[#allocation31_spill] sm:$0xff] }
 0x2c3   : > { %8061 = vst [vmem:[#allocation89_spill] sm:$0xff] %v6495_v22  ;;  %v6502_v16 = vpop.eup %4861  ;;  %4881 = vpow2.f32 %v2145_v4  ;;  %4504 = vmatprep.subr.bf16.mxu1 %v4793_v12  ;;  %v8067_v4 = vld [vmem:[#allocation98_spill] sm:$0xff]  ;;  %v1905_v59 = vsub.f32 %v8068_v6, %v1776_v0 }
 0x2c4   : > { %8063 = vst [vmem:[#allocation90_spill] sm:$0xff] %v6502_v16  ;;  %8064 = vst [vmem:[#allocation92_spill] sm:$0xff] %v6508_v8  ;;  %v4864_v23 = vpop.eup %4863  ;;  %4883 = vpow2.f32 %v2147_v51  ;;  %v2362_v53 = vadd.f32 %v6495_v22, %v2361_v14  ;;  %v1904_v48 = vsub.f32 %v8067_v4, %v1776_v0  ;;  %v8069_v51 = vld [vmem:[#allocation101_spill] sm:$0xff]  ;;  %v2151_v4 = vmul.f32 1.442695, %v1903_v2  ;;  %v8074_v22 = vld [vmem:[#allocation102_spill] sm:$0xff] }
 0x2c5   : > { %v4866_v39 = vpop.eup %4865  ;;  %4885 = vpow2.f32 %v2149_v5  ;;  %v2732_v49 = vpack.c.bf16 %v4864_v23, %v4856_v25  ;;  %v1906_v12 = vsub.f32 %v8069_v51, %v1776_v0  ;;  %v4796_v5 = vld [vmem:[%s7691_s2 + $0x90] sm:$0xff]   ;;  %v4797_v25 = vld [vmem:[%s7691_s2 + $0xd8] sm:$0xff]   ;;  %v1781_v3 = vpop.permute.xlu1 %1780 }
 0x2c6   : > { %v6514_v13 = vpop.eup %4867  ;;  %v2733_v21 = vpack.c.bf16 %v4866_v39, %v4858_v47  ;;  %4505 = vmatpush3.bf16.msra.mxu1 %v4794_v63  ;;  %v2366_v14 = vadd.f32 %v4866_v39, %v4864_v23  ;;  %v6529_v61 = vadd.f32 %v6502_v16, %v2362_v53  ;;  %v2153_v51 = vmul.f32 1.442695, %v1904_v48  ;;  %v8073_v53 = vld [vmem:[#allocation100_spill] sm:$0xff]  ;;  %v8075_v48 = vld [vmem:[#allocation103_spill] sm:$0xff] }
 0x2c7   : > { %8065 = vst [vmem:[#allocation93_spill] sm:$0xff] %v6514_v13  ;;  %v6520_v20 = vpop.eup %4869  ;;  %v2155_v47 = vmul.f32 1.442695, %v1905_v59  ;;  %4506 = vmatprep.subr.bf16.mxu1 %v4795_v27  ;;  %v2157_v7 = vmul.f32 1.442695, %v1906_v12  ;;  %4887 = vpow2.f32 %v2151_v4  ;;  %v1907_v6 = vsub.f32 %v8073_v53, %v1781_v3  ;;  %v8077_v63 = vld [vmem:[#allocation104_spill] sm:$0xff] }
 0x2c8   : > { %8070 = vst [vmem:[#allocation95_spill] sm:$0xff] %v6520_v20  ;;  %8071 = vst [vmem:[#allocation94_spill] sm:$0xff] %v6529_v61  ;;  %v4872_v0 = vpop.eup %4871  ;;  %3136 = vmatprep.mubr.bf16.mxu1 %v2733_v21  ;;  %v2367_v23 = vadd.f32 %v6514_v13, %v2366_v14  ;;  %v1908_v2 = vsub.f32 %v8074_v22, %v1781_v3  ;;  %v1909_v59 = vsub.f32 %v8075_v48, %v1781_v3  ;;  %v4798_v21 = vld [vmem:[%s7691_s2 + $0x98] sm:$0xff]  }
 0x2c9   : > { %v4874_v10 = vpop.eup %4873  ;;  %3137 = vmatmul.mubr.bf16.gmra.mrb[68].mxu1 %v2732_v49  ;;  %4889 = vpow2.f32 %v2153_v51  ;;  %v1910_v61 = vsub.f32 %v8077_v63, %v1781_v3  ;;  %v4799_v49 = vld [vmem:[%s7691_s2 + $0xe0] sm:$0xff]   ;;  %v2159_v4 = vmul.f32 1.442695, %v1907_v6 }
 0x2ca   : > { %v6536_v39 = vpop.eup %4875  ;;  %4507 = vmatpush3.bf16.msra.mxu1 %v4796_v5  ;;  %v6551_v12 = vadd.f32 %v6520_v20, %v2367_v23  ;;  %v2371_v22 = vadd.f32 %v4874_v10, %v4872_v0  ;;  %4891 = vpow2.f32 %v2155_v47  ;;  %v2161_v53 = vmul.f32 1.442695, %v1908_v2  ;;  %v4800_v6 = vld [vmem:[%s7691_s2 + $0xa0] sm:$0xff]   ;;  %v8083_v2 = vld [vmem:[#allocation107_spill] sm:$0xff] }
 0x2cb   : > { %8072 = vst [vmem:[#allocation96_spill] sm:$0xff] %v6536_v39  ;;  %v6541_v27 = vpop.eup %4877  ;;  %v2163_v51 = vmul.f32 1.442695, %v1909_v59  ;;  %4508 = vmatprep.subr.bf16.mxu1 %v4797_v25  ;;  %4893 = vpow2.f32 %v2157_v7  ;;  %v2165_v5 = vmul.f32 1.442695, %v1910_v61  ;;  %v8082_v47 = vld [vmem:[#allocation105_spill] sm:$0xff] }
 0x2cc   : > { %8076 = vst [vmem:[#allocation97_spill] sm:$0xff] %v6541_v27  ;;  %8078 = vst [vmem:[#allocation98_spill] sm:$0xff] %v6551_v12  ;;  %v4880_v14 = vpop.eup %4879  ;;  %v2372_v48 = vadd.f32 %v6536_v39, %v2371_v22  ;;  %4895 = vpow2.f32 %v2159_v4  ;;  %v8084_v59 = vsub.f32 %v8082_v47, %v8083_v2  ;;  %v8092_v47 = vld [vmem:[#allocation113_spill] sm:$0xff]  ;;  %v8099_v7 = vld [vmem:[#allocation115_spill] sm:$0xff] }
 0x2cd   : > { %v4882_v3 = vpop.eup %4881  ;;  %v2736_v63 = vpack.c.bf16 %v4880_v14, %v4872_v0  ;;  %4897 = vpow2.f32 %v2161_v53  ;;  %v1531_v2 = vsub.f32 %v8092_v47, %v6151_v28  ;;  %v1533_v0 = vsub.f32 %v8099_v7, %v6180_v31  ;;  %v4804_v28 = vld [vmem:[%s7691_s2 + $0xb0] sm:$0xff]   ;;  %v8101_v7 = vld [vmem:[#allocation117_spill] sm:$0xff] }
 0x2ce   : > { %v6554_v13 = vpop.eup %4883  ;;  %v2737_v16 = vpack.c.bf16 %v4882_v3, %v4874_v10  ;;  %v2376_v57 = vadd.f32 %v4882_v3, %v4880_v14  ;;  %4509 = vmatpush3.bf16.msra.mxu1 %v4798_v21  ;;  %v6562_v25 = vadd.f32 %v6541_v27, %v2372_v48  ;;  %4899 = vpow2.f32 %v2163_v51  ;;  %v4801_v10 = vld [vmem:[%s7691_s2 + $0xe8] sm:$0xff]   ;;  %v8089_v51 = vld [vmem:[#allocation109_spill] sm:$0xff]  ;;  %v8090_v3 = vld [vmem:[#allocation111_spill] sm:$0xff] }
 0x2cf   : > { %8079 = vst [vmem:[#allocation99_spill] sm:$0xff] %v6554_v13  ;;  %v6556_v23 = vpop.eup %4885  ;;  %4510 = vmatprep.subr.bf16.mxu1 %v4799_v49  ;;  %4901 = vpow2.f32 %v2165_v5  ;;  %v1559_v21 = vmul.f32 1.442695, %v8084_v59  ;;  %v8087_v49 = vld [vmem:[#allocation108_spill] sm:$0xff]  ;;  %v8091_v5 = vsub.f32 %v8089_v51, %v8090_v3  ;;  %v8096_v51 = vld [vmem:[#allocation110_spill] sm:$0xff]  ;;  %v8203_v12 = vld [vmem:[#allocation49_spill] sm:$0xff] }
 0x2d0   : > { %8080 = vst [vmem:[#allocation101_spill] sm:$0xff] %v6556_v23  ;;  %8081 = vst [vmem:[#allocation100_spill] sm:$0xff] %v6562_v25  ;;  %3144 = vmatprep.mubr.bf16.mxu1 %v2737_v16  ;;  %v2377_v61 = vadd.f32 %v6554_v13, %v2376_v57  ;;  %v8086_v16 = vld [vmem:[#allocation106_spill] sm:$0xff] }
 0x2d1   : > { %3145 = vmatmul.mubr.bf16.gmra.mrb[72].mxu1 %v2736_v63  ;;  %v8088_v14 = vsub.f32 %v8086_v16, %v8087_v49  ;;  %v4802_v57 = vld [vmem:[%s7691_s2 + $0xa8] sm:$0xff]   ;;  %v4888_v53 = vpop.eup %4887  ;;  %v1563_v48 = vmul.f32 1.442695, %v8091_v5  ;;  %v4803_v63 = vld [vmem:[%s7691_s2 + $0xf0] sm:$0xff]   ;;  %4903 = vpow2.f32 %v1559_v21  ;;  %v8100_v21 = vld [vmem:[#allocation116_spill] sm:$0xff] }
 0x2d2   : > { %v6576_v22 = vadd.f32 %v6556_v23, %v2377_v61  ;;  %4511 = vmatpush3.bf16.msra.mxu1 %v4800_v6  ;;  %v8093_v6 = vld [vmem:[#allocation114_spill] sm:$0xff]  ;;  %v1534_v47 = vsub.f32 %v8100_v21, %v6188_v33 }
 0x2d3   : > { %v1561_v4 = vmul.f32 1.442695, %v8088_v14  ;;  %4512 = vmatprep.subr.bf16.mxu1 %v4801_v10  ;;  %v4890_v61 = vpop.eup %4889  ;;  %v1532_v59 = vsub.f32 %v8093_v6, %v6159_v52  ;;  %v8097_v10 = vld [vmem:[#allocation112_spill] sm:$0xff]  ;;  %v8190_v25 = vld [vmem:[#allocation26_spill] sm:$0xff] }
 0x2d4   : > { %8085 = vst [vmem:[#allocation102_spill] sm:$0xff] %v6576_v22  ;;  %v6594_v16 = vpop.eup %4891  ;;  %v2381_v49 = vadd.f32 %v4890_v61, %v4888_v53  ;;  %v8098_v3 = vsub.f32 %v8096_v51, %v8097_v10  ;;  %v1567_v10 = vmul.f32 1.442695, %v1531_v2  ;;  %v8106_v2 = vld [vmem:[#allocation119_spill] sm:$0xff] }
 0x2d5   : > { %8094 = vst [vmem:[#allocation103_spill] sm:$0xff] %v6594_v16  ;;  %v6596_v14 = vpop.eup %4893  ;;  %4905 = vpow2.f32 %v1561_v4  ;;  %v4805_v4 = vld [vmem:[%s7691_s2 + $0xf8] sm:$0xff]   ;;  %v1569_v31 = vmul.f32 1.442695, %v1532_v59  ;;  %v1537_v59 = vsub.f32 %v8106_v2, %v6211_v38 }
 0x2d6   : > { %8095 = vst [vmem:[#allocation104_spill] sm:$0xff] %v6596_v14  ;;  %v1565_v5 = vmul.f32 1.442695, %v8098_v3  ;;  %4513 = vmatpush3.bf16.msra.mxu1 %v4802_v57  ;;  %v4896_v52 = vpop.eup %4895  ;;  %4907 = vpow2.f32 %v1563_v48  ;;  %v2382_v6 = vadd.f32 %v6594_v16, %v2381_v49  ;;  %v1535_v57 = vsub.f32 %v8101_v7, %v6197_v55  ;;  %v8103_v48 = vld [vmem:[#allocation118_spill] sm:$0xff]  ;;  %v4806_v55 = vld [vmem:[%s7691_s2 + $0xb8] sm:$0xff]  }
 0x2d7   : > { %4514 = vmatprep.subr.bf16.mxu1 %v4803_v63  ;;  %v4898_v51 = vpop.eup %4897  ;;  %v2740_v3 = vpack.c.bf16 %v4896_v52, %v4888_v53  ;;  %v1536_v13 = vsub.f32 %v8103_v48, %v6202_v26  ;;  %v1571_v49 = vmul.f32 1.442695, %v1533_v0  ;;  %v1573_v53 = vmul.f32 1.442695, %v1534_v47  ;;  %v8109_v47 = vld [vmem:[#allocation122_spill] sm:$0xff] }
 0x2d8   : > { %v6614_v39 = vpop.eup %4899  ;;  %v2741_v33 = vpack.c.bf16 %v4898_v51, %v4890_v61  ;;  %v2386_v63 = vadd.f32 %v4898_v51, %v4896_v52  ;;  %v6619_v21 = vadd.f32 %v6596_v14, %v2382_v6  ;;  %4909 = vpow2.f32 %v1565_v5  ;;  %v8107_v61 = vld [vmem:[#allocation120_spill] sm:$0xff]  ;;  %v8174_v26 = vld [vmem:[#allocation14_spill] sm:$0xff] }
 0x2d9   : > { %8102 = vst [vmem:[#allocation105_spill] sm:$0xff] %v6614_v39  ;;  %v6621_v27 = vpop.eup %4901  ;;  %v1538_v52 = vsub.f32 %v8107_v61, %v6216_v17  ;;  %4911 = vpow2.f32 %v1567_v10  ;;  %v1575_v38 = vmul.f32 1.442695, %v1535_v57  ;;  %v1577_v51 = vmul.f32 1.442695, %v1536_v13  ;;  %v8112_v10 = vld [vmem:[#allocation123_spill] sm:$0xff] }
 0x2da   : > { %8104 = vst [vmem:[#allocation107_spill] sm:$0xff] %v6619_v21  ;;  %8105 = vst [vmem:[#allocation106_spill] sm:$0xff] %v6621_v27  ;;  %4515 = vmatpush3.bf16.msra.mxu1 %v4804_v28  ;;  %3152 = vmatprep.mubr.bf16.mxu1 %v2741_v33  ;;  %v2387_v5 = vadd.f32 %v6614_v39, %v2386_v63  ;;  %v8108_v28 = vld [vmem:[#allocation121_spill] sm:$0xff]  ;;  %4913 = vpow2.f32 %v1569_v31  ;;  %v1540_v7 = vsub.f32 %v8109_v47, %v6230_v30  ;;  %v8114_v31 = vld [vmem:[#allocation124_spill] sm:$0xff] }
 0x2db   : > { %4516 = vmatprep.subr.bf16.mxu1 %v4805_v4  ;;  %v1539_v6 = vsub.f32 %v8108_v28, %v6225_v45  ;;  %3153 = vmatmul.mubr.bf16.gmra.mrb[76].mxu1 %v2740_v3  ;;  %v8110_v17 = vpack.c.bf16 %v6402_v42, %v6391_v41  ;;  %4915 = vpow2.f32 %v1571_v49  ;;  %v1579_v48 = vmul.f32 1.442695, %v1537_v59  ;;  %v6647_v45 = vpop.eup %4903 }
 0x2dc   : > { %v6643_v4 = vadd.f32 %v6621_v27, %v2387_v5  ;;  %v1541_v57 = vsub.f32 %v8112_v10, %v6239_v56  ;;  %8113 = vst [vmem:[#allocation109_spill] sm:$0xff] %v6647_v45  ;;  %4917 = vpow2.f32 %v1573_v53  ;;  %v1581_v13 = vmul.f32 1.442695, %v1538_v52  ;;  %v8117_v56 = vld [vmem:[#allocation129_spill] sm:$0xff]  ;;  %v8123_v5 = vld [vmem:[#allocation127_spill] sm:$0xff] }
 0x2dd   : > { %3193 = vmatprep.mubr.bf16.mxu1 %v8110_v17  ;;  %v1542_v30 = vsub.f32 %v8114_v31, %v6244_v54  ;;  %4919 = vpow2.f32 %v1575_v38  ;;  %v1583_v41 = vmul.f32 1.442695, %v1539_v6  ;;  %v1585_v33 = vmul.f32 1.442695, %v1540_v7  ;;  %v8120_v54 = vld [vmem:[#allocation126_spill] sm:$0xff]  ;;  %v8124_v38 = vld [vmem:[#allocation128_spill] sm:$0xff] }
 0x2de   : > { %8111 = vst [vmem:[#allocation108_spill] sm:$0xff] %v6643_v4  ;;  %4517 = vmatpush3.bf16.msra.mxu1 %v4806_v55  ;;  %4921 = vpow2.f32 %v1577_v51  ;;  %v1587_v63 = vmul.f32 1.442695, %v1541_v57  ;;  %v1543_v49 = vsub.f32 %v8117_v56, %v6273_v46  ;;  %v8119_v55 = vld [vmem:[#allocation125_spill] sm:$0xff]  ;;  %v8122_v52 = vpack.c.bf16 %v6397_v1, %v6389_v60  ;;  %v8126_v46 = vld [vmem:[#allocation134_spill] sm:$0xff]  ;;  %v8131_v1 = vld [vmem:[#allocation131_spill] sm:$0xff] }
 0x2df   : > { %v6651_v3 = vpop.eup %4905  ;;  %4923 = vpow2.f32 %v1579_v48  ;;  %v1589_v2 = vmul.f32 1.442695, %v1542_v30  ;;  %v8121_v53 = vsub.f32 %v8119_v55, %v8120_v54  ;;  %v8125_v28 = vsub.f32 %v8123_v5, %v8124_v38  ;;  %v8130_v60 = vld [vmem:[#allocation130_spill] sm:$0xff]  ;;  %v1326_v30 = vld [vmem:[#allocation2 + $0xb8] sm:$0xff] }
 0x2e0   : > { %8115 = vst [vmem:[#allocation111_spill] sm:$0xff] %v6651_v3  ;;  %v6653_v42 = vpop.eup %4907  ;;  %4925 = vpow2.f32 %v1581_v13  ;;  %v1544_v51 = vsub.f32 %v8126_v46, %v6300_v32  ;;  %v8127_v47 = vpack.c.bf16 %v6422_v58, %v6414_v11  ;;  %v1591_v17 = vmul.f32 1.442695, %v1543_v49  ;;  %v8133_v13 = vld [vmem:[#allocation137_spill] sm:$0xff]  ;;  %v8135_v11 = vld [vmem:[#allocation132_spill] sm:$0xff] }
 0x2e1   : > { %8116 = vst [vmem:[#allocation113_spill] sm:$0xff] %v6653_v42  ;;  %4927 = vpow2.f32 %v1583_v41  ;;  %v1607_v61 = vmul.f32 1.442695, %v8121_v53  ;;  %v1609_v6 = vmul.f32 1.442695, %v8125_v28  ;;  %v8132_v10 = vsub.f32 %v8130_v60, %v8131_v1  ;;  %v8136_v58 = vld [vmem:[#allocation133_spill] sm:$0xff] }
 0x2e2   : > { %v6657_v59 = vpop.eup %4909  ;;  %4929 = vpow2.f32 %v1585_v33  ;;  %v1546_v31 = vsub.f32 %v8133_v13, %v6317_v44  ;;  %v8137_v41 = vsub.f32 %v8135_v11, %v8136_v58  ;;  %v1593_v56 = vmul.f32 1.442695, %v1544_v51  ;;  %v8139_v49 = vld [vmem:[#allocation140_spill] sm:$0xff]  ;;  %v8141_v44 = vld [vmem:[#allocation135_spill] sm:$0xff]  ;;  %v8145_v46 = vld [vmem:[#allocation141_spill] sm:$0xff] }
 0x2e3   : > { %8118 = vst [vmem:[#allocation114_spill] sm:$0xff] %v6657_v59  ;;  %3194 = vmatmul.mubr.bf16.vlgmr.msra.gmra.mrb[80].mxu1 %v8122_v52  ;;  %v6673_v7 = vpop.eup %4911  ;;  %4931 = vpow2.f32 %v1587_v63  ;;  %v1611_v57 = vmul.f32 1.442695, %v8132_v10  ;;  %v8142_v53 = vld [vmem:[#allocation136_spill] sm:$0xff]  ;;  %v8151_v13 = vpack.c.bf16 %v6417_v19, %v6409_v9 }
 0x2e4   : > { %3201 = vmatprep.mubr.bf16.mxu1 %v8127_v47  ;;  %8128 = vst [vmem:[#allocation110_spill] sm:$0xff] %v6673_v7  ;;  %v6675_v48 = vpop.eup %4913  ;;  %4933 = vpow2.f32 %v1589_v2  ;;  %v1613_v33 = vmul.f32 1.442695, %v8137_v41  ;;  %v1547_v2 = vsub.f32 %v8139_v49, %v6334_v29  ;;  %v8143_v52 = vsub.f32 %v8141_v44, %v8142_v53  ;;  %v8147_v29 = vld [vmem:[#allocation138_spill] sm:$0xff]  ;;  %v8148_v47 = vld [vmem:[#allocation139_spill] sm:$0xff] }
 0x2e5   : > { %8129 = vst [vmem:[#allocation112_spill] sm:$0xff] %v6675_v48  ;;  %v6682_v32 = vpop.eup %4915  ;;  %4935 = vpow2.f32 %v1607_v61  ;;  %v1597_v28 = vmul.f32 1.442695, %v1546_v31  ;;  %v8149_v60 = vsub.f32 %v8147_v29, %v8148_v47  ;;  %v8159_v53 = vld [vmem:[#allocation6_spill] sm:$0xff] }
 0x2e6   : > { %8134 = vst [vmem:[#allocation115_spill] sm:$0xff] %v6682_v32  ;;  %v6687_v63 = vpop.eup %4917  ;;  %4937 = vpow2.f32 %v1609_v6  ;;  %v1454_v55 = vpop.xlane.xlu0 %1453  ;;  %v1615_v5 = vmul.f32 1.442695, %v8143_v52  ;;  %v1545_v6 = vsub.f32 %v8145_v46, %v6337_v34  ;;  %v1599_v34 = vmul.f32 1.442695, %v1547_v2 }
 0x2e7   : > { %8138 = vst [vmem:[#allocation116_spill] sm:$0xff] %v6687_v63  ;;  %v6691_v54 = vpop.eup %4919  ;;  %4939 = vpow2.f32 %v1591_v17  ;;  %v1518_v61 = vmax.f32 %v1326_v30, %v1454_v55  ;;  %v1617_v1 = vmul.f32 1.442695, %v8149_v60  ;;  %v8150_v17 = vld [vmem:[#allocation146_spill] sm:$0xff]  ;;  %v8158_v55 = vld [vmem:[#allocation7_spill] sm:$0xff] }
 0x2e8   : > { %8140 = vst [vmem:[#allocation117_spill] sm:$0xff] %v6691_v54  ;;  %v6696_v38 = vpop.eup %4921  ;;  %4941 = vpow2.f32 %v1611_v57  ;;  %v1548_v10 = vsub.f32 %v8150_v17, %v6368_v40  ;;  %v1595_v41 = vmul.f32 1.442695, %v1545_v6 }
 0x2e9   : > { %8144 = vst [vmem:[#allocation118_spill] sm:$0xff] %v6696_v38  ;;  %v6700_v51 = vpop.eup %4923  ;;  %4943 = vpow2.f32 %v1613_v33  ;;  %3409 = vst.msk [vmem:[#allocation2 + $0xb8] sm:$0xff] %vm338_vm1, %v1518_v61  ;;  %1740 = vperm.xlu1 %4726, %v1518_v61   ;;  %v1550_v31 = vsub.f32 %v1326_v30, %v1518_v61  ;;  %v8157_v30 = vld [vmem:[#allocation5_spill] sm:$0xff] }
 0x2ea   : > { %8146 = vst [vmem:[#allocation119_spill] sm:$0xff] %v6700_v51  ;;  %v6711_v57 = vpop.eup %4925  ;;  %4945 = vpow2.f32 %v1593_v56  ;;  %v1601_v33 = vmul.f32 1.442695, %v1548_v10 }
 0x2eb   : > { %3202 = vmatmul.mubr.bf16.gmra.mrb[84].mxu1 %v8151_v13  ;;  %8152 = vst [vmem:[#allocation120_spill] sm:$0xff] %v6711_v57  ;;  %v6713_v11 = vpop.eup %4927  ;;  %4947 = vpow2.f32 %v1615_v5  ;;  %v1605_v19 = vmul.f32 1.442695, %v1550_v31  ;;  %v8160_v5 = vld [vmem:[#allocation8_spill] sm:$0xff]  ;;  %v8165_v13 = vld [vmem:[#allocation9_spill] sm:$0xff]  ;;  %v8166_v31 = vld [vmem:[#allocation11_spill] sm:$0xff] }
 0x2ec   : > { %8153 = vst [vmem:[#allocation121_spill] sm:$0xff] %v6713_v11  ;;  %v6715_v58 = vpop.eup %4929  ;;  %4949 = vpow2.f32 %v1597_v28 }
 0x2ed   : > { %8154 = vst [vmem:[#allocation122_spill] sm:$0xff] %v6715_v58  ;;  %v6717_v40 = vpop.eup %4931  ;;  %4951 = vpow2.f32 %v1617_v1  ;;  %2490 = vperm.xlu1 %4726, %v6647_v45  }
 0x2ee   : > { %8155 = vst [vmem:[#allocation123_spill] sm:$0xff] %v6717_v40  ;;  %v6720_v9 = vpop.eup %4933  ;;  %4953 = vpow2.f32 %v1599_v34  ;;  %v1646_v56 = vpop.permute.xlu0 %1645 }
 0x2ef   : > { %8156 = vst [vmem:[#allocation124_spill] sm:$0xff] %v6720_v9  ;;  %v6722_v49 = vpop.eup %4935  ;;  %v1799_v2 = vsub.f32 %v8157_v30, %v1646_v56  ;;  %v1800_v44 = vsub.f32 %v8158_v55, %v1646_v56  ;;  %v1801_v52 = vsub.f32 %v8159_v53, %v1646_v56  ;;  %v1802_v61 = vsub.f32 %v8160_v5, %v1646_v56  ;;  %v8167_v56 = vld [vmem:[#allocation10_spill] sm:$0xff] }
 0x2f0   : > { %v6728_v28 = vpop.eup %4937  ;;  %4955 = vpow2.f32 %v1595_v41 }
 0x2f1   : > { %8161 = vst [vmem:[#allocation129_spill] sm:$0xff] %v6728_v28  ;;  %v6730_v46 = vpop.eup %4939  ;;  %4957 = vpow2.f32 %v1601_v33  ;;  %v1943_v6 = vmul.f32 1.442695, %v1799_v2  ;;  %v1945_v29 = vmul.f32 1.442695, %v1800_v44  ;;  %2500 = vperm.xlu1 %4726, %v6653_v42   ;;  %v8169_v2 = vld [vmem:[#allocation12_spill] sm:$0xff] }
 0x2f2   : > { %8162 = vst [vmem:[#allocation125_spill] sm:$0xff] %v6730_v46  ;;  %v1947_v47 = vmul.f32 1.442695, %v1801_v52  ;;  %v6733_v60 = vpop.eup %4941  ;;  %4959 = vpow2.f32 %v1605_v19  ;;  %v1949_v1 = vmul.f32 1.442695, %v1802_v61  ;;  %v1651_v17 = vpop.permute.xlu0 %1650  ;;  %v1325_v44 = vld [vmem:[#allocation2 + $0xb0] sm:$0xff] }
 0x2f3   : > { %8163 = vst [vmem:[#allocation126_spill] sm:$0xff] %v6733_v60  ;;  %v6735_v10 = vpop.eup %4943  ;;  %4961 = vpow2.f32 %v1943_v6  ;;  %v1803_v34 = vsub.f32 %v8165_v13, %v1651_v17  ;;  %v1804_v41 = vsub.f32 %v8166_v31, %v1651_v17  ;;  %v1805_v30 = vsub.f32 %v8167_v56, %v1651_v17 }
 0x2f4   : > { %8164 = vst [vmem:[#allocation127_spill] sm:$0xff] %v6735_v10  ;;  %v6740_v33 = vpop.eup %4945  ;;  %4963 = vpow2.f32 %v1945_v29  ;;  %v1806_v55 = vsub.f32 %v8169_v2, %v1651_v17  ;;  %v8172_v29 = vld [vmem:[#allocation13_spill] sm:$0xff]  ;;  %v8173_v17 = vld [vmem:[#allocation15_spill] sm:$0xff] }
 0x2f5   : > { %8168 = vst [vmem:[#allocation128_spill] sm:$0xff] %v6740_v33  ;;  %v6743_v53 = vpop.eup %4947  ;;  %4965 = vpow2.f32 %v1947_v47  ;;  %v1951_v19 = vmul.f32 1.442695, %v1803_v34  ;;  %v1953_v52 = vmul.f32 1.442695, %v1804_v41  ;;  %2505 = vperm.xlu1 %4726, %v6657_v59   ;;  %v8176_v41 = vld [vmem:[#allocation16_spill] sm:$0xff] }
 0x2f6   : > { %8170 = vst [vmem:[#allocation134_spill] sm:$0xff] %v6743_v53  ;;  %v1955_v5 = vmul.f32 1.442695, %v1805_v30  ;;  %v6746_v61 = vpop.eup %4949  ;;  %4967 = vpow2.f32 %v1949_v1  ;;  %v1957_v6 = vmul.f32 1.442695, %v1806_v55  ;;  %v1656_v13 = vpop.permute.xlu0 %1655 }
 0x2f7   : > { %8171 = vst [vmem:[#allocation130_spill] sm:$0xff] %v6746_v61  ;;  %v6748_v31 = vpop.eup %4951  ;;  %4969 = vpow2.f32 %v1951_v19  ;;  %v1807_v56 = vsub.f32 %v8172_v29, %v1656_v13  ;;  %v1808_v2 = vsub.f32 %v8173_v17, %v1656_v13  ;;  %v1809_v0 = vsub.f32 %v8174_v26, %v1656_v13  ;;  %v1449_v47 = vpop.xlane.xlu1 %1448 }
 0x2f8   : > { %v6753_v34 = vpop.eup %4953  ;;  %4971 = vpow2.f32 %v1953_v52  ;;  %v1810_v30 = vsub.f32 %v8176_v41, %v1656_v13  ;;  %v1517_v59 = vmax.f32 %v1325_v44, %v1449_v47  ;;  %v8179_v52 = vld [vmem:[#allocation17_spill] sm:$0xff] }
 0x2f9   : > { %8175 = vst [vmem:[#allocation131_spill] sm:$0xff] %v6753_v34  ;;  %4973 = vpow2.f32 %v1955_v5  ;;  %v1959_v1 = vmul.f32 1.442695, %v1807_v56  ;;  %v1961_v55 = vmul.f32 1.442695, %v1808_v2  ;;  %2515 = vperm.xlu1 %4726, %v6675_v48   ;;  %v8180_v5 = vld [vmem:[#allocation19_spill] sm:$0xff] }
 0x2fa   : > { %v1963_v42 = vmul.f32 1.442695, %v1809_v0  ;;  %v6757_v19 = vpop.eup %4955  ;;  %4975 = vpow2.f32 %v1957_v6  ;;  %v1965_v29 = vmul.f32 1.442695, %v1810_v30  ;;  %v1549_v17 = vsub.f32 %v1325_v44, %v1517_v59  ;;  %3408 = vst.msk [vmem:[#allocation2 + $0xb0] sm:$0xff] %vm338_vm1, %v1517_v59  ;;  %v1661_v26 = vpop.permute.xlu0 %1660  ;;  %1735 = vperm.xlu0 %4725, %v1517_v59   ;;  %v8181_v2 = vld [vmem:[#allocation18_spill] sm:$0xff] }
 0x2fb   : > { %8177 = vst [vmem:[#allocation137_spill] sm:$0xff] %v6757_v19  ;;  %v6760_v45 = vpop.eup %4957  ;;  %4977 = vpow2.f32 %v1959_v1  ;;  %v1811_v13 = vsub.f32 %v8179_v52, %v1661_v26  ;;  %v1812_v56 = vsub.f32 %v8180_v5, %v1661_v26  ;;  %v1813_v0 = vsub.f32 %v8181_v2, %v1661_v26  ;;  %v1666_v47 = vpop.permute.xlu1 %1665  ;;  %v8183_v30 = vld [vmem:[#allocation20_spill] sm:$0xff]  ;;  %v8184_v48 = vld [vmem:[#allocation21_spill] sm:$0xff]  ;;  %v8185_v2 = vld [vmem:[#allocation23_spill] sm:$0xff] }
 0x2fc   : > { %8178 = vst [vmem:[#allocation132_spill] sm:$0xff] %v6760_v45  ;;  %v6765_v41 = vpop.eup %4959  ;;  %4979 = vpow2.f32 %v1961_v55  ;;  %v1603_v6 = vmul.f32 1.442695, %v1549_v17  ;;  %v1814_v44 = vsub.f32 %v8183_v30, %v1661_v26  ;;  %v1815_v16 = vsub.f32 %v8184_v48, %v1666_v47  ;;  %v8186_v55 = vld [vmem:[#allocation22_spill] sm:$0xff] }
 0x2fd   : > { %8182 = vst [vmem:[#allocation133_spill] sm:$0xff] %v6765_v41  ;;  %v6769_v39 = vpop.eup %4961  ;;  %4981 = vpow2.f32 %v1963_v42  ;;  %v1967_v59 = vmul.f32 1.442695, %v1811_v13  ;;  %v1969_v1 = vmul.f32 1.442695, %v1812_v56  ;;  %2525 = vperm.xlu1 %4726, %v6687_v63   ;;  %v1816_v27 = vsub.f32 %v8185_v2, %v1666_v47  ;;  %v8187_v42 = vld [vmem:[#allocation24_spill] sm:$0xff] }
 0x2fe   : > { %v1971_v14 = vmul.f32 1.442695, %v1813_v0  ;;  %v6772_v52 = vpop.eup %4963  ;;  %4983 = vpow2.f32 %v1965_v29  ;;  %v1973_v5 = vmul.f32 1.442695, %v1814_v44  ;;  %v1817_v17 = vsub.f32 %v8186_v55, %v1666_v47  ;;  %v1671_v21 = vpop.permute.xlu0 %1670  ;;  %2495 = vperm.xlu0 %4725, %v6651_v3   ;;  %v8188_v56 = vld [vmem:[#allocation25_spill] sm:$0xff]  ;;  %v8189_v2 = vld [vmem:[#allocation27_spill] sm:$0xff] }
 0x2ff   : > { %v6777_v48 = vpop.eup %4965  ;;  %4985 = vpow2.f32 %v1603_v6  ;;  %v1818_v26 = vsub.f32 %v8187_v42, %v1666_v47  ;;  %v1975_v13 = vmul.f32 1.442695, %v1815_v16  ;;  %v1819_v0 = vsub.f32 %v8188_v56, %v1671_v21  ;;  %v1691_v30 = vpop.permute.xlu1 %1690  ;;  %v8191_v6 = vld [vmem:[#allocation28_spill] sm:$0xff] }
 0x300   : > { %v6781_v63 = vpop.eup %4967  ;;  %4987 = vpow2.f32 %v1967_v59  ;;  %v1977_v29 = vmul.f32 1.442695, %v1816_v27  ;;  %v1979_v44 = vmul.f32 1.442695, %v1817_v17  ;;  %v1820_v23 = vsub.f32 %v8189_v2, %v1671_v21  ;;  %v8192_v59 = vld [vmem:[#allocation41_spill] sm:$0xff] }
 0x301   : > { %v6784_v55 = vpop.eup %4969  ;;  %4989 = vpow2.f32 %v1969_v1  ;;  %v1981_v3 = vmul.f32 1.442695, %v1818_v26  ;;  %v1821_v20 = vsub.f32 %v8190_v25, %v1671_v21  ;;  %v1822_v36 = vsub.f32 %v8191_v6, %v1671_v21  ;;  %2535 = vperm.xlu1 %4726, %v6696_v38   ;;  %v8194_v25 = vld [vmem:[#allocation43_spill] sm:$0xff]  ;;  %v8196_v6 = vld [vmem:[#allocation42_spill] sm:$0xff] }
 0x302   : > { %v6789_v16 = vpop.eup %4971  ;;  %4991 = vpow2.f32 %v1971_v14  ;;  %v1983_v47 = vmul.f32 1.442695, %v1819_v0  ;;  %v1985_v42 = vmul.f32 1.442695, %v1820_v23  ;;  %v1835_v27 = vsub.f32 %v8192_v59, %v1691_v30  ;;  %v1676_v17 = vpop.permute.xlu0 %1675  ;;  %2510 = vperm.xlu0 %4725, %v6673_v7   ;;  %v8197_v14 = vld [vmem:[#allocation44_spill] sm:$0xff]  ;;  %v8198_v7 = vld [vmem:[#allocation29_spill] sm:$0xff] }
 0x303   : > { %v6793_v56 = vpop.eup %4973  ;;  %4993 = vpow2.f32 %v1973_v5  ;;  %v1987_v1 = vmul.f32 1.442695, %v1821_v20  ;;  %v1989_v26 = vmul.f32 1.442695, %v1822_v36  ;;  %v1836_v2 = vsub.f32 %v8194_v25, %v1691_v30  ;;  %v1701_v20 = vpop.permute.xlu1 %1700 }
 0x304   : > { %8193 = vst [vmem:[#allocation140_spill] sm:$0xff] %v6793_v56  ;;  %v6796_v21 = vpop.eup %4975  ;;  %4995 = vpow2.f32 %v1975_v13  ;;  %v1837_v38 = vsub.f32 %v8196_v6, %v1691_v30  ;;  %v1838_v0 = vsub.f32 %v8197_v14, %v1691_v30  ;;  %v2015_v23 = vmul.f32 1.442695, %v1835_v27  ;;  %v8200_v6 = vld [vmem:[#allocation30_spill] sm:$0xff] }
 0x305   : > { %8195 = vst [vmem:[#allocation135_spill] sm:$0xff] %v6796_v21  ;;  %v6800_v4 = vpop.eup %4977  ;;  %4997 = vpow2.f32 %v1977_v29  ;;  %v2017_v59 = vmul.f32 1.442695, %v1836_v2  ;;  %v1823_v18 = vsub.f32 %v8198_v7, %v1676_v17  ;;  %v1824_v5 = vsub.f32 %v8199_v15, %v1676_v17  ;;  %2545 = vperm.xlu1 %4726, %v6711_v57   ;;  %v8201_v29 = vld [vmem:[#allocation32_spill] sm:$0xff] }
 0x306   : > { %v6805_v36 = vpop.eup %4979  ;;  %4999 = vpow2.f32 %v1979_v44  ;;  %v2019_v13 = vmul.f32 1.442695, %v1837_v38  ;;  %v2021_v25 = vmul.f32 1.442695, %v1838_v0  ;;  %v1825_v22 = vsub.f32 %v8200_v6, %v1676_v17  ;;  %v1681_v30 = vpop.permute.xlu0 %1680  ;;  %2520 = vperm.xlu0 %4725, %v6682_v32   ;;  %v8204_v38 = vld [vmem:[#allocation51_spill] sm:$0xff]  ;;  %v8205_v32 = vld [vmem:[#allocation50_spill] sm:$0xff] }
 0x307   : > { %v6809_v27 = vpop.eup %4981  ;;  %5001 = vpow2.f32 %v1981_v3  ;;  %v1826_v7 = vsub.f32 %v8201_v29, %v1676_v17  ;;  %v1991_v2 = vmul.f32 1.442695, %v1823_v18  ;;  %v1993_v15 = vmul.f32 1.442695, %v1824_v5  ;;  %v1711_v5 = vpop.permute.xlu1 %1710 }
 0x308   : > { %v6812_v14 = vpop.eup %4983  ;;  %5003 = vpow2.f32 %v1983_v47  ;;  %v1995_v57 = vmul.f32 1.442695, %v1825_v22  ;;  %v1843_v44 = vsub.f32 %v8203_v12, %v1701_v20  ;;  %v1844_v0 = vsub.f32 %v8204_v38, %v1701_v20  ;;  %v8210_v38 = vld [vmem:[#allocation35_spill] sm:$0xff] }
 0x309   : > { %8202 = vst [vmem:[#allocation136_spill] sm:$0xff] %v6812_v14  ;;  %v6816_v8 = vpop.eup %4985  ;;  %5005 = vpow2.f32 %v1985_v42  ;;  %v1997_v6 = vmul.f32 1.442695, %v1826_v7  ;;  %v1845_v37 = vsub.f32 %v8205_v32, %v1701_v20  ;;  %v1846_v3 = vsub.f32 %v8206_v43, %v1701_v20  ;;  %2555 = vperm.xlu1 %4726, %v6715_v58  }
 0x30a   : > { %v6821_v18 = vpop.eup %4987  ;;  %5007 = vpow2.f32 %v1987_v1  ;;  %v2031_v17 = vmul.f32 1.442695, %v1843_v44  ;;  %v6823_v47 = vmul.f32 1.442695, %v1844_v0  ;;  %v2689_v12 = vpack.c.bf16 %v6789_v16, %v6772_v52  ;;  %v6827_v22 = vpop.permute.xlu0 %1685  ;;  %2530 = vperm.xlu0 %4725, %v6691_v54   ;;  %v8208_v44 = vld [vmem:[#allocation33_spill] sm:$0xff]  ;;  %v8212_v54 = vld [vmem:[#allocation36_spill] sm:$0xff] }
 0x30b   : > { %v6830_v42 = vpop.eup %4989  ;;  %5009 = vpow2.f32 %v1989_v26  ;;  %v6832_v32 = vmul.f32 1.442695, %v1845_v37  ;;  %v6834_v43 = vmul.f32 1.442695, %v1846_v3  ;;  %v2691_v1 = vpack.c.bf16 %v6796_v21, %v6781_v63  ;;  %v8211_v3 = vld [vmem:[#allocation34_spill] sm:$0xff] }
 0x30c   : > { %v6838_v20 = vpop.eup %4991  ;;  %5011 = vpow2.f32 %v2015_v23  ;;  %3048 = vmatprep.mubr.bf16.mxu0 %v2689_v12  ;;  %v2688_v29 = vpack.c.bf16 %v6784_v55, %v6769_v39  ;;  %v2690_v7 = vpack.c.bf16 %v6793_v56, %v6777_v48  ;;  %v1827_v26 = vsub.f32 %v8208_v44, %v1681_v30 }
 0x30d   : > { %8207 = vst [vmem:[#allocation141_spill] sm:$0xff] %v6838_v20  ;;  %v6845_v37 = vpop.eup %4993  ;;  %5013 = vpow2.f32 %v2017_v59  ;;  %3209 = vmatprep.mubr.bf16.mxu1 %v2691_v1  ;;  %v1828_v0 = vsub.f32 %v8210_v38, %v1681_v30  ;;  %v1829_v58 = vsub.f32 %v8211_v3, %v1681_v30  ;;  %v1830_v24 = vsub.f32 %v8212_v54, %v1681_v30  ;;  %v8215_v30 = vld [vmem:[#allocation58_spill] sm:$0xff] }
 0x30e   : > { %8209 = vst [vmem:[#allocation138_spill] sm:$0xff] %v6845_v37  ;;  %2565 = vperm.xlu1 %4726, %v6720_v9   ;;  %v6851_v23 = vpop.eup %4995  ;;  %5015 = vpow2.f32 %v2019_v13  ;;  %3049 = vmatmul.mubr.bf16.gmra.mrb[72].mxu0 %v2688_v29  ;;  %v1999_v12 = vmul.f32 1.442695, %v1827_v26  ;;  %v1851_v44 = vsub.f32 %v8213_v50, %v1711_v5  ;;  %v1852_v62 = vsub.f32 %v8214_v35, %v1711_v5  ;;  %v6855_v59 = vpop.permute.xlu0 %1695  ;;  %v8216_v50 = vld [vmem:[#allocation60_spill] sm:$0xff] }
 0x30f   : > { %3210 = vmatmul.mubr.bf16.gmra.mrb[88].mxu1 %v2690_v7  ;;  %v6857_v1 = vpop.eup %4997  ;;  %5017 = vpow2.f32 %v2021_v25  ;;  %v2001_v38 = vmul.f32 1.442695, %v1828_v0  ;;  %v6859_v3 = vmul.f32 1.442695, %v1829_v58  ;;  %v6861_v54 = vmul.f32 1.442695, %v1830_v24  ;;  %2540 = vperm.xlu0 %4725, %v6700_v51   ;;  %v1721_v51 = vpop.permute.xlu1 %1720 }
 0x310   : > { %v6864_v13 = vpop.eup %4999  ;;  %5019 = vpow2.f32 %v1991_v2  ;;  %v1853_v29 = vsub.f32 %v8215_v30, %v1711_v5  ;;  %v1854_v7 = vsub.f32 %v8216_v50, %v1711_v5  ;;  %v6868_v35 = vmul.f32 1.442695, %v1851_v44  ;;  %v8217_v58 = vld [vmem:[#allocation37_spill] sm:$0xff]  ;;  %v8218_v0 = vld [vmem:[#allocation39_spill] sm:$0xff]  ;;  %v8220_v50 = vld [vmem:[#allocation40_spill] sm:$0xff] }
 0x311   : > { %v6870_v26 = vpop.eup %5001  ;;  %5021 = vpow2.f32 %v1993_v15  ;;  %v6872_v25 = vmul.f32 1.442695, %v1852_v62  ;;  %v1831_v24 = vsub.f32 %v8217_v58, %v6827_v22  ;;  %v1832_v9 = vsub.f32 %v8218_v0, %v6827_v22  ;;  %v8219_v15 = vld [vmem:[#allocation38_spill] sm:$0xff] }
 0x312   : > { %2575 = vperm.xlu1 %4726, %v6740_v33   ;;  %v6879_v2 = vpop.eup %5003  ;;  %5023 = vpow2.f32 %v1995_v57  ;;  %v6881_v5 = vmul.f32 1.442695, %v1853_v29  ;;  %v6883_v44 = vmul.f32 1.442695, %v1854_v7  ;;  %v1833_v62 = vsub.f32 %v8219_v15, %v6827_v22  ;;  %v8221_v7 = vld [vmem:[#allocation65_spill] sm:$0xff]  ;;  %v8222_v15 = vld [vmem:[#allocation67_spill] sm:$0xff]  ;;  %v6902_v21 = vpop.permute.xlu0 %1705 }
 0x313   : > { %v6887_v30 = vpop.eup %5005  ;;  %5025 = vpow2.f32 %v1997_v6  ;;  %v1834_v58 = vsub.f32 %v8220_v50, %v6827_v22  ;;  %v6891_v0 = vmul.f32 1.442695, %v1831_v24  ;;  %v6893_v53 = vmul.f32 1.442695, %v1832_v9  ;;  %2550 = vperm.xlu0 %4725, %v6713_v11   ;;  %v8224_v9 = vld [vmem:[#allocation66_spill] sm:$0xff]  ;;  %v8225_v50 = vld [vmem:[#allocation68_spill] sm:$0xff] }
 0x314   : > { %v6896_v57 = vpop.eup %5007  ;;  %5027 = vpow2.f32 %v2031_v17  ;;  %v6898_v29 = vmul.f32 1.442695, %v1833_v62  ;;  %v1859_v33 = vsub.f32 %v8221_v7, %v1721_v51  ;;  %v1860_v60 = vsub.f32 %v8222_v15, %v1721_v51 }
 0x315   : > { %v6904_v6 = vpop.eup %5009  ;;  %5029 = vpow2.f32 %v6823_v47  ;;  %v6907_v22 = vmul.f32 1.442695, %v1834_v58  ;;  %v1861_v24 = vsub.f32 %v8224_v9, %v1721_v51  ;;  %v1862_v11 = vsub.f32 %v8225_v50, %v1721_v51  ;;  %v1731_v50 = vpop.permute.xlu1 %1730 }
 0x316   : > { %8223 = vst [vmem:[#allocation139_spill] sm:$0xff] %v6904_v6  ;;  %2585 = vperm.xlu1 %4726, %v6746_v61   ;;  %v6912_v17 = vpop.eup %5011  ;;  %5031 = vpow2.f32 %v6832_v32  ;;  %v6915_v62 = vmul.f32 1.442695, %v1859_v33  ;;  %v6917_v7 = vmul.f32 1.442695, %v1860_v60  ;;  %v2693_v15 = vpack.c.bf16 %v6830_v42, %v6805_v36  ;;  %v8229_v61 = vld [vmem:[#allocation47_spill] sm:$0xff] }
 0x317   : > { %v6921_v47 = vpop.eup %5013  ;;  %5033 = vpow2.f32 %v6834_v43  ;;  %v6924_v58 = vmul.f32 1.442695, %v1861_v24  ;;  %v6926_v51 = vmul.f32 1.442695, %v1862_v11  ;;  %v2695_v9 = vpack.c.bf16 %v6845_v37, %v6812_v14  ;;  %2560 = vperm.xlu0 %4725, %v6717_v40   ;;  %v8227_v43 = vld [vmem:[#allocation45_spill] sm:$0xff]  ;;  %v8230_v37 = vld [vmem:[#allocation46_spill] sm:$0xff] }
 0x318   : > { %v6931_v33 = vpop.eup %5015  ;;  %5035 = vpow2.f32 %v1999_v12  ;;  %3056 = vmatprep.mubr.bf16.mxu0 %v2693_v15  ;;  %v2692_v60 = vpack.c.bf16 %v6821_v18, %v6800_v4  ;;  %v2694_v32 = vpack.c.bf16 %v6838_v20, %v6809_v27  ;;  %v1839_v11 = vsub.f32 %v8227_v43, %v6855_v59  ;;  %v8231_v15 = vld [vmem:[#allocation48_spill] sm:$0xff]  ;;  %v8233_v20 = vld [vmem:[#allocation75_spill] sm:$0xff] }
 0x319   : > { %8226 = vst [vmem:[#allocation146_spill] sm:$0xff] %v6931_v33  ;;  %v6939_v24 = vpop.eup %5017  ;;  %5037 = vpow2.f32 %v2001_v38  ;;  %3217 = vmatprep.mubr.bf16.mxu1 %v2695_v9  ;;  %v1840_v40 = vsub.f32 %v8229_v61, %v6855_v59  ;;  %v1841_v12 = vsub.f32 %v8230_v37, %v6855_v59  ;;  %v1842_v14 = vsub.f32 %v8231_v15, %v6855_v59  ;;  %v8232_v38 = vld [vmem:[#allocation73_spill] sm:$0xff] }
 0x31a   : > { %8228 = vst [vmem:[#allocation5_spill] sm:$0xff] %v6939_v24  ;;  %2595 = vperm.xlu1 %4726, %v6760_v45   ;;  %v6948_v33 = vpop.eup %5019  ;;  %5039 = vpow2.f32 %v6859_v3  ;;  %3057 = vmatmul.mubr.bf16.gmra.mrb[76].mxu0 %v2692_v60  ;;  %v6951_v43 = vmul.f32 1.442695, %v1839_v11  ;;  %v1867_v9 = vsub.f32 %v8232_v38, %v1731_v50  ;;  %v1868_v61 = vsub.f32 %v8233_v20, %v1731_v50  ;;  %v6955_v24 = vpop.permute.xlu0 %1715  ;;  %v8234_v60 = vld [vmem:[#allocation74_spill] sm:$0xff] }
 0x31b   : > { %3218 = vmatmul.mubr.bf16.gmra.mrb[92].mxu1 %v2694_v32  ;;  %v6957_v37 = vpop.eup %5021  ;;  %5041 = vpow2.f32 %v6861_v54  ;;  %v6960_v59 = vmul.f32 1.442695, %v1840_v40  ;;  %v6962_v15 = vmul.f32 1.442695, %v1841_v12  ;;  %v6964_v45 = vmul.f32 1.442695, %v1842_v14  ;;  %2570 = vperm.xlu0 %4725, %v6730_v46  }
 0x31c   : > { %v6967_v3 = vpop.eup %5023  ;;  %5043 = vpow2.f32 %v6868_v35  ;;  %v1869_v20 = vsub.f32 %v8234_v60, %v1731_v50  ;;  %v8235_v32 = vld [vmem:[#allocation76_spill] sm:$0xff]  ;;  %v6972_v38 = vmul.f32 1.442695, %v1867_v9  ;;  %v6977_v40 = vmul.f32 1.442695, %v1868_v61  ;;  %v8237_v60 = vld [vmem:[#allocation55_spill] sm:$0xff] }
 0x31d   : > { %v1870_v11 = vsub.f32 %v8235_v32, %v1731_v50  ;;  %v6974_v56 = vpop.eup %5025  ;;  %5045 = vpow2.f32 %v6872_v25  ;;  %v2697_v14 = vpack.c.bf16 %v6887_v30, %v6857_v1  ;;  %v2699_v54 = vpack.c.bf16 %v6904_v6, %v6870_v26  ;;  %v8236_v25 = vld [vmem:[#allocation53_spill] sm:$0xff] }
 0x31e   : > { %2605 = vperm.xlu1 %4726, %v6765_v41   ;;  %v6984_v35 = vpop.eup %5027  ;;  %5047 = vpow2.f32 %v6881_v5  ;;  %v6987_v50 = vmul.f32 1.442695, %v1869_v20  ;;  %v1847_v9 = vsub.f32 %v8236_v25, %v6902_v21  ;;  %v1848_v32 = vsub.f32 %v8237_v60, %v6902_v21  ;;  %v8238_v41 = vld [vmem:[#allocation54_spill] sm:$0xff]  ;;  %v8239_v5 = vld [vmem:[#allocation56_spill] sm:$0xff]  ;;  %v8247_v6 = vld [vmem:[#allocation69_spill] sm:$0xff] }
 0x31f   : > { %v6989_v12 = vmul.f32 1.442695, %v1870_v11  ;;  %v6993_v61 = vpop.eup %5029  ;;  %5049 = vpow2.f32 %v6883_v44  ;;  %3064 = vmatprep.mubr.bf16.mxu0 %v2697_v14  ;;  %3225 = vmatprep.mubr.bf16.mxu1 %v2699_v54  ;;  %v1849_v46 = vsub.f32 %v8238_v41, %v6902_v21  ;;  %v1850_v20 = vsub.f32 %v8239_v5, %v6902_v21  ;;  %v1726_v54 = vpop.permute.xlu0 %1725  ;;  %v8243_v5 = vld [vmem:[#allocation61_spill] sm:$0xff] }
 0x320   : > { %v7002_v11 = vpop.eup %5031  ;;  %5051 = vpow2.f32 %v6891_v0  ;;  %v7005_v25 = vmul.f32 1.442695, %v1847_v9  ;;  %v2696_v44 = vpack.c.bf16 %v6879_v2, %v6851_v23  ;;  %v2698_v14 = vpack.c.bf16 %v6896_v57, %v6864_v13  ;;  %2580 = vperm.xlu0 %4725, %v6757_v19  }
 0x321   : > { %8240 = vst [vmem:[#allocation7_spill] sm:$0xff] %v7002_v11  ;;  %v7012_v60 = vpop.eup %5033  ;;  %5053 = vpow2.f32 %v6893_v53  ;;  %v7015_v41 = vmul.f32 1.442695, %v1848_v32  ;;  %v7017_v21 = vmul.f32 1.442695, %v1849_v46  ;;  %v1855_v19 = vsub.f32 %v8243_v5, %v6955_v24  ;;  %v8245_v32 = vld [vmem:[#allocation62_spill] sm:$0xff] }
 0x322   : > { %8241 = vst [vmem:[#allocation6_spill] sm:$0xff] %v7012_v60  ;;  %v7019_v0 = vmul.f32 1.442695, %v1850_v20  ;;  %2615 = vperm.xlu1 %4726, %v6728_v28   ;;  %v7022_v9 = vpop.eup %5035  ;;  %5055 = vpow2.f32 %v6898_v29  ;;  %3065 = vmatmul.mubr.bf16.gmra.mrb[80].mxu0 %v2696_v44  ;;  %v8244_v60 = vld [vmem:[#allocation63_spill] sm:$0xff]  ;;  %v1857_v46 = vsub.f32 %v8245_v32, %v6955_v24  ;;  %v8246_v20 = vld [vmem:[#allocation64_spill] sm:$0xff]  ;;  %v1863_v29 = vsub.f32 %v8247_v6, %v1726_v54 }
 0x323   : > { %3226 = vmatmul.mubr.bf16.gmra.mrb[96].mxu1 %v2698_v14  ;;  %v1856_v53 = vsub.f32 %v8244_v60, %v6955_v24  ;;  %v7031_v11 = vpop.eup %5037  ;;  %5057 = vpow2.f32 %v6907_v22  ;;  %v1858_v28 = vsub.f32 %v8246_v20, %v6955_v24  ;;  %v8248_v44 = vld [vmem:[#allocation71_spill] sm:$0xff]  ;;  %v7041_v5 = vmul.f32 1.442695, %v1855_v19  ;;  %v8249_v20 = vld [vmem:[#allocation70_spill] sm:$0xff] }
 0x324   : > { %8242 = vst [vmem:[#allocation8_spill] sm:$0xff] %v7019_v0  ;;  %v1864_v14 = vsub.f32 %v8248_v44, %v1726_v54  ;;  %v7038_v0 = vpop.eup %5039  ;;  %5059 = vpow2.f32 %v6915_v62  ;;  %v7045_v32 = vmul.f32 1.442695, %v1857_v46  ;;  %2590 = vperm.xlu0 %4725, %v6753_v34   ;;  %v2701_v6 = vpack.c.bf16 %v7031_v11, %v6957_v37 }
 0x325   : > { %v7043_v60 = vmul.f32 1.442695, %v1856_v53  ;;  %v7048_v22 = vpop.eup %5041  ;;  %5061 = vpow2.f32 %v6917_v7  ;;  %v7051_v24 = vmul.f32 1.442695, %v1858_v28  ;;  %v1865_v44 = vsub.f32 %v8249_v20, %v1726_v54  ;;  %v8250_v53 = vld [vmem:[#allocation72_spill] sm:$0xff] }
 0x326   : > { %2625 = vperm.xlu1 %4726, %v6735_v10   ;;  %v7057_v19 = vpop.eup %5043  ;;  %5063 = vpow2.f32 %v6924_v58  ;;  %v2703_v62 = vpack.c.bf16 %v7048_v22, %v6974_v56  ;;  %v1866_v46 = vsub.f32 %v8250_v53, %v1726_v54  ;;  %v7063_v34 = vmul.f32 1.442695, %v1863_v29  ;;  %3072 = vmatprep.mubr.bf16.mxu0 %v2701_v6  ;;  %v8255_v53 = vld [vmem:[#allocation135_spill] sm:$0xff] }
 0x327   : > { %v7065_v28 = vpop.eup %5045  ;;  %5065 = vpow2.f32 %v6926_v51  ;;  %v7068_v7 = vmul.f32 1.442695, %v1864_v14  ;;  %v7070_v20 = vmul.f32 1.442695, %v1865_v44  ;;  %v2700_v10 = vpack.c.bf16 %v7022_v9, %v6948_v33 }
 0x328   : > { %v7074_v58 = vpop.eup %5047  ;;  %5067 = vpow2.f32 %v6951_v43  ;;  %3233 = vmatprep.mubr.bf16.mxu1 %v2703_v62  ;;  %v7077_v54 = vmul.f32 1.442695, %v1866_v46  ;;  %v2702_v29 = vpack.c.bf16 %v7038_v0, %v6967_v3  ;;  %2600 = vperm.xlu0 %4725, %v6816_v8   ;;  %v2251_v51 = vadd.f32 %v6772_v52, %v6769_v39 }
 0x329   : > { %v7084_v14 = vpop.eup %5049  ;;  %5069 = vpow2.f32 %v6960_v59  ;;  %v2261_v43 = vadd.f32 %v6805_v36, %v6800_v4  ;;  %v2271_v6 = vadd.f32 %v6857_v1, %v6851_v23  ;;  %v2256_v44 = vadd.f32 %v6789_v16, %v6784_v55 }
 0x32a   : > { %2635 = vperm.xlu1 %4726, %v6748_v31   ;;  %v5052_v62 = vpop.eup %5051  ;;  %5071 = vpow2.f32 %v6962_v15  ;;  %3073 = vmatmul.mubr.bf16.gmra.mrb[84].mxu0 %v2700_v10  ;;  %v2252_v39 = vadd.f32 %v6777_v48, %v2251_v51  ;;  %v2281_v52 = vadd.f32 %v6957_v37, %v6948_v33  ;;  %v2266_v59 = vadd.f32 %v6830_v42, %v6821_v18  ;;  %v8251_v18 = vld [vmem:[#allocation140_spill] sm:$0xff]  ;;  %v8256_v51 = vld [vmem:[#allocation141_spill] sm:$0xff] }
 0x32b   : > { %3234 = vmatmul.mubr.bf16.gmra.mrb[100].mxu1 %v2702_v29  ;;  %v5054_v4 = vpop.eup %5053  ;;  %5073 = vpow2.f32 %v6964_v45  ;;  %v2704_v36 = vpack.c.bf16 %v6912_v17, %v5052_v62  ;;  %v2262_v55 = vadd.f32 %v6809_v27, %v2261_v43  ;;  %v2272_v16 = vadd.f32 %v6864_v13, %v2271_v6  ;;  %v8252_v45 = vld [vmem:[#allocation146_spill] sm:$0xff]  ;;  %v8253_v27 = vld [vmem:[#allocation136_spill] sm:$0xff] }
 0x32c   : > { %v5056_v23 = vpop.eup %5055  ;;  %5075 = vpow2.f32 %v6972_v38  ;;  %v2705_v10 = vpack.c.bf16 %v6921_v47, %v5054_v4  ;;  %2610 = vperm.xlu0 %4725, %v6722_v49   ;;  %v7108_v48 = vadd.f32 %v6781_v63, %v2252_v39  ;;  %v2257_v42 = vadd.f32 %v8251_v18, %v2256_v44  ;;  %v8254_v63 = vld [vmem:[#allocation5_spill] sm:$0xff] }
 0x32d   : > { %v5058_v1 = vpop.eup %5057  ;;  %5077 = vpow2.f32 %v6977_v40  ;;  %v2706_v33 = vpack.c.bf16 %v8252_v45, %v5056_v23  ;;  %v7114_v37 = vadd.f32 %v8253_v27, %v2262_v55  ;;  %v7117_v13 = vadd.f32 %v6870_v26, %v2272_v16  ;;  %v8260_v16 = vld [vmem:[#allocation139_spill] sm:$0xff] }
 0x32e   : > { %v7119_v15 = vpop.eup %5059  ;;  %5079 = vpow2.f32 %v6987_v50  ;;  %3080 = vmatprep.mubr.bf16.mxu0 %v2705_v10  ;;  %v2707_v38 = vpack.c.bf16 %v8254_v63, %v5058_v1  ;;  %v7124_v46 = vadd.f32 %v8255_v53, %v2257_v42  ;;  %v2282_v40 = vadd.f32 %v6967_v3, %v2281_v52  ;;  %v8257_v50 = vld [vmem:[#allocation126_spill] sm:$0xff] }
 0x32f   : > { %v7127_v29 = vpop.eup %5061  ;;  %5081 = vpow2.f32 %v6989_v12  ;;  %v2267_v43 = vadd.f32 %v8256_v51, %v2266_v59  ;;  %v2291_v26 = vadd.f32 %v5054_v4, %v5052_v62  ;;  %v2276_v6 = vadd.f32 %v6887_v30, %v6879_v2  ;;  %v8258_v2 = vld [vmem:[#allocation138_spill] sm:$0xff] }
 0x330   : > { %v7133_v44 = vpop.eup %5063  ;;  %5083 = vpow2.f32 %v7005_v25  ;;  %3241 = vmatprep.mubr.bf16.mxu1 %v2707_v38  ;;  %2620 = vperm.xlu0 %4725, %v8257_v50   ;;  %v7138_v39 = vadd.f32 %v6974_v56, %v2282_v40  ;;  %v2286_v3 = vadd.f32 %v7031_v11, %v7022_v9  ;;  %v2296_v12 = vadd.f32 %v6921_v47, %v6912_v17  ;;  %v8259_v9 = vld [vmem:[#allocation8_spill] sm:$0xff]  ;;  %v8261_v10 = vld [vmem:[#allocation134_spill] sm:$0xff] }
 0x331   : > { %v7144_v62 = vpop.eup %5065  ;;  %5085 = vpow2.f32 %v7015_v41  ;;  %v7148_v30 = vadd.f32 %v8258_v2, %v2267_v43  ;;  %v2292_v25 = vadd.f32 %v5056_v23, %v2291_v26  ;;  %v2277_v52 = vadd.f32 %v6896_v57, %v2276_v6 }
 0x332   : > { %v5068_v59 = vpop.eup %5067  ;;  %5087 = vpow2.f32 %v7017_v21  ;;  %3081 = vmatmul.mubr.bf16.gmra.mrb[88].mxu0 %v2704_v36  ;;  %v4406_v56 = vpop.f32.mrb[64].mxu0  ;;  %v2287_v11 = vadd.f32 %v7038_v0, %v2286_v3  ;;  %v2297_v17 = vadd.f32 %v8252_v45, %v2296_v12  ;;  %v2306_v47 = vadd.f32 %v6993_v61, %v6984_v35 }
 0x333   : > { %3242 = vmatmul.mubr.bf16.gmra.mrb[104].mxu1 %v2706_v33  ;;  %v5070_v41 = vpop.eup %5069  ;;  %5089 = vpow2.f32 %v8259_v9  ;;  %v2708_v4 = vpack.c.bf16 %v6984_v35, %v5068_v59  ;;  %v4407_v55 = vpop.f32.mrb[65].mxu0  ;;  %v7158_v57 = vadd.f32 %v5058_v1, %v2292_v25  ;;  %v7161_v21 = vadd.f32 %v8260_v16, %v2277_v52  ;;  %v8262_v35 = vld [vmem:[#allocation7_spill] sm:$0xff] }
 0x334   : > { %v5072_v36 = vpop.eup %5071  ;;  %5091 = vpow2.f32 %v7041_v5  ;;  %v2709_v0 = vpack.c.bf16 %v6993_v61, %v5070_v41  ;;  %v7165_v23 = vadd.f32 %v4407_v55, %v4406_v56  ;;  %2630 = vperm.xlu0 %4725, %v8261_v10   ;;  %v4409_v18 = vpop.f32.mrb[66].mxu0  ;;  %v2301_v42 = vadd.f32 %v5070_v41, %v5068_v59  ;;  %v8263_v61 = vld [vmem:[#allocation6_spill] sm:$0xff] }
 0x335   : > { %v5074_v45 = vpop.eup %5073  ;;  %5093 = vpow2.f32 %v7043_v60  ;;  %v2710_v1 = vpack.c.bf16 %v8262_v35, %v5072_v36  ;;  %v4410_v33 = vpop.f32.mrb[67].mxu0  ;;  %v7171_v27 = vadd.f32 %v7048_v22, %v2287_v11  ;;  %v7174_v38 = vadd.f32 %v8254_v63, %v2297_v17 }
 0x336   : > { %v7176_v5 = vpop.eup %5075  ;;  %5095 = vpow2.f32 %v7045_v32  ;;  %3088 = vmatprep.mubr.bf16.mxu0 %v2709_v0  ;;  %v2711_v53 = vpack.c.bf16 %v8263_v61, %v5074_v45  ;;  %v7180_v40 = vadd.f32 %v4410_v33, %v4409_v18  ;;  %v2302_v51 = vadd.f32 %v5072_v36, %v2301_v42 }
 0x337   : > { %v7182_v60 = vpop.eup %5077  ;;  %5097 = vpow2.f32 %v7051_v24  ;;  %v2307_v22 = vadd.f32 %v8262_v35, %v2306_v47  ;;  %v2316_v63 = vadd.f32 %v7065_v28, %v7057_v19  ;;  %v2326_v43 = vadd.f32 %v7127_v29, %v7119_v15 }
 0x338   : > { %v7190_v26 = vpop.eup %5079  ;;  %5099 = vpow2.f32 %v7063_v34  ;;  %3249 = vmatprep.mubr.bf16.mxu1 %v2711_v53  ;;  %v7193_v32 = vadd.f32 %v5074_v45, %v2302_v51  ;;  %v2336_v6 = vadd.f32 %v7182_v60, %v7176_v5 }
 0x339   : > { %v5082_v3 = vpop.eup %5081  ;;  %5101 = vpow2.f32 %v7068_v7  ;;  %v7199_v24 = vadd.f32 %v8263_v61, %v2307_v22  ;;  %v2317_v12 = vadd.f32 %v7074_v58, %v2316_v63  ;;  %v2327_v2 = vadd.f32 %v7133_v44, %v2326_v43 }
 0x33a   : > { %v5084_v25 = vpop.eup %5083  ;;  %5103 = vpow2.f32 %v7070_v20  ;;  %3089 = vmatmul.mubr.bf16.gmra.mrb[92].mxu0 %v2708_v4  ;;  %v4412_v34 = vpop.f32.mrb[68].mxu0  ;;  %v2337_v52 = vadd.f32 %v7190_v26, %v2336_v6 }
 0x33b   : > { %3250 = vmatmul.mubr.bf16.gmra.mrb[108].mxu1 %v2710_v1  ;;  %v5086_v59 = vpop.eup %5085  ;;  %5105 = vpow2.f32 %v7077_v54  ;;  %v2712_v7 = vpack.c.bf16 %v7057_v19, %v5084_v25  ;;  %v4413_v56 = vpop.f32.mrb[69].mxu0  ;;  %v7208_v11 = vadd.f32 %v7084_v14, %v2317_v12  ;;  %v7211_v17 = vadd.f32 %v7144_v62, %v2327_v2 }
 0x33c   : > { %v5088_v47 = vpop.eup %5087  ;;  %v2713_v20 = vpack.c.bf16 %v7065_v28, %v5086_v59  ;;  %v7214_v41 = vadd.f32 %v4413_v56, %v4412_v34  ;;  %v4415_v9 = vpop.f32.mrb[70].mxu0  ;;  %v2311_v4 = vadd.f32 %v5086_v59, %v5084_v25  ;;  %v7216_v55 = vadd.f32 %v5082_v3, %v2337_v52  ;;  %v8269_v59 = vld [vmem:[#allocation83_spill] sm:$0xff] }
 0x33d   : > { %v5090_v16 = vpop.eup %5089  ;;  %v2714_v54 = vpack.c.bf16 %v7074_v58, %v5088_v47  ;;  %v4416_v19 = vpop.f32.mrb[71].mxu0 }
 0x33e   : > { %v5092_v36 = vpop.eup %5091  ;;  %3096 = vmatprep.mubr.bf16.mxu0 %v2713_v20  ;;  %v2715_v0 = vpack.c.bf16 %v7084_v14, %v5090_v16  ;;  %v7220_v18 = vadd.f32 %v4416_v19, %v4415_v9  ;;  %v2312_v42 = vadd.f32 %v5088_v47, %v2311_v4  ;;  %v8271_v47 = vld [vmem:[#allocation84_spill] sm:$0xff]  ;;  %v8273_v19 = vld [vmem:[#allocation79_spill] sm:$0xff] }
 0x33f   : > { %v5094_v45 = vpop.eup %5093  ;;  %v2716_v28 = vpack.c.bf16 %v7119_v15, %v5092_v36 }
 0x340   : > { %v5096_v35 = vpop.eup %5095  ;;  %3257 = vmatprep.mubr.bf16.mxu1 %v2715_v0  ;;  %v2717_v1 = vpack.c.bf16 %v7127_v29, %v5094_v45  ;;  %v2313_v33 = vadd.f32 %v5090_v16, %v2312_v42  ;;  %v2321_v61 = vadd.f32 %v5094_v45, %v5092_v36  ;;  %v8274_v0 = vld [vmem:[#allocation78_spill] sm:$0xff]  ;;  %v8275_v45 = vld [vmem:[#allocation80_spill] sm:$0xff] }
 0x341   : > { %v5098_v53 = vpop.eup %5097  ;;  %v2718_v58 = vpack.c.bf16 %v7133_v44, %v5096_v35 }
 0x342   : > { %v5100_v51 = vpop.eup %5099  ;;  %3097 = vmatmul.mubr.bf16.gmra.mrb[96].mxu0 %v2712_v7  ;;  %v2719_v14 = vpack.c.bf16 %v7144_v62, %v5098_v53  ;;  %v2322_v22 = vadd.f32 %v5096_v35, %v2321_v61  ;;  %v8264_v62 = vld [vmem:[#allocation148_spill] sm:$0xff] }
 0x343   : > { %3258 = vmatmul.mubr.bf16.gmra.mrb[112].mxu1 %v2714_v54  ;;  %v5102_v63 = vpop.eup %5101  ;;  %3104 = vmatprep.mubr.bf16.mxu0 %v2717_v1  ;;  %v2720_v43 = vpack.c.bf16 %v7176_v5, %v5100_v51  ;;  %v8265_v5 = vld [vmem:[#allocation147_spill] sm:$0xff] }
 0x344   : > { %v5104_v15 = vpop.eup %5103  ;;  %3265 = vmatprep.mubr.bf16.mxu1 %v2719_v14  ;;  %v2721_v6 = vpack.c.bf16 %v7182_v60, %v5102_v63  ;;  %v2323_v29 = vadd.f32 %v5098_v53, %v2322_v22  ;;  %v2331_v12 = vadd.f32 %v5102_v63, %v5100_v51  ;;  %v8266_v60 = vld [vmem:[#allocation149_spill] sm:$0xff]  ;;  %v8276_v14 = vld [vmem:[#allocation92_spill] sm:$0xff] }
 0x345   : > { %v5106_v2 = vpop.eup %5105  ;;  %v2722_v25 = vpack.c.bf16 %v7190_v26, %v5104_v15  ;;  %v8267_v26 = vld [vmem:[#allocation150_spill] sm:$0xff] }
 0x346   : > { %v2723_v44 = vpack.c.bf16 %v5082_v3, %v5106_v2  ;;  %v2332_v34 = vadd.f32 %v5104_v15, %v2331_v12  ;;  %v8277_v12 = vld [vmem:[#allocation98_spill] sm:$0xff] }
 0x348   : > { %v2333_v52 = vadd.f32 %v5106_v2, %v2332_v34 }
 0x34a   : > { %3105 = vmatmul.mubr.bf16.gmra.mrb[100].mxu0 %v2716_v28 }
 0x34b   : > { %3266 = vmatmul.mubr.bf16.gmra.mrb[116].mxu1 %v2718_v58  ;;  %3112 = vmatprep.mubr.bf16.mxu0 %v2721_v6 }
 0x34c   : > { %3273 = vmatprep.mubr.bf16.mxu1 %v2723_v44 }
 0x34e   : > { %2239 = vadd.xlane.f32.xlu1 %v8264_v62  ;;  %v8278_v62 = vld [vmem:[#allocation102_spill] sm:$0xff] }
 0x352   : > { %2254 = vadd.xlane.f32.xlu1 %v7108_v48  ;;  %3113 = vmatmul.mubr.bf16.gmra.mrb[104].mxu0 %v2720_v43 }
 0x353   : > { %3274 = vmatmul.mubr.bf16.gmra.mrb[120].mxu1 %v2722_v25  ;;  %2234 = vadd.xlane.f32.xlu0 %v8265_v5  ;;  %v8279_v5 = vld [vmem:[#allocation88_spill] sm:$0xff] }
 0x356   : > { %2264 = vadd.xlane.f32.xlu1 %v7114_v37  ;;  %v8268_v37 = vld [vmem:[#allocation81_spill] sm:$0xff] }
 0x357   : > { %2244 = vadd.xlane.f32.xlu0 %v8266_v60  ;;  %v8280_v60 = vld [vmem:[#allocation87_spill] sm:$0xff] }
 0x35a   : > { %2274 = vadd.xlane.f32.xlu1 %v7117_v13  ;;  %v8270_v13 = vld [vmem:[#allocation82_spill] sm:$0xff] }
 0x35b   : > { %2249 = vadd.xlane.f32.xlu0 %v8267_v26  ;;  %v8281_v26 = vpack.c.bf16 %v8279_v5, %v8280_v60 }
 0x35e   : > { %2284 = vadd.xlane.f32.xlu1 %v7138_v39 }
 0x35f   : > { %2259 = vadd.xlane.f32.xlu0 %v7124_v46 }
 0x362   : > { %2294 = vadd.xlane.f32.xlu1 %v7158_v57 }
 0x363   : > { %2269 = vadd.xlane.f32.xlu0 %v7148_v30 }
 0x366   : > { %2304 = vadd.xlane.f32.xlu1 %v7193_v32 }
 0x367   : > { %2279 = vadd.xlane.f32.xlu0 %v7161_v21 }
 0x368   : > { %v1741_v48 = vpop.permute.xlu1 %1740 }
 0x369   : > { %v1875_v3 = vsub.f32 %v8268_v37, %v1741_v48  ;;  %v1876_v7 = vsub.f32 %v8269_v59, %v1741_v48  ;;  %v1877_v56 = vsub.f32 %v8270_v13, %v1741_v48  ;;  %v1878_v39 = vsub.f32 %v8271_v47, %v1741_v48  ;;  %v8282_v13 = vld [vmem:[#allocation108_spill] sm:$0xff] }
 0x36a   : > { %2314 = vadd.xlane.f32.xlu1 %v2313_v33 }
 0x36b   : > { %v2095_v20 = vmul.f32 1.442695, %v1875_v3  ;;  %v2097_v46 = vmul.f32 1.442695, %v1876_v7  ;;  %2289 = vadd.xlane.f32.xlu0 %v7171_v27  ;;  %v2099_v57 = vmul.f32 1.442695, %v1877_v56 }
 0x36c   : > { %v2101_v30 = vmul.f32 1.442695, %v1878_v39  ;;  %v8272_v27 = vld [vmem:[#allocation77_spill] sm:$0xff]  ;;  %v7254_v28 = vpop.permute.xlu1 %2490  ;;  %v8283_v39 = vld [vmem:[#allocation91_spill] sm:$0xff] }
 0x36d   : > { %5107 = vpow2.f32 %v2095_v20 }
 0x36e   : > { %2324 = vadd.xlane.f32.xlu1 %v2323_v29  ;;  %5109 = vpow2.f32 %v2097_v46  ;;  %v8284_v46 = vld [vmem:[#allocation86_spill] sm:$0xff] }
 0x36f   : > { %2299 = vadd.xlane.f32.xlu0 %v7174_v38  ;;  %5111 = vpow2.f32 %v2099_v57  ;;  %v8285_v57 = vld [vmem:[#allocation85_spill] sm:$0xff] }
 0x370   : > { %5113 = vpow2.f32 %v2101_v30  ;;  %v7258_v58 = vpop.permute.xlu1 %2500  ;;  %v8286_v30 = vpack.c.bf16 %v8284_v46, %v8285_v57  ;;  %v8310_v46 = vld [vmem:[#allocation104_spill] sm:$0xff] }
 0x372   : > { %2334 = vadd.xlane.f32.xlu1 %v2333_v52 }
 0x373   : > { %2309 = vadd.xlane.f32.xlu0 %v7199_v24 }
 0x374   : > { %v7260_v51 = vpop.permute.xlu1 %2505 }
 0x377   : > { %v5108_v21 = vpop.eup %5107  ;;  %2319 = vadd.xlane.f32.xlu0 %v7208_v11 }
 0x378   : > { %v5110_v32 = vpop.eup %5109  ;;  %v7264_v44 = vpop.permute.xlu1 %2515 }
 0x379   : > { %v1736_v9 = vpop.permute.xlu0 %1735  ;;  %v2346_v4 = vadd.f32 %v5110_v32, %v5108_v21  ;;  %v5112_v16 = vpop.eup %5111 }
 0x37a   : > { %v1871_v54 = vsub.f32 %v8272_v27, %v1736_v9  ;;  %v1872_v36 = vsub.f32 %v8273_v19, %v1736_v9  ;;  %v1873_v42 = vsub.f32 %v8274_v0, %v1736_v9  ;;  %v1874_v38 = vsub.f32 %v8275_v45, %v1736_v9  ;;  %v5114_v35 = vpop.eup %5113  ;;  %v8292_v19 = vld [vmem:[#allocation144_spill] sm:$0xff] }
 0x37b   : > { %2329 = vadd.xlane.f32.xlu0 %v7211_v17  ;;  %v2347_v24 = vadd.f32 %v5112_v16, %v2346_v4  ;;  %v8290_v4 = vld [vmem:[#allocation94_spill] sm:$0xff] }
 0x37c   : > { %v2087_v1 = vmul.f32 1.442695, %v1871_v54  ;;  %v2089_v11 = vmul.f32 1.442695, %v1872_v36  ;;  %v2091_v33 = vmul.f32 1.442695, %v1873_v42  ;;  %v7272_v3 = vpop.permute.xlu1 %2525 }
 0x37d   : > { %v2093_v61 = vmul.f32 1.442695, %v1874_v38  ;;  %v2348_v53 = vadd.f32 %v5114_v35, %v2347_v24  ;;  %v7266_v34 = vpop.permute.xlu0 %2495  ;;  %v8291_v54 = vld [vmem:[#allocation142_spill] sm:$0xff] }
 0x37e   : > { %5115 = vpow2.f32 %v2087_v1  ;;  %v8293_v36 = vsub.f32 %v8291_v54, %v8292_v19  ;;  %v8294_v1 = vld [vmem:[#allocation100_spill] sm:$0xff]  ;;  %v8313_v54 = vld [vmem:[#allocation105_spill] sm:$0xff]  ;;  %v8314_v19 = vld [vmem:[#allocation103_spill] sm:$0xff] }
 0x37f   : > { %5117 = vpow2.f32 %v2089_v11  ;;  %2339 = vadd.xlane.f32.xlu0 %v7216_v55 }
 0x380   : > { %5119 = vpow2.f32 %v2091_v33  ;;  %v1619_v0 = vmul.f32 1.442695, %v8293_v36  ;;  %v8315_v36 = vpack.c.bf16 %v8313_v54, %v8314_v19  ;;  %v3725_v54 = vld [vmem:[%s7692_s3] sm:$0x1] }
 0x381   : > { %5121 = vpow2.f32 %v2093_v61  ;;  %v7277_v56 = vpop.permute.xlu0 %2510  ;;  %v8295_v61 = vld [vmem:[#allocation93_spill] sm:$0xff]  ;;  %4697 = vmatprep.subr.msk.bf16.mxu0 %vm3781_vm2, %v3725_v54  ;;  %v3783_v19 = vsel %vm3781_vm2, %v3725_v54, 0 }
 0x382   : > { %5123 = vpow2.f32 %v1619_v0  ;;  %4632 = vmatpush3.bf16.msra.mxu0 %v3783_v19  ;;  %v2169_v19 = vld [vmem:[#allocation3 + $0x10] sm:$0xff] }
 0x383   : > { %2349 = vadd.xlane.f32.xlu0 %v2348_v53  ;;  %v8296_v53 = vld [vmem:[#allocation89_spill] sm:$0xff] }
 0x385   : > { %v7294_v42 = vpop.permute.xlu0 %2520 }
 0x387   : > { %2359 = vadd.xlane.f32.xlu0 %v8276_v14  ;;  %v8297_v14 = vpack.c.bf16 %v8295_v61, %v8296_v53  ;;  %v2456_v53 = vld [vmem:[#allocation4] sm:$0xff] }
 0x388   : > { %v5116_v17 = vpop.eup %5115 }
 0x389   : > { %v5118_v22 = vpop.eup %5117  ;;  %v2724_v63 = vpack.c.bf16 %v5108_v21, %v5116_v17  ;;  %v8287_v21 = vld [vmem:[#allocation95_spill] sm:$0xff] }
 0x38a   : > { %v5120_v43 = vpop.eup %5119  ;;  %v2725_v15 = vpack.c.bf16 %v5110_v32, %v5118_v22  ;;  %v2341_v6 = vadd.f32 %v5118_v22, %v5116_v17  ;;  %v8288_v32 = vld [vmem:[#allocation90_spill] sm:$0xff]  ;;  %v7306_v17 = vpop.permute.xlu0 %2530  ;;  %v8298_v22 = vld [vmem:[#allocation101_spill] sm:$0xff] }
 0x38b   : > { %v5122_v29 = vpop.eup %5121  ;;  %2369 = vadd.xlane.f32.xlu0 %v8277_v12  ;;  %v2726_v2 = vpack.c.bf16 %v5112_v16, %v5120_v43  ;;  %v8289_v9 = vpack.c.bf16 %v8287_v21, %v8288_v32  ;;  %v7289_v16 = vpop.permute.xlu1 %2535  ;;  %v8303_v12 = vld [vmem:[#allocation145_spill] sm:$0xff] }
 0x38c   : > { %3120 = vmatprep.mubr.bf16.mxu0 %v2725_v15  ;;  %v2727_v55 = vpack.c.bf16 %v5114_v35, %v5122_v29  ;;  %v2342_v25 = vadd.f32 %v5120_v43, %v2341_v6  ;;  %v8301_v15 = vld [vmem:[#allocation107_spill] sm:$0xff] }
 0x38d   : > { %3121 = vmatmul.mubr.bf16.gmra.mrb[108].mxu0 %v2724_v63  ;;  %v8299_v63 = vld [vmem:[#allocation97_spill] sm:$0xff] }
 0x38e   : > { %3281 = vmatprep.mubr.bf16.mxu1 %v2727_v55  ;;  %v2343_v52 = vadd.f32 %v5122_v29, %v2342_v25  ;;  %v8300_v43 = vpack.c.bf16 %v8298_v22, %v8299_v63  ;;  %v8302_v29 = vld [vmem:[#allocation143_spill] sm:$0xff] }
 0x38f   : > { %3282 = vmatmul.mubr.bf16.gmra.mrb[124].mxu1 %v2726_v2  ;;  %2379 = vadd.xlane.f32.xlu0 %v8278_v62  ;;  %v7301_v33 = vpop.permute.xlu1 %2545  ;;  %v8304_v2 = vsub.f32 %v8302_v29, %v8303_v12  ;;  %v2648_v29 = vmul.f32 %v7254_v28, %v2456_v53 }
 0x390   : > { %3289 = vmatprep.mubr.bf16.mxu1 %v8281_v26  ;;  %2344 = vadd.xlane.f32.xlu1 %v2343_v52 }
 0x391   : > { %v1621_v55 = vmul.f32 1.442695, %v8304_v2 }
 0x393   : > { %2389 = vadd.xlane.f32.xlu0 %v8282_v13  ;;  %v7317_v60 = vpop.permute.xlu1 %2555  ;;  %5125 = vpow2.f32 %v1621_v55 }
 0x394   : > { %v4478_v48 = vpop.f32.mrb[64].mxu1  ;;  %2354 = vadd.xlane.f32.xlu1 %v8283_v39  ;;  %v8309_v39 = vld [vmem:[#allocation106_spill] sm:$0xff] }
 0x395   : > { %v4479_v37 = vpop.f32.mrb[65].mxu1  ;;  %v8311_v57 = vpack.c.bf16 %v8309_v39, %v8310_v46 }
 0x396   : > { %v7274_v59 = vadd.f32 %v4479_v37, %v4478_v48  ;;  %v4481_v7 = vpop.f32.mrb[66].mxu1  ;;  %v7321_v48 = vpop.permute.xlu0 %2540  ;;  %v8306_v37 = vld [vmem:[#allocation99_spill] sm:$0xff] }
 0x397   : > { %v4482_v47 = vpop.f32.mrb[67].mxu1  ;;  %3290 = vmatmul.mubr.bf16.gmra.mrb[128].mxu1 %v8286_v30  ;;  %v7332_v30 = vpop.permute.xlu1 %2565 }
 0x398   : > { %v7280_v20 = vadd.f32 %v4482_v47, %v4481_v7  ;;  %3297 = vmatprep.mubr.bf16.mxu1 %v8289_v9  ;;  %2364 = vadd.xlane.f32.xlu1 %v8290_v4  ;;  %v8307_v7 = vld [vmem:[#allocation96_spill] sm:$0xff]  ;;  %v7326_v47 = vpop.eup %5123 }
 0x399   : > { %v8308_v13 = vpack.c.bf16 %v8306_v37, %v8307_v7 }
 0x39a   : > { %v7334_v21 = vpop.permute.xlu0 %2550 }
 0x39c   : > { %v4484_v27 = vpop.f32.mrb[68].mxu1  ;;  %2374 = vadd.xlane.f32.xlu1 %v8294_v1 }
 0x39d   : > { %v4485_v45 = vpop.f32.mrb[69].mxu1 }
 0x39e   : > { %v7296_v38 = vadd.f32 %v4485_v45, %v4484_v27  ;;  %v4487_v24 = vpop.f32.mrb[70].mxu1  ;;  %v7341_v45 = vpop.eup %5125 }
 0x39f   : > { %v4488_v35 = vpop.f32.mrb[71].mxu1  ;;  %3298 = vmatmul.mubr.bf16.gmra.mrb[132].mxu1 %v8297_v14  ;;  %v7348_v1 = vpop.permute.xlu0 %2560 }
 0x3a0   : > { %v7299_v11 = vadd.f32 %v4488_v35, %v4487_v24  ;;  %3305 = vmatprep.mubr.bf16.mxu1 %v8300_v43  ;;  %2384 = vadd.xlane.f32.xlu1 %v8301_v15  ;;  %v7345_v35 = vpop.permute.xlu1 %2575  ;;  %v2457_v43 = vld [vmem:[#allocation4 + $0x8] sm:$0xff] }
 0x3a3   : > { %v7353_v12 = vpop.permute.xlu0 %2570 }
 0x3a4   : > { %v4490_v6 = vpop.f32.mrb[72].mxu1  ;;  %v7350_v15 = vpop.permute.xlu1 %2585 }
 0x3a5   : > { %v4491_v25 = vpop.f32.mrb[73].mxu1 }
 0x3a6   : > { %v7315_v52 = vadd.f32 %v4491_v25, %v4490_v6  ;;  %v4493_v62 = vpop.f32.mrb[74].mxu1  ;;  %v2649_v25 = vmul.f32 %v7266_v34, %v2457_v43 }
 0x3a7   : > { %v4494_v5 = vpop.f32.mrb[75].mxu1  ;;  %3306 = vmatmul.mubr.bf16.gmra.mrb[136].mxu1 %v8308_v13  ;;  %v2458_v13 = vld [vmem:[#allocation4 + $0x10] sm:$0xff] }
 0x3a8   : > { %v7319_v26 = vadd.f32 %v4494_v5, %v4493_v62  ;;  %3313 = vmatprep.mubr.bf16.mxu1 %v8311_v57  ;;  %v7359_v39 = vpop.permute.xlu1 %2595  ;;  %v7361_v57 = vpop.permute.xlu0 %2580  ;;  %v2650_v34 = vmul.f32 %v7258_v58, %v2458_v13 }
 0x3a9   : > { %2640 = vperm.xlu0 %4725, %v7326_v47  }
 0x3aa   : > { %8305 = vst [vmem:[#allocation9_spill] sm:$0xff] %v7319_v26 }
 0x3ac   : > { %v7371_v53 = vpop.permute.xlu1 %2605 }
 0x3ae   : > { %v4496_v32 = vpop.f32.mrb[76].mxu1 }
 0x3af   : > { %v4497_v9 = vpop.f32.mrb[77].mxu1  ;;  %3314 = vmatmul.mubr.bf16.gmra.mrb[140].mxu1 %v8315_v36 }
 0x3b0   : > { %v7336_v4 = vadd.f32 %v4497_v9, %v4496_v32  ;;  %v4499_v27 = vpop.f32.mrb[78].mxu1  ;;  %v2459_v32 = vld [vmem:[#allocation4 + $0x18] sm:$0xff]  ;;  %v7377_v58 = vpop.permute.xlu1 %2615 }
 0x3b1   : > { %v4500_v0 = vpop.f32.mrb[79].mxu1  ;;  %2645 = vperm.xlu1 %4726, %v7341_v45   ;;  %v2651_v36 = vmul.f32 %v7260_v51, %v2459_v32 }
 0x3b2   : > { %8312 = vst [vmem:[#allocation11_spill] sm:$0xff] %v7336_v4  ;;  %v7343_v24 = vadd.f32 %v4500_v0, %v4499_v27 }
 0x3b4   : > { %8316 = vst [vmem:[#allocation10_spill] sm:$0xff] %v7343_v24 }
 0x3b6   : > { %v4518_v61 = vpop.f32.mrb[80].mxu1 }
 0x3b7   : > { %v4519_v14 = vpop.f32.mrb[81].mxu1 }
 0x3b8   : > { %v4520_v22 = vadd.f32 %v4519_v14, %v4518_v61  ;;  %v4521_v63 = vpop.f32.mrb[82].mxu1  ;;  %v7373_v14 = vpop.permute.xlu0 %2590 }
 0x3b9   : > { %v4522_v6 = vpop.f32.mrb[83].mxu1 }
 0x3ba   : > { %v3196_v2 = vadd.f32 %v4520_v22, %v7165_v23  ;;  %v4523_v55 = vadd.f32 %v4522_v6, %v4521_v63  ;;  %v7381_v63 = vpop.permute.xlu1 %2625  ;;  %v2168_v6 = vld [vmem:[#allocation3 + $0x8] sm:$0xff] }
 0x3bc   : > { %v3322_v62 = vadd.f32 %v3196_v2, %v2648_v29  ;;  %v3199_v5 = vadd.f32 %v4523_v55, %v7180_v40  ;;  %v7379_v22 = vpop.permute.xlu0 %2600  ;;  %v8317_v29 = vld [vmem:[#allocation111_spill] sm:$0xff] }
 0x3bd   : > { %v2200_v2 = vmul.f32 %v8317_v29, %v2168_v6 }
 0x3be   : > { %3354 = vst.msk [vmem:[#allocation4] sm:$0xff] %vm403_vm0, %v3322_v62  ;;  %v3323_v37 = vadd.f32 %v3199_v5, %v2649_v25  ;;  %v4524_v7 = vpop.f32.mrb[84].mxu1  ;;  %v7385_v43 = vpop.permute.xlu1 %2635  ;;  %v2171_v25 = vld [vmem:[#allocation3 + $0x20] sm:$0xff] }
 0x3bf   : > { %v4525_v46 = vpop.f32.mrb[85].mxu1 }
 0x3c0   : > { %3355 = vst.msk [vmem:[#allocation4 + $0x8] sm:$0xff] %vm403_vm0, %v3323_v37  ;;  %v4526_v28 = vadd.f32 %v4525_v46, %v4524_v7  ;;  %v4527_v23 = vpop.f32.mrb[86].mxu1  ;;  %v7383_v51 = vpop.permute.xlu0 %2610  ;;  %v2167_v37 = vld [vmem:[#allocation3] sm:$0xff]  ;;  %v8318_v7 = vld [vmem:[#allocation110_spill] sm:$0xff] }
 0x3c1   : > { %v4528_v9 = vpop.f32.mrb[87].mxu1  ;;  %v2203_v13 = vmul.f32 %v8318_v7, %v2171_v25 }
 0x3c2   : > { %v3204_v40 = vadd.f32 %v4526_v28, %v7214_v41  ;;  %v4529_v27 = vadd.f32 %v4528_v9, %v4527_v23  ;;  %v8319_v28 = vld [vmem:[#allocation109_spill] sm:$0xff] }
 0x3c3   : > { %v2199_v23 = vmul.f32 %v8319_v28, %v2167_v37  ;;  %v8321_v28 = vld [vmem:[#allocation115_spill] sm:$0xff] }
 0x3c4   : > { %v3324_v0 = vadd.f32 %v3204_v40, %v2650_v34  ;;  %v3207_v61 = vadd.f32 %v4529_v27, %v7220_v18  ;;  %v7387_v18 = vpop.permute.xlu0 %2620  ;;  %v2460_v34 = vld [vmem:[#allocation4 + $0x20] sm:$0xff] }
 0x3c5   : > { %v2652_v25 = vmul.f32 %v7277_v56, %v2460_v34 }
 0x3c6   : > { %3356 = vst.msk [vmem:[#allocation4 + $0x10] sm:$0xff] %vm403_vm0, %v3324_v0  ;;  %v3325_v41 = vadd.f32 %v3207_v61, %v2651_v36  ;;  %v2173_v36 = vld [vmem:[#allocation3 + $0x30] sm:$0xff] }
 0x3c8   : > { %3357 = vst.msk [vmem:[#allocation4 + $0x18] sm:$0xff] %vm403_vm0, %v3325_v41  ;;  %v7390_v5 = vpop.permute.xlu0 %2630 }
 0x3db   : > { %v2240_v55 = vpop.xlane.xlu1 %2239 }
 0x3dc   : > { %v2392_v62 = vadd.f32 %v2240_v55, %v2200_v2  ;;  %v2461_v55 = vld [vmem:[#allocation4 + $0x28] sm:$0xff] }
 0x3dd   : > { %v2653_v26 = vmul.f32 %v7264_v44, %v2461_v55  ;;  %v2177_v55 = vld [vmem:[#allocation3 + $0x50] sm:$0xff] }
 0x3de   : > { %2425 = vst.msk [vmem:[#allocation3 + $0x8] sm:$0xff] %vm338_vm1, %v2392_v62 }
 0x3df   : > { %v2255_v46 = vpop.xlane.xlu1 %2254 }
 0x3e0   : > { %v2395_v32 = vadd.f32 %v2255_v46, %v2203_v13  ;;  %v2235_v9 = vpop.xlane.xlu0 %2234  ;;  %v8320_v13 = vld [vmem:[#allocation113_spill] sm:$0xff] }
 0x3e1   : > { %v4418_v40 = vpop.f32.mrb[72].mxu0  ;;  %v2391_v54 = vadd.f32 %v2235_v9, %v2199_v23  ;;  %v2201_v46 = vmul.f32 %v8320_v13, %v2169_v19  ;;  %v2205_v23 = vmul.f32 %v8321_v28, %v2173_v36  ;;  %v8322_v19 = vld [vmem:[#allocation114_spill] sm:$0xff] }
 0x3e2   : > { %v4530_v27 = vpop.f32.mrb[88].mxu1  ;;  %2428 = vst.msk [vmem:[#allocation3 + $0x20] sm:$0xff] %vm338_vm1, %v2395_v32  ;;  %v4419_v0 = vpop.f32.mrb[73].mxu0 }
 0x3e3   : > { %v4531_v61 = vpop.f32.mrb[89].mxu1  ;;  %v4420_v41 = vadd.f32 %v4419_v0, %v4418_v40  ;;  %v4421_v29 = vpop.f32.mrb[74].mxu0  ;;  %2424 = vst.msk [vmem:[#allocation3] sm:$0xff] %vm338_vm1, %v2391_v54  ;;  %v2170_v0 = vld [vmem:[#allocation3 + $0x18] sm:$0xff] }
 0x3e4   : > { %v4532_v6 = vadd.f32 %v4531_v61, %v4530_v27  ;;  %v4533_v2 = vpop.f32.mrb[90].mxu1  ;;  %v4422_v37 = vpop.f32.mrb[75].mxu0  ;;  %v2175_v61 = vld [vmem:[#allocation3 + $0x40] sm:$0xff]  ;;  %v2202_v36 = vmul.f32 %v8322_v19, %v2170_v0  ;;  %v2463_v0 = vld [vmem:[#allocation4 + $0x38] sm:$0xff] }
 0x3e5   : > { %v3454_v62 = vld [vmem:[#allocation3 + $0x8] sm:$0xff]  ;;  %v4534_v7 = vpop.f32.mrb[91].mxu1  ;;  %v4423_v9 = vadd.f32 %v4422_v37, %v4421_v29  ;;  %v2245_v40 = vpop.xlane.xlu0 %2244 }
 0x3e6   : > { %v3212_v32 = vadd.f32 %v4532_v6, %v4420_v41  ;;  %5127 = vrcp.f32 %v3454_v62  ;;  %v4535_v24 = vadd.f32 %v4534_v7, %v4533_v2  ;;  %v2265_v27 = vpop.xlane.xlu1 %2264  ;;  %v2393_v4 = vadd.f32 %v2245_v40, %v2201_v46  ;;  %v8323_v41 = vld [vmem:[#allocation117_spill] sm:$0xff] }
 0x3e7   : > { %v2397_v54 = vadd.f32 %v2265_v27, %v2205_v23  ;;  %v2207_v6 = vmul.f32 %v8323_v41, %v2175_v61 }
 0x3e8   : > { %v3326_v56 = vadd.f32 %v3212_v32, %v2652_v25  ;;  %v3215_v34 = vadd.f32 %v4535_v24, %v4423_v9  ;;  %2426 = vst.msk [vmem:[#allocation3 + $0x10] sm:$0xff] %vm338_vm1, %v2393_v4  ;;  %v2172_v24 = vld [vmem:[#allocation3 + $0x28] sm:$0xff]  ;;  %v2462_v25 = vld [vmem:[#allocation4 + $0x30] sm:$0xff] }
 0x3e9   : > { %2430 = vst.msk [vmem:[#allocation3 + $0x30] sm:$0xff] %vm338_vm1, %v2397_v54  ;;  %v2250_v2 = vpop.xlane.xlu0 %2249  ;;  %v3457_v61 = vld [vmem:[#allocation3 + $0x20] sm:$0xff] }
 0x3ea   : > { %3358 = vst.msk [vmem:[#allocation4 + $0x20] sm:$0xff] %vm403_vm0, %v3326_v56  ;;  %v3327_v29 = vadd.f32 %v3215_v34, %v2653_v26  ;;  %v2275_v62 = vpop.xlane.xlu1 %2274  ;;  %v3453_v37 = vld [vmem:[#allocation3] sm:$0xff]  ;;  %v2394_v7 = vadd.f32 %v2250_v2, %v2202_v36  ;;  %v8324_v34 = vld [vmem:[#allocation112_spill] sm:$0xff]  ;;  %v8325_v36 = vld [vmem:[#allocation119_spill] sm:$0xff] }
 0x3eb   : > { %v2399_v13 = vadd.f32 %v2275_v62, %v2207_v6  ;;  %5129 = vrcp.f32 %v3453_v37  ;;  %v2204_v19 = vmul.f32 %v8324_v34, %v2172_v24  ;;  %v2209_v41 = vmul.f32 %v8325_v36, %v2177_v55  ;;  %v2465_v34 = vld [vmem:[#allocation4 + $0x48] sm:$0xff] }
 0x3ec   : > { %3359 = vst.msk [vmem:[#allocation4 + $0x28] sm:$0xff] %vm403_vm0, %v3327_v29  ;;  %v2654_v6 = vmul.f32 %v7294_v42, %v2462_v25 }
 0x3ed   : > { %2427 = vst.msk [vmem:[#allocation3 + $0x18] sm:$0xff] %vm338_vm1, %v2394_v7  ;;  %2432 = vst.msk [vmem:[#allocation3 + $0x40] sm:$0xff] %vm338_vm1, %v2399_v13  ;;  %v4424_v44 = vpop.f32.mrb[76].mxu0  ;;  %v2260_v37 = vpop.xlane.xlu0 %2259 }
 0x3ee   : > { %v4536_v4 = vpop.f32.mrb[92].mxu1  ;;  %v4425_v46 = vpop.f32.mrb[77].mxu0  ;;  %v2396_v13 = vadd.f32 %v2260_v37, %v2204_v19 }
 0x3ef   : > { %v4537_v28 = vpop.f32.mrb[93].mxu1  ;;  %v4426_v23 = vadd.f32 %v4425_v46, %v4424_v44  ;;  %v4427_v9 = vpop.f32.mrb[78].mxu0  ;;  %v3455_v27 = vld [vmem:[#allocation3 + $0x10] sm:$0xff] }
 0x3f0   : > { %v5128_v26 = vpop.eup %5127  ;;  %v4538_v32 = vadd.f32 %v4537_v28, %v4536_v4  ;;  %v4539_v40 = vpop.f32.mrb[94].mxu1  ;;  %5131 = vrcp.f32 %v3455_v27  ;;  %v2655_v4 = vmul.f32 %v7272_v3, %v2463_v0  ;;  %2429 = vst.msk [vmem:[#allocation3 + $0x28] sm:$0xff] %vm338_vm1, %v2396_v13  ;;  %v3459_v42 = vld [vmem:[#allocation3 + $0x30] sm:$0xff] }
 0x3f1   : > { %v4428_v54 = vpop.f32.mrb[79].mxu0  ;;  %v4540_v56 = vpop.f32.mrb[95].mxu1  ;;  %3524 = vperm.xlu1 %4726, %v5128_v26   ;;  %5133 = vrcp.f32 %v3457_v61 }
 0x3f2   : > { %v3220_v29 = vadd.f32 %v4538_v32, %v4426_v23  ;;  %v4429_v2 = vadd.f32 %v4428_v54, %v4427_v9  ;;  %v4541_v62 = vadd.f32 %v4540_v56, %v4539_v40  ;;  %v2285_v7 = vpop.xlane.xlu1 %2284  ;;  %v2174_v23 = vld [vmem:[#allocation3 + $0x38] sm:$0xff]  ;;  %v2179_v32 = vld [vmem:[#allocation3 + $0x60] sm:$0xff] }
 0x3f3   : > { %v2401_v44 = vadd.f32 %v2285_v7, %v2209_v41  ;;  %v2464_v9 = vld [vmem:[#allocation4 + $0x40] sm:$0xff] }
 0x3f4   : > { %v3328_v46 = vadd.f32 %v3220_v29, %v2654_v6  ;;  %v3223_v28 = vadd.f32 %v4541_v62, %v4429_v2  ;;  %v3456_v27 = vld [vmem:[#allocation3 + $0x18] sm:$0xff]  ;;  %v3461_v19 = vld [vmem:[#allocation3 + $0x40] sm:$0xff]  ;;  %v2656_v37 = vmul.f32 %v7306_v17, %v2464_v9  ;;  %v2181_v17 = vld [vmem:[#allocation3 + $0x70] sm:$0xff] }
 0x3f5   : > { %5135 = vrcp.f32 %v3456_v27  ;;  %2434 = vst.msk [vmem:[#allocation3 + $0x50] sm:$0xff] %vm338_vm1, %v2401_v44  ;;  %v5130_v24 = vpop.eup %5129  ;;  %v4430_v25 = vpop.f32.mrb[80].mxu0  ;;  %v8326_v6 = vld [vmem:[#allocation116_spill] sm:$0xff]  ;;  %v8327_v2 = vld [vmem:[#allocation121_spill] sm:$0xff] }
 0x3f6   : > { %3360 = vst.msk [vmem:[#allocation4 + $0x30] sm:$0xff] %vm403_vm0, %v3328_v46  ;;  %v3329_v55 = vadd.f32 %v3223_v28, %v2655_v4  ;;  %v4542_v26 = vpop.f32.mrb[96].mxu1  ;;  %v4431_v3 = vpop.f32.mrb[81].mxu0  ;;  %3519 = vperm.xlu0 %4725, %v5130_v24   ;;  %5137 = vrcp.f32 %v3459_v42  ;;  %v2206_v29 = vmul.f32 %v8326_v6, %v2174_v23  ;;  %v2211_v62 = vmul.f32 %v8327_v2, %v2179_v32  ;;  %v8329_v2 = vld [vmem:[#allocation123_spill] sm:$0xff] }
 0x3f7   : > { %v4543_v40 = vpop.f32.mrb[97].mxu1  ;;  %v4432_v0 = vadd.f32 %v4431_v3, %v4430_v25  ;;  %v4433_v54 = vpop.f32.mrb[82].mxu0  ;;  %5139 = vrcp.f32 %v3461_v19  ;;  %v3458_v25 = vld [vmem:[#allocation3 + $0x28] sm:$0xff] }
 0x3f8   : > { %3361 = vst.msk [vmem:[#allocation4 + $0x38] sm:$0xff] %vm403_vm0, %v3329_v55  ;;  %v4544_v61 = vadd.f32 %v4543_v40, %v4542_v26  ;;  %v4545_v56 = vpop.f32.mrb[98].mxu1  ;;  %v4434_v36 = vpop.f32.mrb[83].mxu0  ;;  %v2657_v55 = vmul.f32 %v7289_v16, %v2465_v34  ;;  %v2176_v3 = vld [vmem:[#allocation3 + $0x48] sm:$0xff]  ;;  %5141 = vrcp.f32 %v3458_v25 }
 0x3f9   : > { %v4546_v41 = vpop.f32.mrb[99].mxu1  ;;  %v4435_v13 = vadd.f32 %v4434_v36, %v4433_v54  ;;  %v2270_v4 = vpop.xlane.xlu0 %2269  ;;  %v8328_v34 = vld [vmem:[#allocation118_spill] sm:$0xff] }
 0x3fa   : > { %v3228_v7 = vadd.f32 %v4544_v61, %v4432_v0  ;;  %v4547_v44 = vadd.f32 %v4546_v41, %v4545_v56  ;;  %v2295_v46 = vpop.xlane.xlu1 %2294  ;;  %v5132_v28 = vpop.eup %5131  ;;  %v2398_v27 = vadd.f32 %v2270_v4, %v2206_v29  ;;  %v2466_v61 = vld [vmem:[#allocation4 + $0x50] sm:$0xff]  ;;  %v2208_v19 = vmul.f32 %v8328_v34, %v2176_v3  ;;  %v2183_v4 = vld [vmem:[#allocation3 + $0x80] sm:$0xff] }
 0x3fb   : > { %v2403_v24 = vadd.f32 %v2295_v46, %v2211_v62  ;;  %3529 = vperm.xlu0 %4725, %v5132_v28   ;;  %v5134_v23 = vpop.eup %5133  ;;  %v2213_v62 = vmul.f32 %v8329_v2, %v2181_v17  ;;  %v2467_v46 = vld [vmem:[#allocation4 + $0x58] sm:$0xff]  ;;  %v2658_v28 = vmul.f32 %v7321_v48, %v2466_v61  ;;  %v2180_v48 = vld [vmem:[#allocation3 + $0x68] sm:$0xff] }
 0x3fc   : > { %v3330_v42 = vadd.f32 %v3228_v7, %v2656_v37  ;;  %v3231_v26 = vadd.f32 %v4547_v44, %v4435_v13  ;;  %2431 = vst.msk [vmem:[#allocation3 + $0x38] sm:$0xff] %vm338_vm1, %v2398_v27  ;;  %v3463_v32 = vld [vmem:[#allocation3 + $0x50] sm:$0xff]  ;;  %v2178_v37 = vld [vmem:[#allocation3 + $0x58] sm:$0xff]  ;;  %v2659_v61 = vmul.f32 %v7301_v33, %v2467_v46  ;;  %v8332_v33 = vld [vmem:[#allocation122_spill] sm:$0xff] }
 0x3fd   : > { %2436 = vst.msk [vmem:[#allocation3 + $0x60] sm:$0xff] %vm338_vm1, %v2403_v24  ;;  %v4436_v40 = vpop.f32.mrb[84].mxu0  ;;  %v2280_v6 = vpop.xlane.xlu0 %2279  ;;  %5143 = vrcp.f32 %v3463_v32  ;;  %v8330_v17 = vld [vmem:[#allocation120_spill] sm:$0xff] }
 0x3fe   : > { %3362 = vst.msk [vmem:[#allocation4 + $0x40] sm:$0xff] %vm403_vm0, %v3330_v42  ;;  %v3331_v9 = vadd.f32 %v3231_v26, %v2657_v55  ;;  %v4548_v0 = vpop.f32.mrb[100].mxu1  ;;  %v4437_v54 = vpop.f32.mrb[85].mxu0  ;;  %v2400_v7 = vadd.f32 %v2280_v6, %v2208_v19 }
 0x3ff   : > { %v5136_v16 = vpop.eup %5135  ;;  %v4549_v56 = vpop.f32.mrb[101].mxu1  ;;  %v4438_v36 = vadd.f32 %v4437_v54, %v4436_v40  ;;  %3539 = vperm.xlu0 %4725, %v5134_v23  }
 0x400   : > { %3363 = vst.msk [vmem:[#allocation4 + $0x48] sm:$0xff] %vm403_vm0, %v3331_v9  ;;  %v4550_v41 = vadd.f32 %v4549_v56, %v4548_v0  ;;  %v4439_v29 = vpop.f32.mrb[86].mxu0  ;;  %3534 = vperm.xlu1 %4726, %v5136_v16   ;;  %v4551_v13 = vpop.f32.mrb[102].mxu1  ;;  %v2210_v9 = vmul.f32 %v8330_v17, %v2178_v37  ;;  %v8331_v16 = vld [vmem:[#allocation125_spill] sm:$0xff] }
 0x401   : > { %v2305_v44 = vpop.xlane.xlu1 %2304  ;;  %v4440_v55 = vpop.f32.mrb[87].mxu0  ;;  %2433 = vst.msk [vmem:[#allocation3 + $0x48] sm:$0xff] %vm338_vm1, %v2400_v7  ;;  %v2215_v54 = vmul.f32 %v8331_v16, %v2183_v4  ;;  %v2468_v37 = vld [vmem:[#allocation4 + $0x60] sm:$0xff]  ;;  %v2212_v4 = vmul.f32 %v8332_v33, %v2180_v48 }
 0x402   : > { %v3236_v27 = vadd.f32 %v4550_v41, %v4438_v36  ;;  %v2405_v24 = vadd.f32 %v2305_v44, %v2213_v62  ;;  %v4552_v42 = vpop.f32.mrb[103].mxu1  ;;  %v5138_v25 = vpop.eup %5137  ;;  %v4441_v26 = vadd.f32 %v4440_v55, %v4439_v29  ;;  %v2185_v36 = vld [vmem:[#allocation3 + $0x90] sm:$0xff]  ;;  %v8333_v55 = vld [vmem:[#allocation137_spill] sm:$0xff] }
 0x403   : > { %v4553_v3 = vadd.f32 %v4552_v42, %v4551_v13  ;;  %v3460_v23 = vld [vmem:[#allocation3 + $0x38] sm:$0xff]  ;;  %v2290_v0 = vpop.xlane.xlu0 %2289  ;;  %3549 = vperm.xlu0 %4725, %v5138_v25   ;;  %v5140_v41 = vpop.eup %5139  ;;  %v2217_v42 = vmul.f32 %v8333_v55, %v2185_v36  ;;  %v2187_v17 = vld [vmem:[#allocation3 + $0xa0] sm:$0xff] }
 0x404   : > { %v3465_v32 = vld [vmem:[#allocation3 + $0x60] sm:$0xff]  ;;  %v3332_v40 = vadd.f32 %v3236_v27, %v2658_v28  ;;  %2438 = vst.msk [vmem:[#allocation3 + $0x70] sm:$0xff] %vm338_vm1, %v2405_v24  ;;  %5145 = vrcp.f32 %v3460_v23  ;;  %v2402_v34 = vadd.f32 %v2290_v0, %v2210_v9  ;;  %v5142_v62 = vpop.eup %5141  ;;  %v2469_v9 = vld [vmem:[#allocation4 + $0x68] sm:$0xff]  ;;  %v2660_v23 = vmul.f32 %v7334_v21, %v2468_v37  ;;  %v8335_v21 = vld [vmem:[#allocation131_spill] sm:$0xff] }
 0x405   : > { %v3239_v56 = vadd.f32 %v4553_v3, %v4441_v26  ;;  %v2315_v19 = vpop.xlane.xlu1 %2314  ;;  %5147 = vrcp.f32 %v3465_v32  ;;  %v4442_v29 = vpop.f32.mrb[88].mxu0  ;;  %3544 = vperm.xlu1 %4726, %v5142_v62   ;;  %v2182_v3 = vld [vmem:[#allocation3 + $0x78] sm:$0xff] }
 0x406   : > { %3364 = vst.msk [vmem:[#allocation4 + $0x50] sm:$0xff] %vm403_vm0, %v3332_v40  ;;  %v2407_v6 = vadd.f32 %v2315_v19, %v2215_v54  ;;  %v4554_v2 = vpop.f32.mrb[104].mxu1  ;;  %v4443_v13 = vpop.f32.mrb[89].mxu0 }
 0x407   : > { %v3333_v7 = vadd.f32 %v3239_v56, %v2659_v61  ;;  %2435 = vst.msk [vmem:[#allocation3 + $0x58] sm:$0xff] %vm338_vm1, %v2402_v34  ;;  %v4555_v44 = vpop.f32.mrb[105].mxu1  ;;  %v4444_v46 = vadd.f32 %v4443_v13, %v4442_v29  ;;  %v4445_v27 = vpop.f32.mrb[90].mxu0  ;;  %3559 = vperm.xlu0 %4725, %v5140_v41   ;;  %v8334_v41 = vld [vmem:[#allocation124_spill] sm:$0xff]  ;;  %v2219_v29 = vmul.f32 %v8335_v21, %v2187_v17  ;;  %v2184_v13 = vld [vmem:[#allocation3 + $0x88] sm:$0xff] }
 0x408   : > { %2440 = vst.msk [vmem:[#allocation3 + $0x80] sm:$0xff] %vm338_vm1, %v2407_v6  ;;  %v4556_v28 = vadd.f32 %v4555_v44, %v4554_v2  ;;  %v4557_v24 = vpop.f32.mrb[106].mxu1  ;;  %v2300_v25 = vpop.xlane.xlu0 %2299  ;;  %v3462_v32 = vld [vmem:[#allocation3 + $0x48] sm:$0xff]  ;;  %v2214_v6 = vmul.f32 %v8334_v41, %v2182_v3  ;;  %v2661_v2 = vmul.f32 %v7317_v60, %v2469_v9 }
 0x409   : > { %3365 = vst.msk [vmem:[#allocation4 + $0x58] sm:$0xff] %vm403_vm0, %v3333_v7  ;;  %v2325_v26 = vpop.xlane.xlu1 %2324  ;;  %v2404_v0 = vadd.f32 %v2300_v25, %v2212_v4  ;;  %v4446_v54 = vpop.f32.mrb[91].mxu0  ;;  %5149 = vrcp.f32 %v3462_v32  ;;  %v8336_v32 = vld [vmem:[#allocation128_spill] sm:$0xff] }
 0x40a   : > { %v3244_v40 = vadd.f32 %v4556_v28, %v4444_v46  ;;  %v2409_v16 = vadd.f32 %v2325_v26, %v2217_v42  ;;  %v4558_v48 = vpop.f32.mrb[107].mxu1  ;;  %v5144_v61 = vpop.eup %5143  ;;  %v4447_v34 = vadd.f32 %v4446_v54, %v4445_v27  ;;  %v2186_v54 = vld [vmem:[#allocation3 + $0x98] sm:$0xff] }
 0x40b   : > { %v3467_v56 = vld [vmem:[#allocation3 + $0x70] sm:$0xff]  ;;  %v4559_v19 = vadd.f32 %v4558_v48, %v4557_v24  ;;  %2437 = vst.msk [vmem:[#allocation3 + $0x68] sm:$0xff] %vm338_vm1, %v2404_v0  ;;  %3569 = vperm.xlu0 %4725, %v5144_v61   ;;  %v2471_v48 = vld [vmem:[#allocation4 + $0x78] sm:$0xff] }
 0x40c   : > { %5151 = vrcp.f32 %v3467_v56  ;;  %v3334_v36 = vadd.f32 %v3244_v40, %v2660_v23  ;;  %2442 = vst.msk [vmem:[#allocation3 + $0x90] sm:$0xff] %vm338_vm1, %v2409_v16  ;;  %v2310_v37 = vpop.xlane.xlu0 %2309  ;;  %v2470_v24 = vld [vmem:[#allocation4 + $0x70] sm:$0xff]  ;;  %v2216_v40 = vmul.f32 %v8336_v32, %v2184_v13 }
 0x40d   : > { %v3247_v62 = vadd.f32 %v4559_v19, %v4447_v34  ;;  %v2335_v7 = vpop.xlane.xlu1 %2334  ;;  %v2406_v33 = vadd.f32 %v2310_v37, %v2214_v6  ;;  %v4448_v46 = vpop.f32.mrb[92].mxu0  ;;  %v2662_v61 = vmul.f32 %v7348_v1, %v2470_v24  ;;  %v2188_v1 = vld [vmem:[#allocation3 + $0xa8] sm:$0xff] }
 0x40e   : > { %v3464_v44 = vld [vmem:[#allocation3 + $0x58] sm:$0xff]  ;;  %3366 = vst.msk [vmem:[#allocation4 + $0x60] sm:$0xff] %vm403_vm0, %v3334_v36  ;;  %v2411_v4 = vadd.f32 %v2335_v7, %v2219_v29  ;;  %v4560_v28 = vpop.f32.mrb[108].mxu1  ;;  %v5146_v27 = vpop.eup %5145  ;;  %v2663_v7 = vmul.f32 %v7332_v30, %v2471_v48  ;;  %v2473_v48 = vld [vmem:[#allocation4 + $0x88] sm:$0xff] }
 0x40f   : > { %5153 = vrcp.f32 %v3464_v44  ;;  %v3469_v55 = vld [vmem:[#allocation3 + $0x80] sm:$0xff]  ;;  %v3335_v42 = vadd.f32 %v3247_v62, %v2661_v2  ;;  %v4449_v25 = vpop.f32.mrb[93].mxu0  ;;  %v4561_v26 = vpop.f32.mrb[109].mxu1  ;;  %2439 = vst.msk [vmem:[#allocation3 + $0x78] sm:$0xff] %vm338_vm1, %v2406_v33  ;;  %3554 = vperm.xlu1 %4726, %v5146_v27   ;;  %v8337_v2 = vld [vmem:[#allocation130_spill] sm:$0xff] }
 0x410   : > { %v5148_v3 = vpop.eup %5147  ;;  %5155 = vrcp.f32 %v3469_v55  ;;  %2444 = vst.msk [vmem:[#allocation3 + $0xa0] sm:$0xff] %vm338_vm1, %v2411_v4  ;;  %v4450_v60 = vadd.f32 %v4449_v25, %v4448_v46  ;;  %v4562_v17 = vadd.f32 %v4561_v26, %v4560_v28  ;;  %v4451_v9 = vpop.f32.mrb[94].mxu0  ;;  %v2218_v62 = vmul.f32 %v8337_v2, %v2186_v54  ;;  %v2472_v27 = vld [vmem:[#allocation4 + $0x80] sm:$0xff] }
 0x411   : > { %v4563_v23 = vpop.f32.mrb[110].mxu1  ;;  %3367 = vst.msk [vmem:[#allocation4 + $0x68] sm:$0xff] %vm403_vm0, %v3335_v42  ;;  %v2320_v0 = vpop.xlane.xlu0 %2319  ;;  %3579 = vperm.xlu0 %4725, %v5148_v3  }
 0x412   : > { %v4452_v16 = vpop.f32.mrb[95].mxu0  ;;  %v3252_v56 = vadd.f32 %v4562_v17, %v4450_v60  ;;  %v2408_v34 = vadd.f32 %v2320_v0, %v2216_v40  ;;  %v4564_v36 = vpop.f32.mrb[111].mxu1  ;;  %v3466_v41 = vld [vmem:[#allocation3 + $0x68] sm:$0xff] }
 0x413   : > { %v4453_v19 = vadd.f32 %v4452_v16, %v4451_v9  ;;  %v3471_v6 = vld [vmem:[#allocation3 + $0x90] sm:$0xff]  ;;  %v4565_v21 = vadd.f32 %v4564_v36, %v4563_v23  ;;  %5157 = vrcp.f32 %v3466_v41  ;;  %v5150_v37 = vpop.eup %5149  ;;  %v8338_v9 = vld [vmem:[#allocation132_spill] sm:$0xff] }
 0x414   : > { %v3336_v29 = vadd.f32 %v3252_v56, %v2662_v61  ;;  %2441 = vst.msk [vmem:[#allocation3 + $0x88] sm:$0xff] %vm338_vm1, %v2408_v34  ;;  %5159 = vrcp.f32 %v3471_v6  ;;  %3564 = vperm.xlu1 %4726, %v5150_v37   ;;  %v2220_v23 = vmul.f32 %v8338_v9, %v2188_v1  ;;  %v2190_v16 = vld [vmem:[#allocation3 + $0xb8] sm:$0xff]  ;;  %v2664_v61 = vmul.f32 %v7353_v12, %v2472_v27 }
 0x415   : > { %v3255_v13 = vadd.f32 %v4565_v21, %v4453_v19  ;;  %v2330_v44 = vpop.xlane.xlu0 %2329  ;;  %v4454_v46 = vpop.f32.mrb[96].mxu0 }
 0x416   : > { %v5152_v33 = vpop.eup %5151  ;;  %3368 = vst.msk [vmem:[#allocation4 + $0x70] sm:$0xff] %vm403_vm0, %v3336_v29  ;;  %v2410_v4 = vadd.f32 %v2330_v44, %v2218_v62  ;;  %v4566_v28 = vpop.f32.mrb[112].mxu1  ;;  %v3468_v24 = vld [vmem:[#allocation3 + $0x78] sm:$0xff]  ;;  %v8339_v29 = vld [vmem:[#allocation133_spill] sm:$0xff]  ;;  %v2665_v62 = vmul.f32 %v7345_v35, %v2473_v48 }
 0x417   : > { %v3473_v55 = vld [vmem:[#allocation3 + $0xa0] sm:$0xff]  ;;  %v3337_v42 = vadd.f32 %v3255_v13, %v2663_v7  ;;  %v4455_v25 = vpop.f32.mrb[97].mxu0  ;;  %v4567_v26 = vpop.f32.mrb[113].mxu1  ;;  %3589 = vperm.xlu0 %4725, %v5152_v33   ;;  %5161 = vrcp.f32 %v3468_v24  ;;  %v2222_v2 = vmul.f32 %v8339_v29, %v2190_v16  ;;  %v2192_v13 = vld [vmem:[#allocation3 + $0xc8] sm:$0xff]  ;;  %v8341_v29 = vld [vmem:[#allocation127_spill] sm:$0xff] }
 0x418   : > { %2443 = vst.msk [vmem:[#allocation3 + $0x98] sm:$0xff] %vm338_vm1, %v2410_v4  ;;  %v4456_v30 = vadd.f32 %v4455_v25, %v4454_v46  ;;  %v4568_v3 = vadd.f32 %v4567_v26, %v4566_v28  ;;  %v4457_v60 = vpop.f32.mrb[98].mxu0  ;;  %v4569_v17 = vpop.f32.mrb[114].mxu1  ;;  %5163 = vrcp.f32 %v3473_v55  ;;  %v2189_v4 = vld [vmem:[#allocation3 + $0xb0] sm:$0xff] }
 0x419   : > { %v5154_v32 = vpop.eup %5153  ;;  %3369 = vst.msk [vmem:[#allocation4 + $0x78] sm:$0xff] %vm403_vm0, %v3337_v42  ;;  %v2340_v40 = vpop.xlane.xlu0 %2339  ;;  %v2474_v28 = vld [vmem:[#allocation4 + $0x90] sm:$0xff] }
 0x41a   : > { %v4458_v0 = vpop.f32.mrb[99].mxu0  ;;  %v5156_v54 = vpop.eup %5155  ;;  %v3260_v56 = vadd.f32 %v4568_v3, %v4456_v30  ;;  %v2412_v34 = vadd.f32 %v2340_v40, %v2220_v23  ;;  %3574 = vperm.xlu1 %4726, %v5154_v32   ;;  %v8340_v3 = vld [vmem:[#allocation129_spill] sm:$0xff]  ;;  %v2194_v23 = vld [vmem:[#allocation3 + $0xd8] sm:$0xff]  ;;  %v2221_v32 = vmul.f32 %v6816_v8, %v2189_v4  ;;  %v2666_v16 = vmul.f32 %v7361_v57, %v2474_v28 }
 0x41b   : > { %v4459_v19 = vadd.f32 %v4458_v0, %v4457_v60  ;;  %v4570_v36 = vpop.f32.mrb[115].mxu1  ;;  %v3470_v41 = vld [vmem:[#allocation3 + $0x88] sm:$0xff]  ;;  %3599 = vperm.xlu0 %4725, %v5156_v54   ;;  %v2224_v60 = vmul.f32 %v8340_v3, %v2192_v13  ;;  %v2475_v0 = vld [vmem:[#allocation4 + $0x98] sm:$0xff]  ;;  %v2226_v8 = vmul.f32 %v8341_v29, %v2194_v23 }
 0x41c   : > { %v4571_v6 = vadd.f32 %v4570_v36, %v4569_v17  ;;  %5165 = vrcp.f32 %v3470_v41  ;;  %v3338_v21 = vadd.f32 %v3260_v56, %v2664_v61  ;;  %2445 = vst.msk [vmem:[#allocation3 + $0xa8] sm:$0xff] %vm338_vm1, %v2412_v34 }
 0x41d   : > { %v2350_v7 = vpop.xlane.xlu0 %2349  ;;  %v5158_v12 = vpop.eup %5157 }
 0x41e   : > { %v3263_v37 = vadd.f32 %v4571_v6, %v4459_v19  ;;  %3370 = vst.msk [vmem:[#allocation4 + $0x80] sm:$0xff] %vm403_vm0, %v3338_v21  ;;  %v2414_v44 = vadd.f32 %v2350_v7, %v2222_v2  ;;  %v4460_v1 = vpop.f32.mrb[100].mxu0  ;;  %v4572_v33 = vpop.f32.mrb[116].mxu1  ;;  %3584 = vperm.xlu1 %4726, %v5158_v12   ;;  %v2667_v2 = vmul.f32 %v7350_v15, %v2475_v0 }
 0x41f   : > { %v5160_v46 = vpop.eup %5159  ;;  %v3472_v27 = vld [vmem:[#allocation3 + $0x98] sm:$0xff]  ;;  %v4461_v55 = vpop.f32.mrb[101].mxu0 }
 0x420   : > { %v3339_v24 = vadd.f32 %v3263_v37, %v2665_v62  ;;  %v4573_v42 = vpop.f32.mrb[117].mxu1  ;;  %5167 = vrcp.f32 %v3472_v27  ;;  %2447 = vst.msk [vmem:[#allocation3 + $0xb8] sm:$0xff] %vm338_vm1, %v2414_v44  ;;  %v4462_v35 = vadd.f32 %v4461_v55, %v4460_v1  ;;  %v4463_v26 = vpop.f32.mrb[102].mxu0  ;;  %3609 = vperm.xlu0 %4725, %v5160_v46   ;;  %v2196_v37 = vld [vmem:[#allocation3 + $0xe8] sm:$0xff]  ;;  %v2191_v1 = vld [vmem:[#allocation3 + $0xc0] sm:$0xff] }
 0x421   : > { %v4574_v25 = vadd.f32 %v4573_v42, %v4572_v33  ;;  %v4575_v30 = vpop.f32.mrb[118].mxu1  ;;  %v2360_v17 = vpop.xlane.xlu0 %2359  ;;  %v2476_v33 = vld [vmem:[#allocation4 + $0xa0] sm:$0xff]  ;;  %v2223_v3 = vmul.f32 %v6722_v49, %v2191_v1 }
 0x422   : > { %3371 = vst.msk [vmem:[#allocation4 + $0x88] sm:$0xff] %vm403_vm0, %v3339_v24  ;;  %v4464_v9 = vpop.f32.mrb[103].mxu0  ;;  %v5162_v40 = vpop.eup %5161  ;;  %v2416_v48 = vadd.f32 %v2360_v17, %v2224_v60  ;;  %v2477_v17 = vld [vmem:[#allocation4 + $0xa8] sm:$0xff] }
 0x423   : > { %v3268_v54 = vadd.f32 %v4574_v25, %v4462_v35  ;;  %v4465_v61 = vadd.f32 %v4464_v9, %v4463_v26  ;;  %v4576_v56 = vpop.f32.mrb[119].mxu1  ;;  %v2345_v34 = vpop.xlane.xlu1 %2344  ;;  %v3474_v36 = vld [vmem:[#allocation3 + $0xa8] sm:$0xff]  ;;  %3594 = vperm.xlu1 %4726, %v5162_v40   ;;  %v2228_v35 = vmul.f32 %v6748_v31, %v2196_v37  ;;  %v2668_v9 = vmul.f32 %v7373_v14, %v2476_v33  ;;  %v2197_v37 = vld [vmem:[#allocation3 + $0xf0] sm:$0xff] }
 0x424   : > { %v5164_v19 = vpop.eup %5163  ;;  %v4577_v41 = vadd.f32 %v4576_v56, %v4575_v30  ;;  %v2413_v6 = vadd.f32 %v2345_v34, %v2221_v32  ;;  %5169 = vrcp.f32 %v3474_v36  ;;  %2449 = vst.msk [vmem:[#allocation3 + $0xc8] sm:$0xff] %vm338_vm1, %v2416_v48  ;;  %v2198_v30 = vld [vmem:[#allocation3 + $0xf8] sm:$0xff] }
 0x425   : > { %v3340_v21 = vadd.f32 %v3268_v54, %v2666_v16  ;;  %3619 = vperm.xlu0 %4725, %v5164_v19   ;;  %v2370_v62 = vpop.xlane.xlu0 %2369  ;;  %v4466_v12 = vpop.f32.mrb[104].mxu0  ;;  %v2193_v54 = vld [vmem:[#allocation3 + $0xd0] sm:$0xff]  ;;  %v2230_v49 = vmul.f32 %v7341_v45, %v2198_v30  ;;  %v2669_v19 = vmul.f32 %v7359_v39, %v2477_v17 }
 0x426   : > { %v3271_v57 = vadd.f32 %v4577_v41, %v4465_v61  ;;  %2446 = vst.msk [vmem:[#allocation3 + $0xb0] sm:$0xff] %vm338_vm1, %v2413_v6  ;;  %v5166_v7 = vpop.eup %5165  ;;  %v2418_v13 = vadd.f32 %v2370_v62, %v2226_v8  ;;  %v4578_v44 = vpop.f32.mrb[120].mxu1  ;;  %v2225_v41 = vmul.f32 %v8257_v50, %v2193_v54  ;;  %v2195_v8 = vld [vmem:[#allocation3 + $0xe0] sm:$0xff] }
 0x427   : > { %3372 = vst.msk [vmem:[#allocation4 + $0x90] sm:$0xff] %vm403_vm0, %v3340_v21  ;;  %v3476_v4 = vld [vmem:[#allocation3 + $0xb8] sm:$0xff]  ;;  %3604 = vperm.xlu1 %4726, %v5166_v7   ;;  %v4467_v28 = vpop.f32.mrb[105].mxu0  ;;  %v4579_v27 = vpop.f32.mrb[121].mxu1  ;;  %v2227_v45 = vmul.f32 %v8261_v10, %v2195_v8 }
 0x428   : > { %v3341_v46 = vadd.f32 %v3271_v57, %v2667_v2  ;;  %5171 = vrcp.f32 %v3476_v4  ;;  %2451 = vst.msk [vmem:[#allocation3 + $0xd8] sm:$0xff] %vm338_vm1, %v2418_v13  ;;  %v4468_v15 = vadd.f32 %v4467_v28, %v4466_v12  ;;  %v4580_v24 = vadd.f32 %v4579_v27, %v4578_v44  ;;  %v4469_v55 = vpop.f32.mrb[106].mxu0  ;;  %v4581_v42 = vpop.f32.mrb[122].mxu1 }
 0x429   : > { %v2380_v25 = vpop.xlane.xlu0 %2379  ;;  %v4470_v26 = vpop.f32.mrb[107].mxu0  ;;  %v2229_v44 = vmul.f32 %v7326_v47, %v2197_v37 }
 0x42a   : > { %3373 = vst.msk [vmem:[#allocation4 + $0x98] sm:$0xff] %vm403_vm0, %v3341_v46  ;;  %v5168_v60 = vpop.eup %5167  ;;  %v3276_v23 = vadd.f32 %v4580_v24, %v4468_v15  ;;  %v2420_v32 = vadd.f32 %v2380_v25, %v2228_v35  ;;  %v4471_v40 = vadd.f32 %v4470_v26, %v4469_v55  ;;  %v4582_v0 = vpop.f32.mrb[123].mxu1 }
 0x42b   : > { %v2355_v16 = vpop.xlane.xlu1 %2354  ;;  %v3478_v48 = vld [vmem:[#allocation3 + $0xc8] sm:$0xff]  ;;  %v4583_v61 = vadd.f32 %v4582_v0, %v4581_v42  ;;  %3614 = vperm.xlu1 %4726, %v5168_v60  }
 0x42c   : > { %v2415_v31 = vadd.f32 %v2355_v16, %v2223_v3  ;;  %5173 = vrcp.f32 %v3478_v48  ;;  %v3342_v56 = vadd.f32 %v3276_v23, %v2668_v9  ;;  %2453 = vst.msk [vmem:[#allocation3 + $0xe8] sm:$0xff] %vm338_vm1, %v2420_v32  ;;  %v2478_v23 = vld [vmem:[#allocation4 + $0xb0] sm:$0xff]  ;;  %v2479_v48 = vld [vmem:[#allocation4 + $0xb8] sm:$0xff] }
 0x42d   : > { %v3475_v34 = vld [vmem:[#allocation3 + $0xb0] sm:$0xff]  ;;  %v3279_v14 = vadd.f32 %v4583_v61, %v4471_v40  ;;  %v2390_v36 = vpop.xlane.xlu0 %2389 }
 0x42e   : > { %5175 = vrcp.f32 %v3475_v34  ;;  %2448 = vst.msk [vmem:[#allocation3 + $0xc0] sm:$0xff] %vm338_vm1, %v2415_v31  ;;  %v5170_v6 = vpop.eup %5169  ;;  %v2422_v21 = vadd.f32 %v2390_v36, %v2230_v49  ;;  %v2670_v31 = vmul.f32 %v7379_v22, %v2478_v23  ;;  %v2671_v49 = vmul.f32 %v7371_v53, %v2479_v48 }
 0x42f   : > { %3374 = vst.msk [vmem:[#allocation4 + $0xa0] sm:$0xff] %vm403_vm0, %v3342_v56  ;;  %v2365_v29 = vpop.xlane.xlu1 %2364  ;;  %v3480_v2 = vld [vmem:[#allocation3 + $0xd8] sm:$0xff]  ;;  %v3343_v57 = vadd.f32 %v3279_v14, %v2669_v19  ;;  %3624 = vperm.xlu1 %4726, %v5170_v6   ;;  %v2480_v6 = vld [vmem:[#allocation4 + $0xc0] sm:$0xff] }
 0x430   : > { %v2417_v62 = vadd.f32 %v2365_v29, %v2225_v41  ;;  %5177 = vrcp.f32 %v3480_v2  ;;  %2455 = vst.msk [vmem:[#allocation3 + $0xf8] sm:$0xff] %vm338_vm1, %v2422_v21  ;;  %v2481_v2 = vld [vmem:[#allocation4 + $0xc8] sm:$0xff]  ;;  %v2672_v22 = vmul.f32 %v7383_v51, %v2480_v6 }
 0x431   : > { %3375 = vst.msk [vmem:[#allocation4 + $0xa8] sm:$0xff] %vm403_vm0, %v3343_v57 }
 0x432   : > { %2450 = vst.msk [vmem:[#allocation3 + $0xd0] sm:$0xff] %vm338_vm1, %v2417_v62  ;;  %v5172_v50 = vpop.eup %5171 }
 0x433   : > { %v2375_v39 = vpop.xlane.xlu1 %2374  ;;  %v3482_v7 = vld [vmem:[#allocation3 + $0xe8] sm:$0xff]  ;;  %3634 = vperm.xlu1 %4726, %v5172_v50   ;;  %v2673_v50 = vmul.f32 %v7377_v58, %v2481_v2  ;;  %v3425_v2 = vld [vmem:[#allocation4 + $0x20] sm:$0xff] }
 0x434   : > { %v2419_v13 = vadd.f32 %v2375_v39, %v2227_v45  ;;  %5179 = vrcp.f32 %v3482_v7  ;;  %v2641_v7 = vpop.permute.xlu0 %2640 }
 0x435   : > { %v3477_v12 = vld [vmem:[#allocation3 + $0xc0] sm:$0xff] }
 0x436   : > { %5181 = vrcp.f32 %v3477_v12  ;;  %2452 = vst.msk [vmem:[#allocation3 + $0xe0] sm:$0xff] %vm338_vm1, %v2419_v13  ;;  %v5174_v1 = vpop.eup %5173  ;;  %v2482_v13 = vld [vmem:[#allocation4 + $0xd0] sm:$0xff] }
 0x437   : > { %v2385_v33 = vpop.xlane.xlu1 %2384  ;;  %v3484_v46 = vld [vmem:[#allocation3 + $0xf8] sm:$0xff]  ;;  %3644 = vperm.xlu1 %4726, %v5174_v1  }
 0x438   : > { %v5176_v4 = vpop.eup %5175  ;;  %v2421_v28 = vadd.f32 %v2385_v33, %v2229_v44  ;;  %5183 = vrcp.f32 %v3484_v46  ;;  %v2674_v46 = vmul.f32 %v7387_v18, %v2482_v13 }
 0x439   : > { %v3479_v10 = vld [vmem:[#allocation3 + $0xd0] sm:$0xff]  ;;  %3629 = vperm.xlu0 %4725, %v5176_v4   ;;  %v2483_v4 = vld [vmem:[#allocation4 + $0xd8] sm:$0xff] }
 0x43a   : > { %5185 = vrcp.f32 %v3479_v10  ;;  %2454 = vst.msk [vmem:[#allocation3 + $0xf0] sm:$0xff] %vm338_vm1, %v2421_v28  ;;  %v5178_v27 = vpop.eup %5177  ;;  %v3422_v28 = vld [vmem:[#allocation4 + $0x8] sm:$0xff] }
 0x43b   : > { %3654 = vperm.xlu1 %4726, %v5178_v27   ;;  %v7497_v53 = vpop.permute.xlu1 %2645  ;;  %v3421_v27 = vld [vmem:[#allocation4] sm:$0xff] }
 0x43d   : > { %v3481_v15 = vld [vmem:[#allocation3 + $0xe0] sm:$0xff] }
 0x43e   : > { %5187 = vrcp.f32 %v3481_v15  ;;  %v5180_v24 = vpop.eup %5179 }
 0x43f   : > { %3664 = vperm.xlu1 %4726, %v5180_v24  }
 0x440   : > { %v5182_v55 = vpop.eup %5181 }
 0x441   : > { %v3483_v47 = vld [vmem:[#allocation3 + $0xf0] sm:$0xff]  ;;  %3639 = vperm.xlu0 %4725, %v5182_v55  }
 0x442   : > { %5189 = vrcp.f32 %v3483_v47  ;;  %v5184_v42 = vpop.eup %5183  ;;  %v2675_v47 = vmul.f32 %v7381_v63, %v2483_v4  ;;  %v3427_v4 = vld [vmem:[#allocation4 + $0x30] sm:$0xff] }
 0x443   : > { %3674 = vperm.xlu1 %4726, %v5184_v42  }
 0x444   : > { %v5186_v35 = vpop.eup %5185 }
 0x445   : > { %3649 = vperm.xlu0 %4725, %v5186_v35  }
 0x448   : > { %v5188_v25 = vpop.eup %5187 }
 0x449   : > { %3659 = vperm.xlu0 %4725, %v5188_v25  }
 0x44c   : > { %v5190_v26 = vpop.eup %5189 }
 0x44d   : > { %3669 = vperm.xlu0 %4725, %v5190_v26  }
 0x460   : > { %v4472_v30 = vpop.f32.mrb[108].mxu0 }
 0x461   : > { %v4473_v3 = vpop.f32.mrb[109].mxu0 }
 0x462   : > { %v4584_v60 = vpop.f32.mrb[124].mxu1  ;;  %v4474_v17 = vadd.f32 %v4473_v3, %v4472_v30  ;;  %v4475_v9 = vpop.f32.mrb[110].mxu0  ;;  %v2484_v3 = vld [vmem:[#allocation4 + $0xe0] sm:$0xff] }
 0x463   : > { %v4585_v32 = vpop.f32.mrb[125].mxu1  ;;  %v4476_v40 = vpop.f32.mrb[111].mxu0  ;;  %v2676_v63 = vmul.f32 %v7390_v5, %v2484_v3 }
 0x464   : > { %v4586_v0 = vadd.f32 %v4585_v32, %v4584_v60  ;;  %v4587_v16 = vpop.f32.mrb[126].mxu1  ;;  %v4477_v54 = vadd.f32 %v4476_v40, %v4475_v9  ;;  %v2485_v9 = vld [vmem:[#allocation4 + $0xe8] sm:$0xff]  ;;  %v3423_v32 = vld [vmem:[#allocation4 + $0x10] sm:$0xff] }
 0x465   : > { %v4588_v61 = vpop.f32.mrb[127].mxu1 }
 0x466   : > { %v3284_v56 = vadd.f32 %v4586_v0, %v4474_v17  ;;  %v4589_v34 = vadd.f32 %v4588_v61, %v4587_v16  ;;  %v3424_v16 = vld [vmem:[#allocation4 + $0x18] sm:$0xff] }
 0x468   : > { %v3344_v19 = vadd.f32 %v3284_v56, %v2670_v31  ;;  %v3287_v14 = vadd.f32 %v4589_v34, %v4477_v54  ;;  %v2677_v31 = vmul.f32 %v7385_v43, %v2485_v9  ;;  %v8342_v34 = vld [vmem:[#allocation9_spill] sm:$0xff] }
 0x46a   : > { %3376 = vst.msk [vmem:[#allocation4 + $0xb0] sm:$0xff] %vm403_vm0, %v3344_v19  ;;  %v3345_v36 = vadd.f32 %v3287_v14, %v2671_v49  ;;  %v4590_v41 = vpop.f32.mrb[128].mxu1 }
 0x46b   : > { %v4591_v21 = vpop.f32.mrb[129].mxu1 }
 0x46c   : > { %3377 = vst.msk [vmem:[#allocation4 + $0xb8] sm:$0xff] %vm403_vm0, %v3345_v36  ;;  %v4592_v29 = vadd.f32 %v4591_v21, %v4590_v41  ;;  %v4593_v8 = vpop.f32.mrb[130].mxu1  ;;  %v2486_v41 = vld [vmem:[#allocation4 + $0xf0] sm:$0xff] }
 0x46d   : > { %v4594_v57 = vpop.f32.mrb[131].mxu1  ;;  %v2678_v43 = vmul.f32 %v2641_v7, %v2486_v41  ;;  %v3440_v41 = vld [vmem:[#allocation4 + $0x98] sm:$0xff] }
 0x46e   : > { %v3292_v62 = vadd.f32 %v4592_v29, %v7274_v59  ;;  %v4595_v45 = vadd.f32 %v4594_v57, %v4593_v8  ;;  %v2487_v29 = vld [vmem:[#allocation4 + $0xf8] sm:$0xff]  ;;  %v3426_v57 = vld [vmem:[#allocation4 + $0x28] sm:$0xff] }
 0x470   : > { %v3346_v39 = vadd.f32 %v3292_v62, %v2672_v22  ;;  %v3295_v37 = vadd.f32 %v4595_v45, %v7280_v20  ;;  %v3525_v1 = vpop.permute.xlu1 %3524  ;;  %v8343_v62 = vld [vmem:[#allocation11_spill] sm:$0xff] }
 0x471   : > { %v3678_v20 = vmul.f32 %v3525_v1, %v3422_v28  ;;  %v8344_v1 = vld [vmem:[#allocation10_spill] sm:$0xff] }
 0x472   : > { %3378 = vst.msk [vmem:[#allocation4 + $0xc0] sm:$0xff] %vm403_vm0, %v3346_v39  ;;  %v3347_v12 = vadd.f32 %v3295_v37, %v2673_v50  ;;  %v4596_v44 = vpop.f32.mrb[132].mxu1 }
 0x473   : > { %v4597_v33 = vpop.f32.mrb[133].mxu1 }
 0x474   : > { %3379 = vst.msk [vmem:[#allocation4 + $0xc8] sm:$0xff] %vm403_vm0, %v3347_v12  ;;  %v4598_v51 = vadd.f32 %v4597_v33, %v4596_v44  ;;  %v4599_v59 = vpop.f32.mrb[134].mxu1  ;;  %v2679_v12 = vmul.f32 %v7497_v53, %v2487_v29 }
 0x475   : > { %v4600_v58 = vpop.f32.mrb[135].mxu1  ;;  %v3520_v10 = vpop.permute.xlu0 %3519 }
 0x476   : > { %v3300_v15 = vadd.f32 %v4598_v51, %v7296_v38  ;;  %v4601_v24 = vadd.f32 %v4600_v58, %v4599_v59  ;;  %v3677_v55 = vmul.f32 %v3520_v10, %v3421_v27 }
 0x478   : > { %v3348_v42 = vadd.f32 %v3300_v15, %v2674_v46  ;;  %v3303_v35 = vadd.f32 %v4601_v24, %v7299_v11  ;;  %v3709_v25 = vpack.c.bf16 %v3678_v20, %v3677_v55  ;;  %v3428_v46 = vld [vmem:[#allocation4 + $0x38] sm:$0xff]  ;;  %v3429_v20 = vld [vmem:[#allocation4 + $0x40] sm:$0xff]  ;;  %v3430_v15 = vld [vmem:[#allocation4 + $0x48] sm:$0xff] }
 0x47a   : > { %3380 = vst.msk [vmem:[#allocation4 + $0xd0] sm:$0xff] %vm403_vm0, %v3348_v42  ;;  %v3349_v26 = vadd.f32 %v3303_v35, %v2675_v47  ;;  %v4602_v30 = vpop.f32.mrb[136].mxu1  ;;  %v3530_v18 = vpop.permute.xlu0 %3529  ;;  %4633 = vmatprep.mubr.msk.bf16.mxu0 %vm403_vm0, %v3709_v25  ;;  %v3431_v35 = vld [vmem:[#allocation4 + $0x50] sm:$0xff]  ;;  %v3432_v25 = vld [vmem:[#allocation4 + $0x58] sm:$0xff] }
 0x47b   : > { %v4603_v60 = vpop.f32.mrb[137].mxu1  ;;  %v3679_v48 = vmul.f32 %v3530_v18, %v3423_v32 }
 0x47c   : > { %3381 = vst.msk [vmem:[#allocation4 + $0xd8] sm:$0xff] %vm403_vm0, %v3349_v26  ;;  %v4604_v38 = vadd.f32 %v4603_v60, %v4602_v30  ;;  %v4605_v17 = vpop.f32.mrb[138].mxu1 }
 0x47d   : > { %v4606_v23 = vpop.f32.mrb[139].mxu1 }
 0x47e   : > { %v3308_v11 = vadd.f32 %v4604_v38, %v7315_v52  ;;  %v4607_v40 = vadd.f32 %v4606_v23, %v4605_v17  ;;  %v3540_v0 = vpop.permute.xlu0 %3539  ;;  %v3433_v38 = vld [vmem:[#allocation4 + $0x60] sm:$0xff]  ;;  %v3434_v17 = vld [vmem:[#allocation4 + $0x68] sm:$0xff] }
 0x47f   : > { %v3535_v54 = vpop.permute.xlu1 %3534  ;;  %v3681_v39 = vmul.f32 %v3540_v0, %v3425_v2  ;;  %v3436_v0 = vld [vmem:[#allocation4 + $0x78] sm:$0xff]  ;;  %v3442_v2 = vld [vmem:[#allocation4 + $0xa8] sm:$0xff] }
 0x480   : > { %v3680_v61 = vmul.f32 %v3535_v54, %v3424_v16  ;;  %v3350_v56 = vadd.f32 %v3308_v11, %v2676_v63  ;;  %v3311_v49 = vadd.f32 %v4607_v40, %v8342_v34  ;;  %v3435_v40 = vld [vmem:[#allocation4 + $0x70] sm:$0xff]  ;;  %v3438_v34 = vld [vmem:[#allocation4 + $0x88] sm:$0xff] }
 0x482   : > { %v3710_v19 = vpack.c.bf16 %v3680_v61, %v3679_v48  ;;  %3382 = vst.msk [vmem:[#allocation4 + $0xe0] sm:$0xff] %vm403_vm0, %v3350_v56  ;;  %v3351_v14 = vadd.f32 %v3311_v49, %v2677_v31  ;;  %v4608_v36 = vpop.f32.mrb[140].mxu1  ;;  %v3550_v5 = vpop.permute.xlu0 %3549  ;;  %v3437_v31 = vld [vmem:[#allocation4 + $0x80] sm:$0xff] }
 0x483   : > { %v4609_v6 = vpop.f32.mrb[141].mxu1  ;;  %v3683_v58 = vmul.f32 %v3550_v5, %v3427_v4  ;;  %v3439_v5 = vld [vmem:[#allocation4 + $0x90] sm:$0xff] }
 0x484   : > { %4634 = vmatmul.mubr.msk.bf16.vlgmr.msra.gmra.mrb[112].mxu0 %vm403_vm0, %v3710_v19  ;;  %3383 = vst.msk [vmem:[#allocation4 + $0xe8] sm:$0xff] %vm403_vm0, %v3351_v14  ;;  %v4610_v52 = vadd.f32 %v4609_v6, %v4608_v36  ;;  %v4611_v21 = vpop.f32.mrb[142].mxu1  ;;  %v3545_v22 = vpop.permute.xlu1 %3544 }
 0x485   : > { %v4612_v8 = vpop.f32.mrb[143].mxu1  ;;  %v3682_v37 = vmul.f32 %v3545_v22, %v3426_v57 }
 0x486   : > { %v3316_v45 = vadd.f32 %v4610_v52, %v8343_v62  ;;  %v4613_v50 = vadd.f32 %v4612_v8, %v4611_v21  ;;  %v3560_v13 = vpop.permute.xlu0 %3559 }
 0x487   : > { %v3711_v51 = vpack.c.bf16 %v3682_v37, %v3681_v39  ;;  %v3685_v55 = vmul.f32 %v3560_v13, %v3429_v20  ;;  %v3444_v39 = vld [vmem:[#allocation4 + $0xb8] sm:$0xff]  ;;  %v3443_v13 = vld [vmem:[#allocation4 + $0xb0] sm:$0xff] }
 0x488   : > { %v3352_v44 = vadd.f32 %v3316_v45, %v2678_v43  ;;  %v3319_v33 = vadd.f32 %v4613_v50, %v8344_v1  ;;  %v3441_v43 = vld [vmem:[#allocation4 + $0xa0] sm:$0xff] }
 0x489   : > { %4637 = vmatprep.mubr.msk.bf16.mxu0 %vm403_vm0, %v3711_v51 }
 0x48a   : > { %3384 = vst.msk [vmem:[#allocation4 + $0xf0] sm:$0xff] %vm403_vm0, %v3352_v44  ;;  %v3353_v59 = vadd.f32 %v3319_v33, %v2679_v12  ;;  %v3570_v7 = vpop.permute.xlu0 %3569 }
 0x48b   : > { %v3687_v30 = vmul.f32 %v3570_v7, %v3431_v35  ;;  %v3445_v7 = vld [vmem:[#allocation4 + $0xc0] sm:$0xff] }
 0x48c   : > { %3385 = vst.msk [vmem:[#allocation4 + $0xf8] sm:$0xff] %vm403_vm0, %v3353_v59  ;;  %v3446_v59 = vld [vmem:[#allocation4 + $0xc8] sm:$0xff] }
 0x48e   : > { %v3555_v28 = vpop.permute.xlu1 %3554 }
 0x48f   : > { %v3684_v10 = vmul.f32 %v3555_v28, %v3428_v46 }
 0x490   : > { %v3580_v53 = vpop.permute.xlu0 %3579 }
 0x491   : > { %v3712_v27 = vpack.c.bf16 %v3684_v10, %v3683_v58  ;;  %v3689_v23 = vmul.f32 %v3580_v53, %v3433_v38  ;;  %v3448_v10 = vld [vmem:[#allocation4 + $0xd8] sm:$0xff]  ;;  %v3447_v53 = vld [vmem:[#allocation4 + $0xd0] sm:$0xff] }
 0x493   : > { %4638 = vmatmul.mubr.msk.bf16.gmra.mrb[116].mxu0 %vm403_vm0, %v3712_v27  ;;  %v3565_v24 = vpop.permute.xlu1 %3564 }
 0x494   : > { %v3686_v47 = vmul.f32 %v3565_v24, %v3430_v15 }
 0x496   : > { %v3713_v42 = vpack.c.bf16 %v3686_v47, %v3685_v55  ;;  %v3590_v3 = vpop.permute.xlu0 %3589  ;;  %v3450_v47 = vld [vmem:[#allocation4 + $0xe8] sm:$0xff] }
 0x497   : > { %v3691_v54 = vmul.f32 %v3590_v3, %v3435_v40  ;;  %v3452_v3 = vld [vmem:[#allocation4 + $0xf8] sm:$0xff] }
 0x498   : > { %4641 = vmatprep.mubr.msk.bf16.mxu0 %vm403_vm0, %v3713_v42  ;;  %v3449_v42 = vld [vmem:[#allocation4 + $0xe0] sm:$0xff] }
 0x499   : > { %v3575_v26 = vpop.permute.xlu1 %3574 }
 0x49a   : > { %v3688_v18 = vmul.f32 %v3575_v26, %v3432_v25  ;;  %v3600_v32 = vpop.permute.xlu0 %3599 }
 0x49b   : > { %v3693_v19 = vmul.f32 %v3600_v32, %v3437_v31 }
 0x49c   : > { %v3714_v60 = vpack.c.bf16 %v3688_v18, %v3687_v30 }
 0x49d   : > { %v3585_v9 = vpop.permute.xlu1 %3584 }
 0x49e   : > { %4642 = vmatmul.mubr.msk.bf16.gmra.mrb[120].mxu0 %vm403_vm0, %v3714_v60  ;;  %v3690_v63 = vmul.f32 %v3585_v9, %v3434_v17  ;;  %v3451_v60 = vld [vmem:[#allocation4 + $0xf0] sm:$0xff] }
 0x49f   : > { %v3610_v56 = vpop.permute.xlu0 %3609 }
 0x4a0   : > { %v3715_v11 = vpack.c.bf16 %v3690_v63, %v3689_v23  ;;  %v3695_v52 = vmul.f32 %v3610_v56, %v3439_v5  ;;  %v7545_v63 = vld [vmem:[%s7693_s4] ss:$0 sm:$0xff] }
 0x4a2   : > { %v3595_v16 = vpop.permute.xlu1 %3594  ;;  %4645 = vmatprep.mubr.msk.bf16.mxu0 %vm403_vm0, %v3715_v11  ;;  %v3948_v11 = vld [vmem:[%s7540_s18 + $0x10] sm:$0xff] }
 0x4a3   : > { %v3692_v48 = vmul.f32 %v3595_v16, %v3436_v0  ;;  %v3946_v16 = vld [vmem:[%s7540_s18] sm:$0xff] }
 0x4a4   : > { %v3620_v29 = vpop.permute.xlu0 %3619 }
 0x4a5   : > { %v3716_v61 = vpack.c.bf16 %v3692_v48, %v3691_v54  ;;  %v3697_v22 = vmul.f32 %v3620_v29, %v3441_v43  ;;  %v3950_v29 = vld [vmem:[%s7540_s18 + $0x20] sm:$0xff] }
 0x4a6   : > { %v3605_v49 = vpop.permute.xlu1 %3604 }
 0x4a7   : > { %v3694_v14 = vmul.f32 %v3605_v49, %v3438_v34  ;;  %4646 = vmatmul.mubr.msk.bf16.gmra.mrb[124].mxu0 %vm403_vm0, %v3716_v61  ;;  %v3949_v61 = vld [vmem:[%s7540_s18 + $0x18] sm:$0xff]  ;;  %v3947_v49 = vld [vmem:[%s7540_s18 + $0x8] sm:$0xff] }
 0x4a9   : > { %v3717_v36 = vpack.c.bf16 %v3694_v14, %v3693_v19 }
 0x4aa   : > { %v3615_v6 = vpop.permute.xlu1 %3614 }
 0x4ab   : > { %v3696_v21 = vmul.f32 %v3615_v6, %v3440_v41  ;;  %4649 = vmatprep.mubr.msk.bf16.mxu0 %vm403_vm0, %v3717_v36  ;;  %v3952_v6 = vld [vmem:[%s7540_s18 + $0x30] sm:$0xff] }
 0x4ad   : > { %v3718_v8 = vpack.c.bf16 %v3696_v21, %v3695_v52 }
 0x4ae   : > { %v3625_v57 = vpop.permute.xlu1 %3624 }
 0x4af   : > { %v3698_v62 = vmul.f32 %v3625_v57, %v3442_v2  ;;  %4650 = vmatmul.mubr.msk.bf16.gmra.mrb[128].mxu0 %vm403_vm0, %v3718_v8  ;;  %v3953_v2 = vld [vmem:[%s7540_s18 + $0x38] sm:$0xff] }
 0x4b1   : > { %v3719_v45 = vpack.c.bf16 %v3698_v62, %v3697_v22 }
 0x4b2   : > { %v3635_v50 = vpop.permute.xlu1 %3634 }
 0x4b3   : > { %4653 = vmatprep.mubr.msk.bf16.mxu0 %vm403_vm0, %v3719_v45  ;;  %v3700_v44 = vmul.f32 %v3635_v50, %v3444_v39  ;;  %v3951_v45 = vld [vmem:[%s7540_s18 + $0x28] sm:$0xff] }
 0x4b6   : > { %v3645_v37 = vpop.permute.xlu1 %3644 }
 0x4b7   : > { %v3702_v46 = vmul.f32 %v3645_v37, %v3446_v59 }
 0x4b8   : > { %v3630_v12 = vpop.permute.xlu0 %3629 }
 0x4b9   : > { %v3699_v1 = vmul.f32 %v3630_v12, %v3443_v13 }
 0x4ba   : > { %v3655_v51 = vpop.permute.xlu1 %3654 }
 0x4bb   : > { %v3720_v33 = vpack.c.bf16 %v3700_v44, %v3699_v1  ;;  %v3704_v15 = vmul.f32 %v3655_v51, %v3448_v10  ;;  %v3956_v44 = vld [vmem:[%s7540_s18 + $0x50] sm:$0xff]  ;;  %v3954_v51 = vld [vmem:[%s7540_s18 + $0x40] sm:$0xff]  ;;  %v3955_v10 = vld [vmem:[%s7540_s18 + $0x48] sm:$0xff] }
 0x4bd   : > { %4654 = vmatmul.mubr.msk.bf16.gmra.mrb[132].mxu0 %vm403_vm0, %v3720_v33 }
 0x4be   : > { %v3665_v27 = vpop.permute.xlu1 %3664 }
 0x4bf   : > { %v3706_v25 = vmul.f32 %v3665_v27, %v3450_v47 }
 0x4c0   : > { %v3640_v4 = vpop.permute.xlu0 %3639 }
 0x4c1   : > { %v3701_v28 = vmul.f32 %v3640_v4, %v3445_v7  ;;  %v3957_v4 = vld [vmem:[%s7540_s18 + $0x58] sm:$0xff] }
 0x4c2   : > { %v3675_v30 = vpop.permute.xlu1 %3674 }
 0x4c3   : > { %v3721_v58 = vpack.c.bf16 %v3702_v46, %v3701_v28  ;;  %v3708_v17 = vmul.f32 %v3675_v30, %v3452_v3  ;;  %v3961_v30 = vld [vmem:[%s7540_s18 + $0x78] sm:$0xff] }
 0x4c4   : > { %v3650_v20 = vpop.permute.xlu0 %3649 }
 0x4c5   : > { %v3703_v24 = vmul.f32 %v3650_v20, %v3447_v53  ;;  %4657 = vmatprep.mubr.msk.bf16.mxu0 %vm403_vm0, %v3721_v58 }
 0x4c7   : > { %v3722_v55 = vpack.c.bf16 %v3704_v15, %v3703_v24 }
 0x4c8   : > { %v3660_v35 = vpop.permute.xlu0 %3659 }
 0x4c9   : > { %v3705_v26 = vmul.f32 %v3660_v35, %v3449_v42  ;;  %4658 = vmatmul.mubr.msk.bf16.gmra.mrb[136].mxu0 %vm403_vm0, %v3722_v55  ;;  %v3960_v55 = vld [vmem:[%s7540_s18 + $0x70] sm:$0xff]  ;;  %v3958_v35 = vld [vmem:[%s7540_s18 + $0x60] sm:$0xff] }
 0x4cb   : > { %v3723_v18 = vpack.c.bf16 %v3706_v25, %v3705_v26 }
 0x4cc   : > { %v3670_v38 = vpop.permute.xlu0 %3669 }
 0x4cd   : > { %v3707_v9 = vmul.f32 %v3670_v38, %v3451_v60  ;;  %4661 = vmatprep.mubr.msk.bf16.mxu0 %vm403_vm0, %v3723_v18  ;;  %v3959_v38 = vld [vmem:[%s7540_s18 + $0x68] sm:$0xff] }
 0x4cf   : > { %v3724_v23 = vpack.c.bf16 %v3708_v17, %v3707_v9 }
 0x4d1   : > { %4662 = vmatmul.mubr.msk.bf16.gmra.mrb[140].mxu0 %vm403_vm0, %v3724_v23 }
 0x557   : > { %v4635_v32 = vpop.f32.mrb[112].mxu0 }
 0x558   : > { %v3828_v40 = vadd.f32 %v4635_v32, %v7545_v63  ;;  %v3819_v0 = vpop.f32.mrb[113].mxu0 }
 0x559   : > { %v3820_v54 = vadd.f32 %v7545_v63, %v3819_v0  ;;  %v4636_v48 = vpop.f32.mrb[114].mxu0 }
 0x55a   : > { %v3980_v31 = vadd.f32 %v3948_v11, %v3828_v40  ;;  %v3831_v56 = vadd.f32 %v4636_v48, %v7545_v63  ;;  %v3822_v34 = vpop.f32.mrb[115].mxu0  ;;  %v3964_v40 = vld [vmem:[%s7540_s18 + $0x90] sm:$0xff] }
 0x55b   : > { %v3978_v19 = vadd.f32 %v3946_v16, %v3820_v54  ;;  %v3823_v14 = vadd.f32 %v7545_v63, %v3822_v34  ;;  %v3962_v54 = vld [vmem:[%s7540_s18 + $0x80] sm:$0xff] }
 0x55c   : > { %4013 = vst.msk [vmem:[%s7553_s28 + $0x10] sm:$0xff] %vm4010_vm3, %v3980_v31  ;;  %v3981_v36 = vadd.f32 %v3949_v61, %v3831_v56  ;;  %v3965_v31 = vld [vmem:[%s7540_s18 + $0x98] sm:$0xff] }
 0x55d   : > { %4011 = vst.msk [vmem:[%s7553_s28] sm:$0xff] %vm4010_vm3, %v3978_v19  ;;  %v3979_v5 = vadd.f32 %v3947_v49, %v3823_v14  ;;  %v3963_v19 = vld [vmem:[%s7540_s18 + $0x88] sm:$0xff] }
 0x55e   : > { %4014 = vst.msk [vmem:[%s7553_s28 + $0x18] sm:$0xff] %vm4010_vm3, %v3981_v36 }
 0x55f   : > { %4012 = vst.msk [vmem:[%s7553_s28 + $0x8] sm:$0xff] %vm4010_vm3, %v3979_v5 }
 0x566   : > { %v4639_v41 = vpop.f32.mrb[116].mxu0 }
 0x567   : > { %v3844_v52 = vadd.f32 %v4639_v41, %v7545_v63  ;;  %v3835_v21 = vpop.f32.mrb[117].mxu0 }
 0x568   : > { %v3836_v8 = vadd.f32 %v7545_v63, %v3835_v21  ;;  %v4640_v43 = vpop.f32.mrb[118].mxu0 }
 0x569   : > { %v3984_v57 = vadd.f32 %v3952_v6, %v3844_v52  ;;  %v3847_v22 = vadd.f32 %v4640_v43, %v7545_v63  ;;  %v3838_v62 = vpop.f32.mrb[119].mxu0  ;;  %v3968_v52 = vld [vmem:[%s7540_s18 + $0xb0] sm:$0xff] }
 0x56a   : > { %v3982_v50 = vadd.f32 %v3950_v29, %v3836_v8  ;;  %v3839_v39 = vadd.f32 %v7545_v63, %v3838_v62  ;;  %v3966_v8 = vld [vmem:[%s7540_s18 + $0xa0] sm:$0xff] }
 0x56b   : > { %4017 = vst.msk [vmem:[%s7553_s28 + $0x30] sm:$0xff] %vm4010_vm3, %v3984_v57  ;;  %v3985_v37 = vadd.f32 %v3953_v2, %v3847_v22  ;;  %v3969_v57 = vld [vmem:[%s7540_s18 + $0xb8] sm:$0xff] }
 0x56c   : > { %4015 = vst.msk [vmem:[%s7553_s28 + $0x20] sm:$0xff] %vm4010_vm3, %v3982_v50  ;;  %v3983_v13 = vadd.f32 %v3951_v45, %v3839_v39  ;;  %v3967_v50 = vld [vmem:[%s7540_s18 + $0xa8] sm:$0xff] }
 0x56d   : > { %4018 = vst.msk [vmem:[%s7553_s28 + $0x38] sm:$0xff] %vm4010_vm3, %v3985_v37 }
 0x56e   : > { %4016 = vst.msk [vmem:[%s7553_s28 + $0x28] sm:$0xff] %vm4010_vm3, %v3983_v13 }
 0x571   : > { %v4643_v12 = vpop.f32.mrb[120].mxu0 }
 0x572   : > { %v3860_v1 = vadd.f32 %v4643_v12, %v7545_v63  ;;  %v3851_v33 = vpop.f32.mrb[121].mxu0 }
 0x573   : > { %v3852_v59 = vadd.f32 %v7545_v63, %v3851_v33  ;;  %v4644_v7 = vpop.f32.mrb[122].mxu0 }
 0x574   : > { %v3988_v46 = vadd.f32 %v3956_v44, %v3860_v1  ;;  %v3863_v28 = vadd.f32 %v4644_v7, %v7545_v63  ;;  %v3854_v58 = vpop.f32.mrb[123].mxu0  ;;  %v3972_v1 = vld [vmem:[%s7540_s18 + $0xd0] sm:$0xff] }
 0x575   : > { %v3986_v27 = vadd.f32 %v3954_v51, %v3852_v59  ;;  %v3855_v53 = vadd.f32 %v7545_v63, %v3854_v58  ;;  %v3970_v59 = vld [vmem:[%s7540_s18 + $0xc0] sm:$0xff] }
 0x576   : > { %4021 = vst.msk [vmem:[%s7553_s28 + $0x50] sm:$0xff] %vm4010_vm3, %v3988_v46  ;;  %v3989_v20 = vadd.f32 %v3957_v4, %v3863_v28  ;;  %v3973_v46 = vld [vmem:[%s7540_s18 + $0xd8] sm:$0xff] }
 0x577   : > { %4019 = vst.msk [vmem:[%s7553_s28 + $0x40] sm:$0xff] %vm4010_vm3, %v3986_v27  ;;  %v3987_v15 = vadd.f32 %v3955_v10, %v3855_v53  ;;  %v3971_v27 = vld [vmem:[%s7540_s18 + $0xc8] sm:$0xff] }
 0x578   : > { %4022 = vst.msk [vmem:[%s7553_s28 + $0x58] sm:$0xff] %vm4010_vm3, %v3989_v20 }
 0x579   : > { %4020 = vst.msk [vmem:[%s7553_s28 + $0x48] sm:$0xff] %vm4010_vm3, %v3987_v15 }
 0x57a   : > { %v4647_v24 = vpop.f32.mrb[124].mxu0 }
 0x57b   : > { %v3876_v47 = vadd.f32 %v4647_v24, %v7545_v63  ;;  %v3867_v42 = vpop.f32.mrb[125].mxu0 }
 0x57c   : > { %v3868_v25 = vadd.f32 %v7545_v63, %v3867_v42  ;;  %v4648_v26 = vpop.f32.mrb[126].mxu0 }
 0x57d   : > { %v3992_v18 = vadd.f32 %v3960_v55, %v3876_v47  ;;  %v3879_v3 = vadd.f32 %v4648_v26, %v7545_v63  ;;  %v3870_v60 = vpop.f32.mrb[127].mxu0  ;;  %v3976_v47 = vld [vmem:[%s7540_s18 + $0xf0] sm:$0xff] }
 0x57e   : > { %v3990_v17 = vadd.f32 %v3958_v35, %v3868_v25  ;;  %v3871_v9 = vadd.f32 %v7545_v63, %v3870_v60  ;;  %v3974_v25 = vld [vmem:[%s7540_s18 + $0xe0] sm:$0xff] }
 0x57f   : > { %4025 = vst.msk [vmem:[%s7553_s28 + $0x70] sm:$0xff] %vm4010_vm3, %v3992_v18  ;;  %v3993_v23 = vadd.f32 %v3961_v30, %v3879_v3  ;;  %v3977_v18 = vld [vmem:[%s7540_s18 + $0xf8] sm:$0xff] }
 0x580   : > { %4023 = vst.msk [vmem:[%s7553_s28 + $0x60] sm:$0xff] %vm4010_vm3, %v3990_v17  ;;  %v3991_v32 = vadd.f32 %v3959_v38, %v3871_v9  ;;  %v3975_v17 = vld [vmem:[%s7540_s18 + $0xe8] sm:$0xff] }
 0x581   : > { %4026 = vst.msk [vmem:[%s7553_s28 + $0x78] sm:$0xff] %vm4010_vm3, %v3993_v23 }
 0x582   : > { %4024 = vst.msk [vmem:[%s7553_s28 + $0x68] sm:$0xff] %vm4010_vm3, %v3991_v32  ;;  %v4651_v11 = vpop.f32.mrb[128].mxu0 }
 0x583   : > { %v3892_v0 = vadd.f32 %v4651_v11, %v7545_v63  ;;  %v3883_v16 = vpop.f32.mrb[129].mxu0 }
 0x584   : > { %v3884_v48 = vadd.f32 %v7545_v63, %v3883_v16  ;;  %v4652_v61 = vpop.f32.mrb[130].mxu0 }
 0x585   : > { %v3996_v56 = vadd.f32 %v3964_v40, %v3892_v0  ;;  %v3895_v34 = vadd.f32 %v4652_v61, %v7545_v63  ;;  %v3886_v49 = vpop.f32.mrb[131].mxu0 }
 0x586   : > { %v3994_v14 = vadd.f32 %v3962_v54, %v3884_v48  ;;  %v3887_v36 = vadd.f32 %v7545_v63, %v3886_v49 }
 0x587   : > { %4029 = vst.msk [vmem:[%s7553_s28 + $0x90] sm:$0xff] %vm4010_vm3, %v3996_v56  ;;  %v3997_v5 = vadd.f32 %v3965_v31, %v3895_v34 }
 0x588   : > { %4027 = vst.msk [vmem:[%s7553_s28 + $0x80] sm:$0xff] %vm4010_vm3, %v3994_v14  ;;  %v3995_v41 = vadd.f32 %v3963_v19, %v3887_v36 }
 0x589   : > { %4030 = vst.msk [vmem:[%s7553_s28 + $0x98] sm:$0xff] %vm4010_vm3, %v3997_v5 }
 0x58a   : > { %4028 = vst.msk [vmem:[%s7553_s28 + $0x88] sm:$0xff] %vm4010_vm3, %v3995_v41 }
 0x590   : > { %v4655_v6 = vpop.f32.mrb[132].mxu0 }
 0x591   : > { %v3908_v21 = vadd.f32 %v4655_v6, %v7545_v63  ;;  %v3899_v29 = vpop.f32.mrb[133].mxu0 }
 0x592   : > { %v3900_v43 = vadd.f32 %v7545_v63, %v3899_v29  ;;  %v4656_v2 = vpop.f32.mrb[134].mxu0 }
 0x593   : > { %v4000_v22 = vadd.f32 %v3968_v52, %v3908_v21  ;;  %v3911_v62 = vadd.f32 %v4656_v2, %v7545_v63  ;;  %v3902_v45 = vpop.f32.mrb[135].mxu0 }
 0x594   : > { %v3998_v39 = vadd.f32 %v3966_v8, %v3900_v43  ;;  %v3903_v37 = vadd.f32 %v7545_v63, %v3902_v45 }
 0x595   : > { %4033 = vst.msk [vmem:[%s7553_s28 + $0xb0] sm:$0xff] %vm4010_vm3, %v4000_v22  ;;  %v4001_v13 = vadd.f32 %v3969_v57, %v3911_v62 }
 0x596   : > { %4031 = vst.msk [vmem:[%s7553_s28 + $0xa0] sm:$0xff] %vm4010_vm3, %v3998_v39  ;;  %v3999_v12 = vadd.f32 %v3967_v50, %v3903_v37 }
 0x597   : > { %4034 = vst.msk [vmem:[%s7553_s28 + $0xb8] sm:$0xff] %vm4010_vm3, %v4001_v13 }
 0x598   : > { %4032 = vst.msk [vmem:[%s7553_s28 + $0xa8] sm:$0xff] %vm4010_vm3, %v3999_v12 }
 0x59c   : > { %v4659_v44 = vpop.f32.mrb[136].mxu0 }
 0x59d   : > { %v3924_v33 = vadd.f32 %v4659_v44, %v7545_v63  ;;  %v3915_v51 = vpop.f32.mrb[137].mxu0 }
 0x59e   : > { %v3916_v7 = vadd.f32 %v7545_v63, %v3915_v51  ;;  %v4660_v4 = vpop.f32.mrb[138].mxu0 }
 0x59f   : > { %v4004_v28 = vadd.f32 %v3972_v1, %v3924_v33  ;;  %v3927_v58 = vadd.f32 %v4660_v4, %v7545_v63  ;;  %v3918_v10 = vpop.f32.mrb[139].mxu0 }
 0x5a0   : > { %v4002_v53 = vadd.f32 %v3970_v59, %v3916_v7  ;;  %v3919_v20 = vadd.f32 %v7545_v63, %v3918_v10 }
 0x5a1   : > { %4037 = vst.msk [vmem:[%s7553_s28 + $0xd0] sm:$0xff] %vm4010_vm3, %v4004_v28  ;;  %v4005_v15 = vadd.f32 %v3973_v46, %v3927_v58 }
 0x5a2   : > { %4035 = vst.msk [vmem:[%s7553_s28 + $0xc0] sm:$0xff] %vm4010_vm3, %v4002_v53  ;;  %v4003_v24 = vadd.f32 %v3971_v27, %v3919_v20 }
 0x5a3   : > { %4038 = vst.msk [vmem:[%s7553_s28 + $0xd8] sm:$0xff] %vm4010_vm3, %v4005_v15 }
 0x5a4   : > { %4036 = vst.msk [vmem:[%s7553_s28 + $0xc8] sm:$0xff] %vm4010_vm3, %v4003_v24  ;;  %v4663_v55 = vpop.f32.mrb[140].mxu0 }
 0x5a5   : > { %v3940_v42 = vadd.f32 %v4663_v55, %v7545_v63  ;;  %v3931_v35 = vpop.f32.mrb[141].mxu0 }
 0x5a6   : > { %v3932_v26 = vadd.f32 %v7545_v63, %v3931_v35  ;;  %v4664_v30 = vpop.f32.mrb[142].mxu0 }
 0x5a7   : > { %v4008_v3 = vadd.f32 %v3976_v47, %v3940_v42  ;;  %v3943_v60 = vadd.f32 %v4664_v30, %v7545_v63  ;;  %v3934_v38 = vpop.f32.mrb[143].mxu0 }
 0x5a8   : > { %v4006_v9 = vadd.f32 %v3974_v25, %v3932_v26  ;;  %v3935_v23 = vadd.f32 %v7545_v63, %v3934_v38 }
 0x5a9   : > { %4041 = vst.msk [vmem:[%s7553_s28 + $0xf0] sm:$0xff] %vm4010_vm3, %v4008_v3  ;;  %v4009_v32 = vadd.f32 %v3977_v18, %v3943_v60 }
 0x5aa   : > { %4039 = vst.msk [vmem:[%s7553_s28 + $0xe0] sm:$0xff] %vm4010_vm3, %v4006_v9  ;;  %v4007_v11 = vadd.f32 %v3975_v17, %v3935_v23 }
 0x5ab   : > { %4042 = vst.msk [vmem:[%s7553_s28 + $0xf8] sm:$0xff] %vm4010_vm3, %v4009_v32 }
 0x5ac   : > { %4040 = vst.msk [vmem:[%s7553_s28 + $0xe8] sm:$0xff] %vm4010_vm3, %v4007_v11 }
 0x5ad PF: > { %s16_s23 = sadd.s32 1, %s5213_s23   ;;  %s8345_s21 = smov %s5209_s22 }
 0x5ae   : > { %p13_p5 = scmp.ge.s32.totalorder %s16_s23, 4   ;;  %s8346_s22 = smov %s8348_s24 }
 0x5b0   :  { %15 = sbr.rel (!%p13_p5) target bundleno = 2 (0x2), region = 91 }

</bundles_post_ra>
